<compile_context>
chip_gen: v7x
topology: tpu7x:2x2x1
jax: 0.10.0
libtpu: 0.0.40
codegen_flags: <defaults>
</compile_context>

<pallas_src>
import functools

import jax
import jax.numpy as jnp
from jax import lax
from jax.experimental import pallas as pl
from jax.experimental.pallas import tpu as pltpu


def _round_up(v, m):
    return (v + m - 1) // m * m


# ----------------------------------------------------------------------------
# Kernel 1: weight-side precompute (one 256-row slab of G per grid step k).
#   G[k*256 + a, n] = lut_corr[a, qw[n, k]]
# built as an MXU matmul  lut_corr @ onehot(qw[:, k]).
# ----------------------------------------------------------------------------
def _gather_lut_kernel(qpw_ref, wt_ref, lutc_ref, g_ref):
    s_w = qpw_ref[0]
    zp_w = qpw_ref[1]
    k = pl.program_id(0)

    w_row = wt_ref[pl.ds(k, 1), :]                                # (1, Np)
    qw = jnp.clip(jnp.round(w_row / s_w) + zp_w, 0.0, 255.0)      # float codes

    npad = w_row.shape[1]
    code = lax.broadcasted_iota(jnp.int32, (256, npad), 0).astype(jnp.float32)
    ow = (qw == code).astype(jnp.float32)                         # (256, Np)
    # G_k[a, n] = sum_c lut_corr[a, c] * (qw[n] == c) = lut_corr[a, qw[n]]
    g_ref[...] = jnp.dot(lutc_ref[...], ow,
                         preferred_element_type=jnp.float32)


# ----------------------------------------------------------------------------
# Kernel 2: activation path.  One wide matmul per (M, N) tile.
# ----------------------------------------------------------------------------
def _lut_linear_kernel(qp_ref, x_ref, r_ref, g_ref, b_ref, o_ref):
    s_x = qp_ref[0]
    zp_x = qp_ref[1]
    s_out = qp_ref[2]           # s_x * s_w

    x = x_ref[...]                                                # (tm, K)
    qx = jnp.clip(jnp.round(x / s_x) + zp_x, 0.0, 255.0)          # float codes

    # Expand codes across the K*256 reduction axis with a 0/1 selector matmul
    # (avoids an in-kernel relayout):  code_exp[m, k*256 + a] = qx[m, k].
    code_exp = jnp.dot(qx, r_ref[...],
                       preferred_element_type=jnp.float32)        # (tm, K*256)
    lane = lax.broadcasted_iota(jnp.int32, code_exp.shape, 1)
    a_idx = (lane & 255).astype(jnp.float32)
    ox = (code_exp == a_idx).astype(jnp.float32)                  # one-hots

    acc = jnp.dot(ox, g_ref[...],
                  preferred_element_type=jnp.float32)             # (tm, tn)
    o_ref[...] = (s_out * acc + b_ref[...]).astype(o_ref.dtype)


# ----------------------------------------------------------------------------
# Host-side glue
# ----------------------------------------------------------------------------
def _dyn_uint8_params(t):
    """Dynamic asymmetric uint8 quantization params (per-tensor)."""
    rmin = jnp.minimum(jnp.min(t), 0.0)
    rmax = jnp.maximum(jnp.max(t), 0.0)
    scale = jnp.maximum((rmax - rmin) / 255.0, 1e-8)
    zp = jnp.clip(jnp.round(-rmin / scale), 0.0, 255.0)
    return scale.astype(jnp.float32), zp.astype(jnp.float32)


@functools.partial(jax.jit, static_argnames=("qmethod",))
def linear_uint8_ste(x, weight, lut, bias=None, qmethod="dynamic",
                     qparams=None):
    M, K = x.shape
    N = weight.shape[0]
    x = x.astype(jnp.float32)
    weight = weight.astype(jnp.float32)
    lut = lut.astype(jnp.float32)

    if qmethod == "dynamic":
        s_x, zp_x = _dyn_uint8_params(x)
        s_w, zp_w = _dyn_uint8_params(weight)
    else:  # 'static': qparams = (s_x, zp_x, s_w, zp_w)
        s_x, zp_x, s_w, zp_w = [jnp.asarray(p, jnp.float32) for p in qparams]

    # Tile sizes: lane-dense output (tn multiple of 128), sublane-aligned tm.
    tn = 128
    n_pad = _round_up(N, tn)
    tm = _round_up(M if M <= 128 else 128, 8)
    m_pad = _round_up(M, tm)
    kc = K * 256

    # --- zero-point correction folded into the LUT (tiny, once per call) ----
    codes = jnp.arange(256, dtype=jnp.float32)
    lut_corr = (lut - zp_x * codes[None, :] - zp_w * codes[:, None]
                + zp_x * zp_w)

    # --- weight-gathered corrected LUT G (weight-side work, amortizable) ----
    w_t = jnp.zeros((K, n_pad), jnp.float32).at[:, :N].set(weight.T)
    qpw = jnp.stack([s_w, zp_w])
    g = pl.pallas_call(
        _gather_lut_kernel,
        out_shape=jax.ShapeDtypeStruct((kc, n_pad), jnp.float32),
        grid=(K,),
        in_specs=[
            pl.BlockSpec(memory_space=pltpu.MemorySpace.SMEM),    # s_w, zp_w
            pl.BlockSpec((K, n_pad), lambda k: (0, 0)),           # W^T (resident)
            pl.BlockSpec((256, 256), lambda k: (0, 0)),           # lut_corr
        ],
        out_specs=pl.BlockSpec((256, n_pad), lambda k: (k, 0)),
        compiler_params=pltpu.CompilerParams(
            dimension_semantics=("parallel",)),
    )(qpw, w_t, lut_corr)

    # --- 0/1 selector for expanding activation codes: R[k, c] = (c//256 == k)
    r = (jnp.arange(kc, dtype=jnp.int32)[None, :] // 256
         == jnp.arange(K, dtype=jnp.int32)[:, None]).astype(jnp.float32)

    x_pad = jnp.zeros((m_pad, K), jnp.float32).at[:M, :].set(x)
    b_pad = jnp.zeros((1, n_pad), jnp.float32)
    if bias is not None:
        b_pad = b_pad.at[0, :N].set(bias.astype(jnp.float32))
    qp = jnp.stack([s_x, zp_x, s_x * s_w])

    out = pl.pallas_call(
        _lut_linear_kernel,
        out_shape=jax.ShapeDtypeStruct((m_pad, n_pad), jnp.float32),
        grid=(m_pad // tm, n_pad // tn),
        in_specs=[
            pl.BlockSpec(memory_space=pltpu.MemorySpace.SMEM),    # qparams
            pl.BlockSpec((tm, K), lambda i, j: (i, 0)),           # x tile
            pl.BlockSpec((K, kc), lambda i, j: (0, 0)),           # R (resident)
            pl.BlockSpec((kc, tn), lambda i, j: (0, j)),          # G column tile
            pl.BlockSpec((1, tn), lambda i, j: (0, j)),           # bias tile
        ],
        out_specs=pl.BlockSpec((tm, tn), lambda i, j: (i, j)),
        compiler_params=pltpu.CompilerParams(
            dimension_semantics=("parallel", "parallel"),
            vmem_limit_bytes=32 * 1024 * 1024),
    )(qp, x_pad, r, g, b_pad)

    return out[:M, :N]


def _reference(x, weight, lut, bias):
    """Plain-JAX reference of the same quantized LUT linear (for checking)."""
    s_x, zp_x = _dyn_uint8_params(x)
    s_w, zp_w = _dyn_uint8_params(weight)
    qx = jnp.clip(jnp.round(x / s_x) + zp_x, 0, 255).astype(jnp.int32)
    qw = jnp.clip(jnp.round(weight / s_w) + zp_w, 0, 255).astype(jnp.int32)
    K = x.shape[1]
    acc = lut[qx[:, None, :], qw[None, :, :]].sum(axis=-1)
    corr = (acc
            - zp_x * qw.sum(axis=1)[None, :]
            - zp_w * qx.sum(axis=1)[:, None]
            + K * zp_x * zp_w)
    out = s_x * s_w * corr
    if bias is not None:
        out = out + bias[None, :]
    return out


# ----------------------------------------------------------------------------
# Main
# ----------------------------------------------------------------------------
if __name__ == "__main__":
    # small shapes consistent with nn.Linear: batch=8, in=32, out=16
    batch, in_features, out_features = 8, 32, 16

    key = jax.random.PRNGKey(0)
    kx, kw, kb = jax.random.split(key, 3)

    x = jax.random.normal(kx, (batch, in_features), jnp.float32)

    bound = 1.0 / (in_features ** 0.5)
    weight = jax.random.uniform(kw, (out_features, in_features), jnp.float32,
                                -bound, bound)
    bias = jax.random.uniform(kb, (out_features,), jnp.float32, -bound, bound)

    # TODO(synk): approxtorch ships measured approximate-multiplier LUTs; we
    # build an exact-product 256x256 LUT deterministically instead of loading.
    codes = jnp.arange(256, dtype=jnp.float32)
    lut = jnp.outer(codes, codes)                     # (256, 256) float32

    y = linear_uint8_ste(x, weight, lut, bias, qmethod="dynamic")
    y = jax.block_until_ready(y)

    y_ref = _reference(x, weight, lut, bias)
    assert y.shape == (batch, out_features)
    assert jnp.allclose(y, y_ref, atol=1e-3, rtol=1e-3), (
        f"max abs err {jnp.max(jnp.abs(y - y_ref))}")

    print("KERNEL_OK")
</pallas_src>

<mosaic_0001>
module attributes {stable_mosaic.version = 11 : i64} {
  func.func @_gather_lut_kernel(%arg0: i32, %arg1: memref<2xf32, #tpu.memory_space<smem>>, %arg2: memref<32x128xf32, #tpu.memory_space<vmem>>, %arg3: memref<256x256xf32, #tpu.memory_space<vmem>>, %arg4: memref<256x128xf32, #tpu.memory_space<vmem>>) attributes {dimension_semantics = [#tpu.dimension_semantics<parallel>], iteration_bounds = array<i64: 32>, scalar_prefetch = 0 : i64, scratch_operands = 0 : i64, tpu.core_type = #tpu.core_type<tc>, window_params = [{transform_indices = @transform_0, window_bounds = array<i64: 2>}, {pipeline_mode = #tpu.pipeline_mode<synchronous>, transform_indices = @transform_1, window_bounds = array<i64: 32, 128>}, {pipeline_mode = #tpu.pipeline_mode<synchronous>, transform_indices = @transform_2, window_bounds = array<i64: 256, 256>}, {transform_indices = @transform_3, window_bounds = array<i64: 256, 128>}]} {
    %c0 = arith.constant 0 : index
    %0 = memref.load %arg1[%c0] : memref<2xf32, #tpu.memory_space<smem>>
    %c1 = arith.constant 1 : index
    %1 = memref.load %arg1[%c1] : memref<2xf32, #tpu.memory_space<smem>>
    %2 = arith.index_cast %arg0 : i32 to index
    %c0_0 = arith.constant 0 : index
    %3 = vector.load %arg2[%2, %c0_0] : memref<32x128xf32, #tpu.memory_space<vmem>>, vector<1x128xf32>
    %4 = vector.broadcast %0 : f32 to vector<1x128xf32>
    %5 = arith.divf %3, %4 : vector<1x128xf32>
    %6 = math.roundeven %5 : vector<1x128xf32>
    %7 = vector.broadcast %1 : f32 to vector<1x128xf32>
    %8 = arith.addf %6, %7 : vector<1x128xf32>
    %cst = arith.constant 0.000000e+00 : f32
    %cst_1 = arith.constant 2.550000e+02 : f32
    %9 = vector.broadcast %cst : f32 to vector<1x128xf32>
    %10 = arith.maximumf %9, %8 : vector<1x128xf32>
    %11 = vector.broadcast %cst_1 : f32 to vector<1x128xf32>
    %12 = arith.minimumf %11, %10 : vector<1x128xf32>
    %13 = tpu.iota {dimensions = array<i32: 0>} : vector<256x128xi32>
    %14 = arith.sitofp %13 : vector<256x128xi32> to vector<256x128xf32>
    %15 = vector.broadcast %12 : vector<1x128xf32> to vector<256x128xf32>
    %16 = arith.cmpf oeq, %15, %14 : vector<256x128xf32>
    %17 = arith.extui %16 : vector<256x128xi1> to vector<256x128xi32>
    %18 = arith.sitofp %17 : vector<256x128xi32> to vector<256x128xf32>
    %c0_2 = arith.constant 0 : index
    %c0_3 = arith.constant 0 : index
    %19 = vector.load %arg3[%c0_2, %c0_3] : memref<256x256xf32, #tpu.memory_space<vmem>>, vector<256x256xf32>
    %cst_4 = arith.constant dense<0.000000e+00> : vector<256x128xf32>
    %20 = tpu.matmul %19, %18, %cst_4 {dimension_numbers = #tpu.dot_dimension_numbers<[1], [0], [0], [1], [0, 0, 1, 1], [], []>} : vector<256x256xf32>, vector<256x128xf32>, vector<256x128xf32> -> vector<256x128xf32>
    %c0_5 = arith.constant 0 : index
    %c0_6 = arith.constant 0 : index
    %21 = vector.load %arg4[%c0_5, %c0_6] : memref<256x128xf32, #tpu.memory_space<vmem>>, vector<256x128xf32>
    tpu.vector_store %arg4[%c0_5, %c0_6], %20 {strides = array<i32>} : memref<256x128xf32, #tpu.memory_space<vmem>>, vector<256x128xf32>,
    return
  }
  func.func @transform_0(%arg0: i32) -> i32 {
    %c0_i32 = arith.constant 0 : i32
    %c0_i32_0 = arith.constant 0 : i32
    return %c0_i32 : i32
  }
  func.func @transform_1(%arg0: i32) -> (i32, i32) {
    %c0_i32 = arith.constant 0 : i32
    %c0_i32_0 = arith.constant 0 : i32
    %c0_i32_1 = arith.constant 0 : i32
    return %c0_i32, %c0_i32_0 : i32, i32
  }
  func.func @transform_2(%arg0: i32) -> (i32, i32) {
    %c0_i32 = arith.constant 0 : i32
    %c0_i32_0 = arith.constant 0 : i32
    %c0_i32_1 = arith.constant 0 : i32
    return %c0_i32, %c0_i32_0 : i32, i32
  }
  func.func @transform_3(%arg0: i32) -> (i32, i32) {
    %c0_i32 = arith.constant 0 : i32
    %c0_i32_0 = arith.constant 0 : i32
    return %arg0, %c0_i32 : i32, i32
  }
}

module attributes {stable_mosaic.version = 11 : i64} {
  func.func @_lut_linear_kernel(%arg0: i32, %arg1: i32, %arg2: memref<3xf32, #tpu.memory_space<smem>>, %arg3: memref<8x32xf32, #tpu.memory_space<vmem>>, %arg4: memref<32x8192xf32, #tpu.memory_space<vmem>>, %arg5: memref<8192x128xf32, #tpu.memory_space<vmem>>, %arg6: memref<1x128xf32, #tpu.memory_space<vmem>>, %arg7: memref<8x128xf32, #tpu.memory_space<vmem>>) attributes {dimension_semantics = [#tpu.dimension_semantics<parallel>, #tpu.dimension_semantics<parallel>], iteration_bounds = array<i64: 1, 1>, scalar_prefetch = 0 : i64, scratch_operands = 0 : i64, tpu.core_type = #tpu.core_type<tc>, window_params = [{transform_indices = @transform_0, window_bounds = array<i64: 3>}, {transform_indices = @transform_1, window_bounds = array<i64: 8, 32>}, {pipeline_mode = #tpu.pipeline_mode<synchronous>, transform_indices = @transform_2, window_bounds = array<i64: 32, 8192>}, {transform_indices = @transform_3, window_bounds = array<i64: 8192, 128>}, {transform_indices = @transform_4, window_bounds = array<i64: 1, 128>}, {transform_indices = @transform_5, window_bounds = array<i64: 8, 128>}]} {
    %c0 = arith.constant 0 : index
    %0 = memref.load %arg2[%c0] : memref<3xf32, #tpu.memory_space<smem>>
    %c1 = arith.constant 1 : index
    %1 = memref.load %arg2[%c1] : memref<3xf32, #tpu.memory_space<smem>>
    %c2 = arith.constant 2 : index
    %2 = memref.load %arg2[%c2] : memref<3xf32, #tpu.memory_space<smem>>
    %c0_0 = arith.constant 0 : index
    %c0_1 = arith.constant 0 : index
    %3 = vector.load %arg3[%c0_0, %c0_1] : memref<8x32xf32, #tpu.memory_space<vmem>>, vector<8x32xf32>
    %4 = vector.broadcast %0 : f32 to vector<8x32xf32>
    %5 = arith.divf %3, %4 : vector<8x32xf32>
    %6 = math.roundeven %5 : vector<8x32xf32>
    %7 = vector.broadcast %1 : f32 to vector<8x32xf32>
    %8 = arith.addf %6, %7 : vector<8x32xf32>
    %cst = arith.constant 0.000000e+00 : f32
    %cst_2 = arith.constant 2.550000e+02 : f32
    %9 = vector.broadcast %cst : f32 to vector<8x32xf32>
    %10 = arith.maximumf %9, %8 : vector<8x32xf32>
    %11 = vector.broadcast %cst_2 : f32 to vector<8x32xf32>
    %12 = arith.minimumf %11, %10 : vector<8x32xf32>
    %c0_3 = arith.constant 0 : index
    %c0_4 = arith.constant 0 : index
    %13 = vector.load %arg4[%c0_3, %c0_4] : memref<32x8192xf32, #tpu.memory_space<vmem>>, vector<32x8192xf32>
    %cst_5 = arith.constant dense<0.000000e+00> : vector<8x8192xf32>
    %14 = tpu.matmul %12, %13, %cst_5 {dimension_numbers = #tpu.dot_dimension_numbers<[1], [0], [0], [1], [0, 0, 1, 1], [], []>} : vector<8x32xf32>, vector<32x8192xf32>, vector<8x8192xf32> -> vector<8x8192xf32>
    %15 = tpu.iota {dimensions = array<i32: 1>} : vector<8x8192xi32>
    %c255_i32 = arith.constant 255 : i32
    %16 = vector.broadcast %c255_i32 : i32 to vector<8x8192xi32>
    %17 = arith.andi %15, %16 : vector<8x8192xi32>
    %18 = arith.sitofp %17 : vector<8x8192xi32> to vector<8x8192xf32>
    %19 = arith.cmpf oeq, %14, %18 : vector<8x8192xf32>
    %20 = arith.extui %19 : vector<8x8192xi1> to vector<8x8192xi32>
    %21 = arith.sitofp %20 : vector<8x8192xi32> to vector<8x8192xf32>
    %c0_6 = arith.constant 0 : index
    %c0_7 = arith.constant 0 : index
    %22 = vector.load %arg5[%c0_6, %c0_7] : memref<8192x128xf32, #tpu.memory_space<vmem>>, vector<8192x128xf32>
    %cst_8 = arith.constant dense<0.000000e+00> : vector<8x128xf32>
    %23 = tpu.matmul %21, %22, %cst_8 {dimension_numbers = #tpu.dot_dimension_numbers<[1], [0], [0], [1], [0, 0, 1, 1], [], []>} : vector<8x8192xf32>, vector<8192x128xf32>, vector<8x128xf32> -> vector<8x128xf32>
    %24 = vector.broadcast %2 : f32 to vector<8x128xf32>
    %25 = arith.mulf %24, %23 : vector<8x128xf32>
    %c0_9 = arith.constant 0 : index
    %c0_10 = arith.constant 0 : index
    %26 = vector.load %arg6[%c0_9, %c0_10] : memref<1x128xf32, #tpu.memory_space<vmem>>, vector<1x128xf32>
    %27 = vector.broadcast %26 : vector<1x128xf32> to vector<8x128xf32>
    %28 = arith.addf %25, %27 : vector<8x128xf32>
    %c0_11 = arith.constant 0 : index
    %c0_12 = arith.constant 0 : index
    %29 = vector.load %arg7[%c0_11, %c0_12] : memref<8x128xf32, #tpu.memory_space<vmem>>, vector<8x128xf32>
    tpu.vector_store %arg7[%c0_11, %c0_12], %28 {strides = array<i32>} : memref<8x128xf32, #tpu.memory_space<vmem>>, vector<8x128xf32>,
    return
  }
  func.func @transform_0(%arg0: i32, %arg1: i32) -> i32 {
    %c0_i32 = arith.constant 0 : i32
    %c0_i32_0 = arith.constant 0 : i32
    return %c0_i32 : i32
  }
  func.func @transform_1(%arg0: i32, %arg1: i32) -> (i32, i32) {
    %c0_i32 = arith.constant 0 : i32
    %c0_i32_0 = arith.constant 0 : i32
    return %arg0, %c0_i32 : i32, i32
  }
  func.func @transform_2(%arg0: i32, %arg1: i32) -> (i32, i32) {
    %c0_i32 = arith.constant 0 : i32
    %c0_i32_0 = arith.constant 0 : i32
    %c0_i32_1 = arith.constant 0 : i32
    return %c0_i32, %c0_i32_0 : i32, i32
  }
  func.func @transform_3(%arg0: i32, %arg1: i32) -> (i32, i32) {
    %c0_i32 = arith.constant 0 : i32
    %c0_i32_0 = arith.constant 0 : i32
    return %c0_i32, %arg1 : i32, i32
  }
  func.func @transform_4(%arg0: i32, %arg1: i32) -> (i32, i32) {
    %c0_i32 = arith.constant 0 : i32
    %c0_i32_0 = arith.constant 0 : i32
    return %c0_i32, %arg1 : i32, i32
  }
  func.func @transform_5(%arg0: i32, %arg1: i32) -> (i32, i32) {
    %c0_i32 = arith.constant 0 : i32
    return %arg0, %arg1 : i32, i32
  }
}

</mosaic_0001>

<bundles_post_ra>
// kernel: linear_uint8_ste.2
= control target key start
LH: loop header
LB: loop body
LE: loop exit
PB: predicated region body
PF: predicated region fallthrough
CT: control target
= control target key end

     0   :  { %8 = vsyncpa [#allocation3], 0  ;;  %s950_s12 = smov 0   ;;  %s1492_s0 = inlined_call_operand.vmem [shape: f32[2], index: 0, kind: input, shape index: {}]   ;;  %s1493_s1 = inlined_call_operand.vmem [shape: f32[32,128], index: 1, kind: input, shape index: {}]   ;;  %s1494_s2 = inlined_call_operand.vmem [shape: f32[256,256], index: 2, kind: input, shape index: {}]   ;;  %s1495_s3 = inlined_call_operand.vmem [shape: f32[8192,128], index: 3, kind: output, shape index: {}]  }
   0x1 LB: > { %s956_s13 = sadd.s32 4294967295, %s925_s12   ;;  %p723_p0 = scmp.ge.s32.totalorder %s925_s12, 1  ;;  %s925_s12 = sphi %s950_s12, %s14_s12  }
   0x2   : > { %p108_p1 = scmp.lt.s32.totalorder %s925_s12, 33  ;;  %s121_s16 = sshll.u32 %s1492_s0, 4  ;;  %s122_s16 = int_to_ptr.vmem [resolvable:$true] %s121_s16 }
   0x3   : > { %p885_p3 = scmp.eq.s32.totalorder %s956_s13, 0  ;;  %s900_s18 = scalar_lea.vmem %s122_s16, 16 }
   0x4   : > { %p963_p2 = pnand %p723_p0, %p108_p1  ;;  %p901_p6 = scmp.ne.s32.totalorder %s122_s16, %s900_s18 }
   0x5   : > { %p908_p10 = scmp.lt.s32.totalorder %s122_s16, %s122_s16  ;;  %p909_p11 = scmp.lt.s32.totalorder %s900_s18, %s900_s18 }
   0x6   : > { %p881_p4 = pneg %p963_p2 }
   0x7   : > { %p910_p12 = por %p909_p11, %p908_p10 }
   0x8   : > { %p882_p5 = pnand %p885_p3, %p881_p4 }
   0xa   : > { %p902_p7 = pneg %p882_p5 }
   0xc   : > { %p903_p8 = pnand %p902_p7, %p901_p6 }
   0xe   : > { %p904_p9 = pneg %p903_p8 }
  0x10   : > { %p911_p13 = pnand %p910_p12, %p904_p9 }
  0x12   : > { %914 = shalt.err (!%p911_p13)
}
  0x13   : > { %s927_s19 = smov [#allocation2]   ;;  %140 = sbr.rel (%p963_p2) target bundleno = 397 (0x18d), region = 32 }
  0x14   : > { %884 = dma.vmem_to_smem (!%p882_p5), %s122_s16, 16, %s927_s19, [#allocation3]  }
  0x1a   : > { %920 = dma.done.wait (%p885_p3), [#allocation3], 16  }
  0x1b   : > { %922 = vsyncadd (%p885_p3), [#allocation3], 4294967280 }
  0x1c   : > { %146 = sfence }
  0x1d   : > { %s166_s20 = sld [smem:[#allocation2]]  ;;  %v344_v0 = vld [vmem:[%s1494_s2 + $0x8] sm:$0xff]  ;;  %v928_v1 = vmov 0.0|0.0   ;;  %s729_s25 = sld [smem:[#allocation2 + $0x1]]  ;;  %v178_v4 = vlaneseq  ;;  %v929_v31 = vmov 1.0|1.0  }
  0x1e   : > { %796 = vmatprep.subr.bf16.mxu0 %v928_v1  ;;  %844 = vmatprep.subr.bf16.mxu1 %v928_v1  ;;  %v376_v2 = vld [vmem:[%s1494_s2 + $0x108] sm:$0xff]  ;;  %s168_s28 = scalar_lea.vmem %s1493_s1, %s956_s13  ;;  %v349_v52 = vld [vmem:[%s1494_s2 + $0x30] sm:$0xff]  ;;  %v354_v58 = vld [vmem:[%s1494_s2 + $0x58] sm:$0xff] }
  0x1f   : > { %471 = vmatprep.mubr.f32.mxu0 %v344_v0  ;;  %551 = vmatprep.mubr.f32.mxu1 %v376_v2  ;;  %v169_v5 = vld [vmem:[%s168_s28] sm:$0x1]  ;;  %v990_v8 = vshrl.u32 %v178_v4, 7  ;;  %v348_v46 = vld [vmem:[%s1494_s2 + $0x28] sm:$0xff]  ;;  %v381_v53 = vld [vmem:[%s1494_s2 + $0x130] sm:$0xff]  ;;  %s727_s28 = sshll.u32 %s956_s13, 5 }
  0x20   : > { %v380_v47 = vld [vmem:[%s1494_s2 + $0x128] sm:$0xff]  ;;  %v386_v59 = vld [vmem:[%s1494_s2 + $0x158] sm:$0xff]  ;;  %v355_v0 = vld [vmem:[%s1494_s2 + $0x60] sm:$0xff]  ;;  %p161_p0 = scmp.lt.s32.totalorder %s727_s28, 1023 }
  0x21   : > { %v180_v12 = vadd.s32 8, %v990_v8  ;;  %v181_v13 = vadd.s32 16, %v990_v8  ;;  %v182_v14 = vadd.s32 24, %v990_v8  ;;  %v245_v16 = vsub.s32 0, %v990_v8  ;;  %v387_v2 = vld [vmem:[%s1494_s2 + $0x160] sm:$0xff]  ;;  %v372_v34 = vld [vmem:[%s1494_s2 + $0xe8] sm:$0xff] }
  0x22   : > { %v211_v17 = vcvt.s32.f32 %v990_v8  ;;  %v183_v18 = vadd.s32 32, %v990_v8  ;;  %v184_v19 = vadd.s32 40, %v990_v8  ;;  %v185_v27 = vadd.s32 48, %v990_v8  ;;  %v404_v35 = vld [vmem:[%s1494_s2 + $0x1e8] sm:$0xff]  ;;  %s1546_s28 = smov (!%p161_p0, %s727_s28), 1023 }
  0x23   : > { %v170_v3 = vstv %s166_s20  ;;  %v174_v9 = vstv %s729_s25  ;;  %v212_v21 = vcvt.s32.f32 %v180_v12  ;;  %v213_v22 = vcvt.s32.f32 %v181_v13  ;;  %s728_s29 = sshll.u32 %s1546_s28, 3 }
  0x24   : > { %898 = vrcp.f32 %v170_v3  ;;  %v214_v23 = vcvt.s32.f32 %v182_v14  ;;  %v215_v25 = vcvt.s32.f32 %v183_v18  ;;  %v216_v26 = vcvt.s32.f32 %v184_v19  ;;  %v361_v14 = vld [vmem:[%s1494_s2 + $0x90] sm:$0xff]  ;;  %s1455_s5 = scalar_lea.vmem %s1495_s3, %s728_s29 }
  0x25   : > { %v186_v28 = vadd.s32 56, %v990_v8  ;;  %v217_v32 = vcvt.s32.f32 %v185_v27  ;;  %v187_v33 = vadd.s32 64, %v990_v8  ;;  %v188_v37 = vadd.s32 72, %v990_v8  ;;  %v367_v27 = vld [vmem:[%s1494_s2 + $0xc0] sm:$0xff] }
  0x26   : > { %v189_v38 = vadd.s32 80, %v990_v8  ;;  %v190_v39 = vadd.s32 88, %v990_v8  ;;  %v191_v44 = vadd.s32 96, %v990_v8  ;;  %v192_v45 = vadd.s32 104, %v990_v8 }
  0x27   : > { %v218_v36 = vcvt.s32.f32 %v186_v28  ;;  %v219_v42 = vcvt.s32.f32 %v187_v33  ;;  %v220_v43 = vcvt.s32.f32 %v188_v37  ;;  %v193_v51 = vadd.s32 112, %v990_v8  ;;  %v399_v28 = vld [vmem:[%s1494_s2 + $0x1c0] sm:$0xff] }
  0x28   : > { %v221_v48 = vcvt.s32.f32 %v189_v38  ;;  %v222_v49 = vcvt.s32.f32 %v190_v39  ;;  %v223_v50 = vcvt.s32.f32 %v191_v44  ;;  %v224_v54 = vcvt.s32.f32 %v192_v45  ;;  %v346_v44 = vld [vmem:[%s1494_s2 + $0x18] sm:$0xff]  ;;  %v377_v45 = vld [vmem:[%s1494_s2 + $0x110] sm:$0xff] }
  0x29   : > { %v194_v55 = vadd.s32 120, %v990_v8  ;;  %v225_v56 = vcvt.s32.f32 %v193_v51  ;;  %v195_v57 = vadd.s32 128, %v990_v8  ;;  %v196_v61 = vadd.s32 136, %v990_v8  ;;  %v382_v51 = vld [vmem:[%s1494_s2 + $0x138] sm:$0xff] }
  0x2a   : > { %v197_v62 = vadd.s32 144, %v990_v8  ;;  %v198_v63 = vadd.s32 152, %v990_v8  ;;  %v201_v13 = vadd.s32 176, %v990_v8  ;;  %v203_v19 = vadd.s32 192, %v990_v8 }
  0x2b   : > { %v226_v60 = vcvt.s32.f32 %v194_v55  ;;  %v227_v3 = vcvt.s32.f32 %v195_v57  ;;  %v228_v4 = vcvt.s32.f32 %v196_v61  ;;  %v208_v33 = vadd.s32 232, %v990_v8  ;;  %v384_v55 = vld [vmem:[%s1494_s2 + $0x148] sm:$0xff]  ;;  %v383_v57 = vld [vmem:[%s1494_s2 + $0x140] sm:$0xff]  ;;  %v385_v61 = vld [vmem:[%s1494_s2 + $0x150] sm:$0xff] }
  0x2c   : > { %v233_v18 = vcvt.s32.f32 %v201_v13  ;;  %v235_v29 = vcvt.s32.f32 %v203_v19  ;;  %v209_v40 = vadd.s32 240, %v990_v8  ;;  %v210_v41 = vadd.s32 248, %v990_v8  ;;  %v394_v13 = vld [vmem:[%s1494_s2 + $0x198] sm:$0xff]  ;;  %v395_v19 = vld [vmem:[%s1494_s2 + $0x1a0] sm:$0xff] }
  0x2d   : > { %v240_v39 = vcvt.s32.f32 %v208_v33  ;;  %v401_v33 = vld [vmem:[%s1494_s2 + $0x1d0] sm:$0xff] }
  0x2e   : > { %v899_v6 = vpop.eup %898 }
  0x2f   : > { %v172_v7 = vmul.f32 %v899_v6, %v169_v5  ;;  %v199_v5 = vadd.s32 160, %v990_v8  ;;  %v200_v6 = vadd.s32 168, %v990_v8 }
  0x31   : > { %v876_v10 = vround.rtne.f32 %v172_v7  ;;  %v231_v12 = vcvt.s32.f32 %v199_v5  ;;  %v357_v5 = vld [vmem:[%s1494_s2 + $0x70] sm:$0xff]  ;;  %v360_v7 = vld [vmem:[%s1494_s2 + $0x88] sm:$0xff] }
  0x33   : > { %v175_v11 = vadd.f32 %v876_v10, %v174_v9  ;;  %v229_v10 = vcvt.s32.f32 %v197_v62  ;;  %v356_v62 = vld [vmem:[%s1494_s2 + $0x68] sm:$0xff] }
  0x34   : > { %v392_v9 = vld [vmem:[%s1494_s2 + $0x188] sm:$0xff] }
  0x35   : > { %v176_v15 = vmax.f32 %v175_v11, 0.0  ;;  %v230_v11 = vcvt.s32.f32 %v198_v63  ;;  %v388_v63 = vld [vmem:[%s1494_s2 + $0x168] sm:$0xff] }
  0x37   : > { %v177_v20 = vmin.f32 %v176_v15, 255.0  ;;  %v393_v15 = vld [vmem:[%s1494_s2 + $0x190] sm:$0xff] }
  0x39   : > { %v999_v24 = vrot.slane %v177_v20, %v245_v16  ;;  %v232_v16 = vcvt.s32.f32 %v200_v6  ;;  %v389_v6 = vld [vmem:[%s1494_s2 + $0x170] sm:$0xff]  ;;  %v366_v20 = vld [vmem:[%s1494_s2 + $0xb8] sm:$0xff] }
  0x3b   : > { %vm247_vm0 = vcmp.eq.f32.partialorder %v999_v24, %v211_v17  ;;  %vm248_vm1 = vcmp.eq.f32.partialorder %v999_v24, %v212_v21  ;;  %vm1006_vm2 = vcmp.eq.f32.partialorder %v999_v24, %v213_v22  ;;  %vm1011_vm3 = vcmp.eq.f32.partialorder %v999_v24, %v214_v23  ;;  %v398_v21 = vld [vmem:[%s1494_s2 + $0x1b8] sm:$0xff] }
  0x3c   : > { %vm797_vm4 = vmpackc.low %vm248_vm1, %vm247_vm0  ;;  %vm1025_vm6 = vcmp.eq.f32.partialorder %v999_v24, %v215_v25  ;;  %vm1030_vm7 = vcmp.eq.f32.partialorder %v999_v24, %v216_v26  ;;  %vm1046_vm9 = vcmp.eq.f32.partialorder %v999_v24, %v217_v32  ;;  %vm1051_vm10 = vcmp.eq.f32.partialorder %v999_v24, %v218_v36 }
  0x3d   : > { %798 = vmatpush1.bf16.msk.msra.mxu0 %vm797_vm4, %v929_v31  ;;  %860 = vmatpush1.bf16.msk.msra.mxu1 %vm797_vm4, %v929_v31  ;;  %vm800_vm5 = vmpackc.low %vm1011_vm3, %vm1006_vm2  ;;  %vm1066_vm12 = vcmp.eq.f32.partialorder %v999_v24, %v219_v42  ;;  %vm1071_vm13 = vcmp.eq.f32.partialorder %v999_v24, %v220_v43  ;;  %vm1085_vm15 = vcmp.eq.f32.partialorder %v999_v24, %v221_v48  ;;  %v202_v17 = vadd.s32 184, %v990_v8  ;;  %v347_v48 = vld [vmem:[%s1494_s2 + $0x20] sm:$0xff] }
  0x3e   : > { %799 = vmatprep.subr.bf16.mxu0 %v928_v1  ;;  %845 = vmatprep.subr.bf16.mxu1 %v928_v1  ;;  %vm803_vm8 = vmpackc.low %vm1030_vm7, %vm1025_vm6  ;;  %vm1090_vm0 = vcmp.eq.f32.partialorder %v999_v24, %v222_v49  ;;  %vm1105_vm2 = vcmp.eq.f32.partialorder %v999_v24, %v223_v50  ;;  %vm1110_vm3 = vcmp.eq.f32.partialorder %v999_v24, %v224_v54  ;;  %v204_v23 = vadd.s32 200, %v990_v8  ;;  %v379_v49 = vld [vmem:[%s1494_s2 + $0x120] sm:$0xff]  ;;  %v350_v50 = vld [vmem:[%s1494_s2 + $0x38] sm:$0xff] }
  0x3f   : > { %vm806_vm11 = vmpackc.low %vm1051_vm10, %vm1046_vm9  ;;  %vm1131_vm6 = vcmp.eq.f32.partialorder %v999_v24, %v226_v60  ;;  %vm1151_vm9 = vcmp.eq.f32.partialorder %v999_v24, %v228_v4  ;;  %v234_v22 = vcvt.s32.f32 %v202_v17  ;;  %v205_v25 = vadd.s32 208, %v990_v8  ;;  %v352_v54 = vld [vmem:[%s1494_s2 + $0x48] sm:$0xff]  ;;  %v353_v60 = vld [vmem:[%s1494_s2 + $0x50] sm:$0xff] }
  0x40   : > { %vm809_vm14 = vmpackc.low %vm1071_vm13, %vm1066_vm12  ;;  %vm1170_vm12 = vcmp.eq.f32.partialorder %v999_v24, %v230_v11  ;;  %v206_v26 = vadd.s32 216, %v990_v8  ;;  %v236_v30 = vcvt.s32.f32 %v204_v23  ;;  %v207_v32 = vadd.s32 224, %v990_v8  ;;  %v343_v8 = vld [vmem:[%s1494_s2] sm:$0xff]  ;;  %v390_v4 = vld [vmem:[%s1494_s2 + $0x178] sm:$0xff] }
  0x41   : > { %801 = vmatpush1.bf16.msk.msra.mxu0 %vm800_vm5, %v929_v31  ;;  %861 = vmatpush1.bf16.msk.msra.mxu1 %vm800_vm5, %v929_v31  ;;  %vm812_vm1 = vmpackc.low %vm1090_vm0, %vm1085_vm15  ;;  %vm1126_vm5 = vcmp.eq.f32.partialorder %v999_v24, %v225_v56  ;;  %vm1190_vm15 = vcmp.eq.f32.partialorder %v999_v24, %v232_v16  ;;  %v237_v36 = vcvt.s32.f32 %v205_v25  ;;  %v241_v42 = vcvt.s32.f32 %v209_v40  ;;  %v351_v56 = vld [vmem:[%s1494_s2 + $0x40] sm:$0xff]  ;;  %v364_v16 = vld [vmem:[%s1494_s2 + $0xa8] sm:$0xff] }
  0x42   : > { %802 = vmatprep.subr.bf16.mxu0 %v928_v1  ;;  %846 = vmatprep.subr.bf16.mxu1 %v928_v1  ;;  %vm815_vm4 = vmpackc.low %vm1110_vm3, %vm1105_vm2  ;;  %vm1211_vm2 = vcmp.eq.f32.partialorder %v999_v24, %v234_v22  ;;  %v238_v37 = vcvt.s32.f32 %v206_v26  ;;  %v239_v38 = vcvt.s32.f32 %v207_v32  ;;  %v242_v43 = vcvt.s32.f32 %v210_v41  ;;  %v391_v11 = vld [vmem:[%s1494_s2 + $0x180] sm:$0xff]  ;;  %v396_v17 = vld [vmem:[%s1494_s2 + $0x1a8] sm:$0xff] }
  0x43   : > { %vm818_vm7 = vmpackc.low %vm1131_vm6, %vm1126_vm5  ;;  %vm1231_vm5 = vcmp.eq.f32.partialorder %v999_v24, %v236_v30  ;;  %v365_v22 = vld [vmem:[%s1494_s2 + $0xb0] sm:$0xff]  ;;  %v368_v25 = vld [vmem:[%s1494_s2 + $0xc8] sm:$0xff] }
  0x44   : > { %v397_v23 = vld [vmem:[%s1494_s2 + $0x1b0] sm:$0xff]  ;;  %v400_v26 = vld [vmem:[%s1494_s2 + $0x1c8] sm:$0xff]  ;;  %v402_v30 = vld [vmem:[%s1494_s2 + $0x1d8] sm:$0xff] }
  0x45   : > { %804 = vmatpush1.bf16.msk.msra.mxu0 %vm803_vm8, %v929_v31  ;;  %862 = vmatpush1.bf16.msk.msra.mxu1 %vm803_vm8, %v929_v31  ;;  %vm1146_vm8 = vcmp.eq.f32.partialorder %v999_v24, %v227_v3  ;;  %v358_v3 = vld [vmem:[%s1494_s2 + $0x78] sm:$0xff]  ;;  %v369_v32 = vld [vmem:[%s1494_s2 + $0xd0] sm:$0xff] }
  0x46   : > { %805 = vmatprep.subr.bf16.mxu0 %v928_v1  ;;  %847 = vmatprep.subr.bf16.mxu1 %v928_v1  ;;  %vm821_vm10 = vmpackc.low %vm1151_vm9, %vm1146_vm8  ;;  %vm274_vm8 = vcmp.eq.f32.partialorder %v999_v24, %v238_v37  ;;  %v403_v37 = vld [vmem:[%s1494_s2 + $0x1e0] sm:$0xff]  ;;  %v373_v40 = vld [vmem:[%s1494_s2 + $0xf0] sm:$0xff] }
  0x47   : > { %v405_v41 = vld [vmem:[%s1494_s2 + $0x1f0] sm:$0xff] }
  0x49   : > { %807 = vmatpush1.bf16.msk.msra.mxu0 %vm806_vm11, %v929_v31  ;;  %863 = vmatpush1.bf16.msk.msra.mxu1 %vm806_vm11, %v929_v31  ;;  %vm1165_vm11 = vcmp.eq.f32.partialorder %v999_v24, %v229_v10  ;;  %v359_v10 = vld [vmem:[%s1494_s2 + $0x80] sm:$0xff] }
  0x4a   : > { %808 = vmatprep.subr.bf16.mxu0 %v928_v1  ;;  %848 = vmatprep.subr.bf16.mxu1 %v928_v1  ;;  %vm824_vm13 = vmpackc.low %vm1170_vm12, %vm1165_vm11  ;;  %vm276_vm11 = vcmp.eq.f32.partialorder %v999_v24, %v240_v39  ;;  %v406_v39 = vld [vmem:[%s1494_s2 + $0x1f8] sm:$0xff] }
  0x4d   : > { %810 = vmatpush1.bf16.msk.msra.mxu0 %vm809_vm14, %v929_v31  ;;  %864 = vmatpush1.bf16.msk.msra.mxu1 %vm809_vm14, %v929_v31  ;;  %vm1185_vm14 = vcmp.eq.f32.partialorder %v999_v24, %v231_v12  ;;  %v362_v12 = vld [vmem:[%s1494_s2 + $0x98] sm:$0xff] }
  0x4e   : > { %811 = vmatprep.subr.bf16.mxu0 %v928_v1  ;;  %849 = vmatprep.subr.bf16.mxu1 %v928_v1  ;;  %vm827_vm0 = vmpackc.low %vm1190_vm15, %vm1185_vm14  ;;  %vm278_vm14 = vcmp.eq.f32.partialorder %v999_v24, %v242_v43 }
  0x51   : > { %813 = vmatpush1.bf16.msk.msra.mxu0 %vm812_vm1, %v929_v31  ;;  %865 = vmatpush1.bf16.msk.msra.mxu1 %vm812_vm1, %v929_v31  ;;  %vm1206_vm1 = vcmp.eq.f32.partialorder %v999_v24, %v233_v18  ;;  %v363_v18 = vld [vmem:[%s1494_s2 + $0xa0] sm:$0xff] }
  0x52   : > { %814 = vmatprep.subr.bf16.mxu0 %v928_v1  ;;  %850 = vmatprep.subr.bf16.mxu1 %v928_v1  ;;  %vm830_vm3 = vmpackc.low %vm1211_vm2, %vm1206_vm1 }
  0x55   : > { %816 = vmatpush1.bf16.msk.msra.mxu0 %vm815_vm4, %v929_v31  ;;  %866 = vmatpush1.bf16.msk.msra.mxu1 %vm815_vm4, %v929_v31  ;;  %vm1226_vm4 = vcmp.eq.f32.partialorder %v999_v24, %v235_v29  ;;  %v370_v29 = vld [vmem:[%s1494_s2 + $0xd8] sm:$0xff] }
  0x56   : > { %817 = vmatprep.subr.bf16.mxu0 %v928_v1  ;;  %851 = vmatprep.subr.bf16.mxu1 %v928_v1  ;;  %vm833_vm6 = vmpackc.low %vm1231_vm5, %vm1226_vm4 }
  0x59   : > { %819 = vmatpush1.bf16.msk.msra.mxu0 %vm818_vm7, %v929_v31  ;;  %867 = vmatpush1.bf16.msk.msra.mxu1 %vm818_vm7, %v929_v31  ;;  %vm273_vm7 = vcmp.eq.f32.partialorder %v999_v24, %v237_v36  ;;  %v371_v36 = vld [vmem:[%s1494_s2 + $0xe0] sm:$0xff] }
  0x5a   : > { %820 = vmatprep.subr.bf16.mxu0 %v928_v1  ;;  %852 = vmatprep.subr.bf16.mxu1 %v928_v1  ;;  %vm836_vm9 = vmpackc.low %vm274_vm8, %vm273_vm7 }
  0x5d   : > { %822 = vmatpush1.bf16.msk.msra.mxu0 %vm821_vm10, %v929_v31  ;;  %868 = vmatpush1.bf16.msk.msra.mxu1 %vm821_vm10, %v929_v31  ;;  %vm275_vm10 = vcmp.eq.f32.partialorder %v999_v24, %v239_v38  ;;  %v374_v38 = vld [vmem:[%s1494_s2 + $0xf8] sm:$0xff] }
  0x5e   : > { %823 = vmatprep.subr.bf16.mxu0 %v928_v1  ;;  %853 = vmatprep.subr.bf16.mxu1 %v928_v1  ;;  %vm839_vm12 = vmpackc.low %vm276_vm11, %vm275_vm10 }
  0x61   : > { %825 = vmatpush1.bf16.msk.msra.mxu0 %vm824_vm13, %v929_v31  ;;  %869 = vmatpush1.bf16.msk.msra.mxu1 %vm824_vm13, %v929_v31  ;;  %vm277_vm13 = vcmp.eq.f32.partialorder %v999_v24, %v241_v42  ;;  %v375_v24 = vld [vmem:[%s1494_s2 + $0x100] sm:$0xff] }
  0x62   : > { %826 = vmatprep.subr.bf16.mxu0 %v928_v1  ;;  %854 = vmatprep.subr.bf16.mxu1 %v928_v1  ;;  %vm842_vm15 = vmpackc.low %vm278_vm14, %vm277_vm13 }
  0x65   : > { %828 = vmatpush1.bf16.msk.msra.mxu0 %vm827_vm0, %v929_v31  ;;  %870 = vmatpush1.bf16.msk.msra.mxu1 %vm827_vm0, %v929_v31 }
  0x66   : > { %829 = vmatprep.subr.bf16.mxu0 %v928_v1  ;;  %855 = vmatprep.subr.bf16.mxu1 %v928_v1 }
  0x69   : > { %831 = vmatpush1.bf16.msk.msra.mxu0 %vm830_vm3, %v929_v31  ;;  %871 = vmatpush1.bf16.msk.msra.mxu1 %vm830_vm3, %v929_v31 }
  0x6a   : > { %832 = vmatprep.subr.bf16.mxu0 %v928_v1  ;;  %856 = vmatprep.subr.bf16.mxu1 %v928_v1 }
  0x6d   : > { %834 = vmatpush1.bf16.msk.msra.mxu0 %vm833_vm6, %v929_v31  ;;  %872 = vmatpush1.bf16.msk.msra.mxu1 %vm833_vm6, %v929_v31 }
  0x6e   : > { %835 = vmatprep.subr.bf16.mxu0 %v928_v1  ;;  %857 = vmatprep.subr.bf16.mxu1 %v928_v1 }
  0x71   : > { %837 = vmatpush1.bf16.msk.msra.mxu0 %vm836_vm9, %v929_v31  ;;  %873 = vmatpush1.bf16.msk.msra.mxu1 %vm836_vm9, %v929_v31 }
  0x72   : > { %838 = vmatprep.subr.bf16.mxu0 %v928_v1  ;;  %858 = vmatprep.subr.bf16.mxu1 %v928_v1 }
  0x75   : > { %840 = vmatpush1.bf16.msk.msra.mxu0 %vm839_vm12, %v929_v31  ;;  %874 = vmatpush1.bf16.msk.msra.mxu1 %vm839_vm12, %v929_v31 }
  0x76   : > { %841 = vmatprep.subr.bf16.mxu0 %v928_v1  ;;  %859 = vmatprep.subr.bf16.mxu1 %v928_v1  ;;  %v378_v1 = vld [vmem:[%s1494_s2 + $0x118] sm:$0xff] }
  0x79   : > { %843 = vmatpush1.bf16.msk.msra.mxu0 %vm842_vm15, %v929_v31  ;;  %875 = vmatpush1.bf16.msk.msra.mxu1 %vm842_vm15, %v929_v31  ;;  %v345_v31 = vld [vmem:[%s1494_s2 + $0x10] sm:$0xff] }
  0x7c   : > { %472 = vmatmul.mubr.f32.vlgmr.msra.gmra.mrb[0].mxu0 %v343_v8  ;;  %552 = vmatmul.mubr.f32.vlgmr.msra.gmra.mrb[0].mxu1 %v375_v24 }
  0x7d   : > { %476 = vmatprep.mubr.f32.mxu0 %v346_v44  ;;  %556 = vmatprep.mubr.f32.mxu1 %v378_v1 }
  0x80   : > { %477 = vmatmul.mubr.f32.gmra.mrb[2].mxu0 %v345_v31  ;;  %557 = vmatmul.mubr.f32.gmra.mrb[2].mxu1 %v377_v45 }
  0x81   : > { %481 = vmatprep.mubr.f32.mxu0 %v348_v46  ;;  %561 = vmatprep.mubr.f32.mxu1 %v380_v47 }
  0x84   : > { %482 = vmatmul.mubr.f32.gmra.mrb[4].mxu0 %v347_v48  ;;  %562 = vmatmul.mubr.f32.gmra.mrb[4].mxu1 %v379_v49 }
  0x85   : > { %486 = vmatprep.mubr.f32.mxu0 %v350_v50  ;;  %566 = vmatprep.mubr.f32.mxu1 %v382_v51 }
  0x88   : > { %487 = vmatmul.mubr.f32.gmra.mrb[6].mxu0 %v349_v52  ;;  %567 = vmatmul.mubr.f32.gmra.mrb[6].mxu1 %v381_v53 }
  0x89   : > { %491 = vmatprep.mubr.f32.mxu0 %v352_v54  ;;  %571 = vmatprep.mubr.f32.mxu1 %v384_v55 }
  0x8c   : > { %492 = vmatmul.mubr.f32.gmra.mrb[8].mxu0 %v351_v56  ;;  %572 = vmatmul.mubr.f32.gmra.mrb[8].mxu1 %v383_v57 }
  0x8d   : > { %496 = vmatprep.mubr.f32.mxu0 %v354_v58  ;;  %576 = vmatprep.mubr.f32.mxu1 %v386_v59 }
  0x90   : > { %497 = vmatmul.mubr.f32.gmra.mrb[10].mxu0 %v353_v60  ;;  %577 = vmatmul.mubr.f32.gmra.mrb[10].mxu1 %v385_v61 }
  0x91   : > { %501 = vmatprep.mubr.f32.mxu0 %v356_v62  ;;  %581 = vmatprep.mubr.f32.mxu1 %v388_v63 }
  0x94   : > { %502 = vmatmul.mubr.f32.gmra.mrb[12].mxu0 %v355_v0  ;;  %582 = vmatmul.mubr.f32.gmra.mrb[12].mxu1 %v387_v2 }
  0x95   : > { %506 = vmatprep.mubr.f32.mxu0 %v358_v3  ;;  %586 = vmatprep.mubr.f32.mxu1 %v390_v4 }
  0x98   : > { %507 = vmatmul.mubr.f32.gmra.mrb[14].mxu0 %v357_v5  ;;  %587 = vmatmul.mubr.f32.gmra.mrb[14].mxu1 %v389_v6 }
  0x99   : > { %511 = vmatprep.mubr.f32.mxu0 %v360_v7  ;;  %591 = vmatprep.mubr.f32.mxu1 %v392_v9 }
  0x9c   : > { %512 = vmatmul.mubr.f32.gmra.mrb[16].mxu0 %v359_v10  ;;  %592 = vmatmul.mubr.f32.gmra.mrb[16].mxu1 %v391_v11 }
  0x9d   : > { %516 = vmatprep.mubr.f32.mxu0 %v362_v12  ;;  %596 = vmatprep.mubr.f32.mxu1 %v394_v13 }
  0xa0   : > { %517 = vmatmul.mubr.f32.gmra.mrb[18].mxu0 %v361_v14  ;;  %597 = vmatmul.mubr.f32.gmra.mrb[18].mxu1 %v393_v15 }
  0xa1   : > { %521 = vmatprep.mubr.f32.mxu0 %v364_v16  ;;  %601 = vmatprep.mubr.f32.mxu1 %v396_v17 }
  0xa4   : > { %522 = vmatmul.mubr.f32.gmra.mrb[20].mxu0 %v363_v18  ;;  %602 = vmatmul.mubr.f32.gmra.mrb[20].mxu1 %v395_v19 }
  0xa5   : > { %526 = vmatprep.mubr.f32.mxu0 %v366_v20  ;;  %606 = vmatprep.mubr.f32.mxu1 %v398_v21 }
  0xa8   : > { %527 = vmatmul.mubr.f32.gmra.mrb[22].mxu0 %v365_v22  ;;  %607 = vmatmul.mubr.f32.gmra.mrb[22].mxu1 %v397_v23 }
  0xa9   : > { %531 = vmatprep.mubr.f32.mxu0 %v368_v25  ;;  %611 = vmatprep.mubr.f32.mxu1 %v400_v26 }
  0xac   : > { %532 = vmatmul.mubr.f32.gmra.mrb[24].mxu0 %v367_v27  ;;  %612 = vmatmul.mubr.f32.gmra.mrb[24].mxu1 %v399_v28 }
  0xad   : > { %536 = vmatprep.mubr.f32.mxu0 %v370_v29  ;;  %616 = vmatprep.mubr.f32.mxu1 %v402_v30 }
  0xb0   : > { %537 = vmatmul.mubr.f32.gmra.mrb[26].mxu0 %v369_v32  ;;  %617 = vmatmul.mubr.f32.gmra.mrb[26].mxu1 %v401_v33 }
  0xb1   : > { %541 = vmatprep.mubr.f32.mxu0 %v372_v34  ;;  %621 = vmatprep.mubr.f32.mxu1 %v404_v35 }
  0xb4   : > { %542 = vmatmul.mubr.f32.gmra.mrb[28].mxu0 %v371_v36  ;;  %622 = vmatmul.mubr.f32.gmra.mrb[28].mxu1 %v403_v37 }
  0xb5   : > { %546 = vmatprep.mubr.f32.mxu0 %v374_v38  ;;  %626 = vmatprep.mubr.f32.mxu1 %v406_v39 }
  0xb8   : > { %547 = vmatmul.mubr.f32.gmra.mrb[30].mxu0 %v373_v40  ;;  %627 = vmatmul.mubr.f32.gmra.mrb[30].mxu1 %v405_v41 }
 0x14f   : > { %v473_v42 = vpop.f32.mrb[0].mxu0  ;;  %v553_v43 = vpop.f32.mrb[0].mxu1 }
 0x150   : > { %632 = vst [vmem:[%s1455_s5] sm:$0xff] %v473_v42  ;;  %648 = vst [vmem:[%s1455_s5 + $0x80] sm:$0xff] %v553_v43  ;;  %v475_v8 = vpop.f32.mrb[1].mxu0  ;;  %v555_v24 = vpop.f32.mrb[1].mxu1 }
 0x153   : > { %v478_v44 = vpop.f32.mrb[2].mxu0  ;;  %v558_v1 = vpop.f32.mrb[2].mxu1 }
 0x154   : > { %633 = vst [vmem:[%s1455_s5 + $0x8] sm:$0xff] %v478_v44  ;;  %649 = vst [vmem:[%s1455_s5 + $0x88] sm:$0xff] %v558_v1  ;;  %v480_v31 = vpop.f32.mrb[3].mxu0  ;;  %v560_v45 = vpop.f32.mrb[3].mxu1 }
 0x157   : > { %v483_v46 = vpop.f32.mrb[4].mxu0  ;;  %v563_v47 = vpop.f32.mrb[4].mxu1 }
 0x158   : > { %634 = vst [vmem:[%s1455_s5 + $0x10] sm:$0xff] %v483_v46  ;;  %650 = vst [vmem:[%s1455_s5 + $0x90] sm:$0xff] %v563_v47  ;;  %v485_v48 = vpop.f32.mrb[5].mxu0  ;;  %v565_v49 = vpop.f32.mrb[5].mxu1 }
 0x15b   : > { %v488_v50 = vpop.f32.mrb[6].mxu0  ;;  %v568_v51 = vpop.f32.mrb[6].mxu1 }
 0x15c   : > { %635 = vst [vmem:[%s1455_s5 + $0x18] sm:$0xff] %v488_v50  ;;  %651 = vst [vmem:[%s1455_s5 + $0x98] sm:$0xff] %v568_v51  ;;  %v490_v52 = vpop.f32.mrb[7].mxu0  ;;  %v570_v53 = vpop.f32.mrb[7].mxu1 }
 0x15f   : > { %v493_v54 = vpop.f32.mrb[8].mxu0  ;;  %v573_v55 = vpop.f32.mrb[8].mxu1 }
 0x160   : > { %636 = vst [vmem:[%s1455_s5 + $0x20] sm:$0xff] %v493_v54  ;;  %652 = vst [vmem:[%s1455_s5 + $0xa0] sm:$0xff] %v573_v55  ;;  %v495_v56 = vpop.f32.mrb[9].mxu0  ;;  %v575_v57 = vpop.f32.mrb[9].mxu1 }
 0x163   : > { %v498_v58 = vpop.f32.mrb[10].mxu0  ;;  %v578_v59 = vpop.f32.mrb[10].mxu1 }
 0x164   : > { %637 = vst [vmem:[%s1455_s5 + $0x28] sm:$0xff] %v498_v58  ;;  %653 = vst [vmem:[%s1455_s5 + $0xa8] sm:$0xff] %v578_v59  ;;  %v500_v60 = vpop.f32.mrb[11].mxu0  ;;  %v580_v61 = vpop.f32.mrb[11].mxu1 }
 0x167   : > { %v503_v62 = vpop.f32.mrb[12].mxu0  ;;  %v583_v63 = vpop.f32.mrb[12].mxu1 }
 0x168   : > { %638 = vst [vmem:[%s1455_s5 + $0x30] sm:$0xff] %v503_v62  ;;  %654 = vst [vmem:[%s1455_s5 + $0xb0] sm:$0xff] %v583_v63  ;;  %v505_v0 = vpop.f32.mrb[13].mxu0  ;;  %v585_v2 = vpop.f32.mrb[13].mxu1 }
 0x16b   : > { %v508_v3 = vpop.f32.mrb[14].mxu0  ;;  %v588_v4 = vpop.f32.mrb[14].mxu1 }
 0x16c   : > { %639 = vst [vmem:[%s1455_s5 + $0x38] sm:$0xff] %v508_v3  ;;  %655 = vst [vmem:[%s1455_s5 + $0xb8] sm:$0xff] %v588_v4  ;;  %v510_v5 = vpop.f32.mrb[15].mxu0  ;;  %v590_v6 = vpop.f32.mrb[15].mxu1 }
 0x16f   : > { %v513_v7 = vpop.f32.mrb[16].mxu0  ;;  %v593_v9 = vpop.f32.mrb[16].mxu1 }
 0x170   : > { %640 = vst [vmem:[%s1455_s5 + $0x40] sm:$0xff] %v513_v7  ;;  %656 = vst [vmem:[%s1455_s5 + $0xc0] sm:$0xff] %v593_v9  ;;  %v515_v10 = vpop.f32.mrb[17].mxu0  ;;  %v595_v11 = vpop.f32.mrb[17].mxu1 }
 0x173   : > { %v518_v12 = vpop.f32.mrb[18].mxu0  ;;  %v598_v13 = vpop.f32.mrb[18].mxu1 }
 0x174   : > { %641 = vst [vmem:[%s1455_s5 + $0x48] sm:$0xff] %v518_v12  ;;  %657 = vst [vmem:[%s1455_s5 + $0xc8] sm:$0xff] %v598_v13  ;;  %v520_v14 = vpop.f32.mrb[19].mxu0  ;;  %v600_v15 = vpop.f32.mrb[19].mxu1 }
 0x177   : > { %v523_v16 = vpop.f32.mrb[20].mxu0  ;;  %v603_v17 = vpop.f32.mrb[20].mxu1 }
 0x178   : > { %642 = vst [vmem:[%s1455_s5 + $0x50] sm:$0xff] %v523_v16  ;;  %658 = vst [vmem:[%s1455_s5 + $0xd0] sm:$0xff] %v603_v17  ;;  %v525_v18 = vpop.f32.mrb[21].mxu0  ;;  %v605_v19 = vpop.f32.mrb[21].mxu1 }
 0x17b   : > { %v528_v20 = vpop.f32.mrb[22].mxu0  ;;  %v608_v21 = vpop.f32.mrb[22].mxu1 }
 0x17c   : > { %643 = vst [vmem:[%s1455_s5 + $0x58] sm:$0xff] %v528_v20  ;;  %659 = vst [vmem:[%s1455_s5 + $0xd8] sm:$0xff] %v608_v21  ;;  %v530_v22 = vpop.f32.mrb[23].mxu0  ;;  %v610_v23 = vpop.f32.mrb[23].mxu1 }
 0x17f   : > { %v533_v25 = vpop.f32.mrb[24].mxu0  ;;  %v613_v26 = vpop.f32.mrb[24].mxu1 }
 0x180   : > { %644 = vst [vmem:[%s1455_s5 + $0x60] sm:$0xff] %v533_v25  ;;  %660 = vst [vmem:[%s1455_s5 + $0xe0] sm:$0xff] %v613_v26  ;;  %v535_v27 = vpop.f32.mrb[25].mxu0  ;;  %v615_v28 = vpop.f32.mrb[25].mxu1 }
 0x183   : > { %v538_v29 = vpop.f32.mrb[26].mxu0  ;;  %v618_v30 = vpop.f32.mrb[26].mxu1 }
 0x184   : > { %645 = vst [vmem:[%s1455_s5 + $0x68] sm:$0xff] %v538_v29  ;;  %661 = vst [vmem:[%s1455_s5 + $0xe8] sm:$0xff] %v618_v30  ;;  %v540_v32 = vpop.f32.mrb[27].mxu0  ;;  %v620_v33 = vpop.f32.mrb[27].mxu1 }
 0x187   : > { %v543_v34 = vpop.f32.mrb[28].mxu0  ;;  %v623_v35 = vpop.f32.mrb[28].mxu1 }
 0x188   : > { %646 = vst [vmem:[%s1455_s5 + $0x70] sm:$0xff] %v543_v34  ;;  %662 = vst [vmem:[%s1455_s5 + $0xf0] sm:$0xff] %v623_v35  ;;  %v545_v36 = vpop.f32.mrb[29].mxu0  ;;  %v625_v37 = vpop.f32.mrb[29].mxu1 }
 0x18b   : > { %v548_v38 = vpop.f32.mrb[30].mxu0  ;;  %v628_v39 = vpop.f32.mrb[30].mxu1 }
 0x18c   : > { %647 = vst [vmem:[%s1455_s5 + $0x78] sm:$0xff] %v548_v38  ;;  %663 = vst [vmem:[%s1455_s5 + $0xf8] sm:$0xff] %v628_v39  ;;  %v550_v40 = vpop.f32.mrb[31].mxu0  ;;  %v630_v41 = vpop.f32.mrb[31].mxu1 }
 0x18d PF: > { %s14_s12 = sadd.s32 1, %s925_s12  }
 0x18e   : > { %p11_p1 = scmp.ge.s32.totalorder %s14_s12, 34  }
 0x190   :  { %13 = sbr.rel (!%p11_p1) target bundleno = 1 (0x1), region = 65 }
 0x197   :  { %686 = vsyncpa [#allocation3], 1 }
 0x198   :  { %688 = vsyncpa [#allocation3 + $0x1], 1 }

// kernel: linear_uint8_ste.3
= control target key start
LH: loop header
LB: loop body
LE: loop exit
PB: predicated region body
PF: predicated region fallthrough
CT: control target
= control target key end

     0   :  { %10 = vsyncpa [#allocation4], 0  ;;  %s13202_s0 = inlined_call_operand.vmem [shape: f32[3], index: 0, kind: input, shape index: {}]   ;;  %s13203_s1 = inlined_call_operand.vmem [shape: f32[8,32], index: 1, kind: input, shape index: {}]   ;;  %s13204_s2 = inlined_call_operand.vmem [shape: f32[32,8192], index: 2, kind: input, shape index: {}]   ;;  %s13205_s3 = inlined_call_operand.vmem [shape: f32[8192,128], index: 3, kind: input, shape index: {}]   ;;  %s13206_s4 = inlined_call_operand.vmem [shape: f32[1,128], index: 4, kind: input, shape index: {}]   ;;  %s13207_s5 = inlined_call_operand.hbm [shape: f32[8,128], index: 5, kind: output, shape index: {}]  }
   0x1   :  { %11 = vsyncpa [#allocation3], 0  ;;  %s18_s20 = sshll.u32 %s13202_s0, 4  ;;  %s19_s20 = int_to_ptr.vmem [resolvable:$true] %s18_s20 }
   0x2   :  { %s8823_s21 = scalar_lea.vmem %s19_s20, 16  ;;  %p8828_p1 = scmp.lt.s32.totalorder %s19_s20, %s19_s20 }
   0x3   :  { %p8824_p0 = scmp.ne.s32.totalorder %s19_s20, %s8823_s21  ;;  %p8829_p2 = scmp.lt.s32.totalorder %s8823_s21, %s8823_s21 }
   0x5   :  { %p8830_p3 = por %p8829_p2, %p8828_p1 }
   0x7   :  { %p8831_p4 = pnand %p8830_p3, %p8824_p0 }
   0x9   :  { %8834 = shalt.err (!%p8831_p4)
}
   0xa   :  { %s8861_s22 = smov [#allocation2]  }
   0xb   :  { %21 = dma.vmem_to_smem %s19_s20, 16, %s8861_s22, [#allocation4]  }
   0xc   :  { %8857 = dma.done.wait [#allocation4], 16  }
   0xd   :  { %8858 = vsyncadd [#allocation4], 4294967280 }
   0xe   :  { %33 = sfence }
   0xf   :  { %v47_v0 = vld [vmem:[%s13204_s2 + $0x8] sm:$0xff]  ;;  %v49_v2 = vld [vmem:[%s13204_s2 + $0x18] sm:$0xff]  ;;  %s8907_s28 = sld [smem:[#allocation2]]  ;;  %v46_v5 = vld [vmem:[%s13204_s2] sm:$0xff]  ;;  %v8862_v7 = vmov 0.0   ;;  %vm302_vm0 = vcmask 261120  }
  0x10   :  { %v111_v1 = vld [vmem:[%s13204_s2 + $0x208] sm:$0xff]  ;;  %v113_v4 = vld [vmem:[%s13204_s2 + $0x218] sm:$0xff]  ;;  %v110_v6 = vld [vmem:[%s13204_s2 + $0x200] sm:$0xff]  ;;  %370 = vmatprep.mubr.f32.mxu0 %v8862_v7  ;;  %441 = vmatprep.mubr.f32.mxu1 %v8862_v7  ;;  %s8864_s8 = smov [#allocation5]  }
  0x11   :  { %v7536_v3 = vpack.c.bf16 %v111_v1, %v47_v0  ;;  %v7544_v8 = vpack.c.bf16 %v113_v4, %v49_v2  ;;  %v7538_v9 = vpack.c.bf16 %v110_v6, %v46_v5  ;;  %v48_v10 = vld [vmem:[%s13204_s2 + $0x10] sm:$0xff]  ;;  %v175_v12 = vld [vmem:[%s13204_s2 + $0x408] sm:$0xff]  ;;  %v177_v15 = vld [vmem:[%s13204_s2 + $0x418] sm:$0xff]  ;;  %s6244_s9 = sshll.u32 %s8864_s8, 4  ;;  %s6245_s9 = int_to_ptr.vmem [resolvable:$true] %s6244_s9 }
  0x12   :  { %v112_v11 = vld [vmem:[%s13204_s2 + $0x210] sm:$0xff]  ;;  %v239_v14 = vld [vmem:[%s13204_s2 + $0x608] sm:$0xff]  ;;  %v241_v16 = vld [vmem:[%s13204_s2 + $0x618] sm:$0xff]  ;;  %p8840_p6 = scmp.lt.s32.totalorder %s6245_s9, %s6245_s9 }
  0x13   :  { %7537 = vmatprep.subr.bf16.mxu0 %v7536_v3  ;;  %v7546_v13 = vpack.c.bf16 %v112_v11, %v48_v10  ;;  %7545 = vmatprep.subr.bf16.mxu1 %v7544_v8  ;;  %v7540_v17 = vpack.c.bf16 %v239_v14, %v175_v12  ;;  %v7548_v18 = vpack.c.bf16 %v241_v16, %v177_v15  ;;  %v174_v19 = vld [vmem:[%s13204_s2 + $0x400] sm:$0xff]  ;;  %v176_v21 = vld [vmem:[%s13204_s2 + $0x410] sm:$0xff]  ;;  %v51_v24 = vld [vmem:[%s13204_s2 + $0x28] sm:$0xff] }
  0x14   :  { %7539 = vmatpush1.bf16.msra.mxu0 %v7538_v9  ;;  %v238_v20 = vld [vmem:[%s13204_s2 + $0x600] sm:$0xff]  ;;  %v240_v23 = vld [vmem:[%s13204_s2 + $0x610] sm:$0xff]  ;;  %v115_v27 = vld [vmem:[%s13204_s2 + $0x228] sm:$0xff] }
  0x15   :  { %7547 = vmatpush1.bf16.msra.mxu1 %v7546_v13  ;;  %v7542_v22 = vpack.c.bf16 %v238_v20, %v174_v19  ;;  %7541 = vmatprep.subr.bf16.mxu0 %v7540_v17  ;;  %v7550_v25 = vpack.c.bf16 %v240_v23, %v176_v21  ;;  %v38_v26 = vstv %s8907_s28  ;;  %v53_v28 = vld [vmem:[%s13204_s2 + $0x38] sm:$0xff]  ;;  %v7552_v30 = vpack.c.bf16 %v115_v27, %v51_v24  ;;  %s6253_s28 = sld [smem:[#allocation2 + $0x1]]  ;;  %v37_v32 = vld [vmem:[%s13203_s1] sm:$0xff]  ;;  %v52_v40 = vld [vmem:[%s13204_s2 + $0x30] sm:$0xff] }
  0x16   :  { %7549 = vmatprep.subr.bf16.mxu1 %v7548_v18  ;;  %v117_v29 = vld [vmem:[%s13204_s2 + $0x238] sm:$0xff]  ;;  %8821 = vrcp.f32 %v38_v26  ;;  %v50_v37 = vld [vmem:[%s13204_s2 + $0x20] sm:$0xff]  ;;  %v116_v41 = vld [vmem:[%s13204_s2 + $0x230] sm:$0xff] }
  0x17   :  { %v7560_v31 = vpack.c.bf16 %v117_v29, %v53_v28  ;;  %v114_v38 = vld [vmem:[%s13204_s2 + $0x220] sm:$0xff]  ;;  %v179_v42 = vld [vmem:[%s13204_s2 + $0x428] sm:$0xff]  ;;  %v181_v44 = vld [vmem:[%s13204_s2 + $0x438] sm:$0xff]  ;;  %v7562_v48 = vpack.c.bf16 %v116_v41, %v52_v40 }
  0x18   :  { %7543 = vmatpush1.bf16.msra.mxu0 %v7542_v22  ;;  %v243_v43 = vld [vmem:[%s13204_s2 + $0x628] sm:$0xff]  ;;  %v245_v45 = vld [vmem:[%s13204_s2 + $0x638] sm:$0xff]  ;;  %v7554_v47 = vpack.c.bf16 %v114_v38, %v50_v37  ;;  %v178_v49 = vld [vmem:[%s13204_s2 + $0x420] sm:$0xff] }
  0x19   :  { %7551 = vmatpush1.bf16.msra.mxu1 %v7550_v25  ;;  %7553 = vmatprep.subr.bf16.mxu0 %v7552_v30  ;;  %v242_v50 = vld [vmem:[%s13204_s2 + $0x620] sm:$0xff]  ;;  %v7556_v52 = vpack.c.bf16 %v243_v43, %v179_v42  ;;  %v7564_v53 = vpack.c.bf16 %v245_v45, %v181_v44  ;;  %v180_v54 = vld [vmem:[%s13204_s2 + $0x430] sm:$0xff]  ;;  %v55_v56 = vld [vmem:[%s13204_s2 + $0x48] sm:$0xff] }
  0x1a   :  { %7561 = vmatprep.subr.bf16.mxu1 %v7560_v31  ;;  %v244_v55 = vld [vmem:[%s13204_s2 + $0x630] sm:$0xff]  ;;  %v119_v57 = vld [vmem:[%s13204_s2 + $0x248] sm:$0xff]  ;;  %v57_v58 = vld [vmem:[%s13204_s2 + $0x58] sm:$0xff]  ;;  %v7558_v60 = vpack.c.bf16 %v242_v50, %v178_v49 }
  0x1b   :  { %v42_v35 = vstv %s6253_s28  ;;  %v121_v59 = vld [vmem:[%s13204_s2 + $0x258] sm:$0xff]  ;;  %v7566_v61 = vpack.c.bf16 %v244_v55, %v180_v54  ;;  %v54_v62 = vld [vmem:[%s13204_s2 + $0x40] sm:$0xff]  ;;  %v7568_v0 = vpack.c.bf16 %v119_v57, %v55_v56  ;;  %v56_v2 = vld [vmem:[%s13204_s2 + $0x50] sm:$0xff] }
  0x1c   :  { %v118_v63 = vld [vmem:[%s13204_s2 + $0x240] sm:$0xff]  ;;  %v7576_v1 = vpack.c.bf16 %v121_v59, %v57_v58  ;;  %v120_v3 = vld [vmem:[%s13204_s2 + $0x250] sm:$0xff]  ;;  %v183_v4 = vld [vmem:[%s13204_s2 + $0x448] sm:$0xff] }
  0x1d   :  { %v247_v5 = vld [vmem:[%s13204_s2 + $0x648] sm:$0xff]  ;;  %v185_v6 = vld [vmem:[%s13204_s2 + $0x458] sm:$0xff]  ;;  %v7570_v9 = vpack.c.bf16 %v118_v63, %v54_v62  ;;  %v7578_v10 = vpack.c.bf16 %v120_v3, %v56_v2  ;;  %v182_v11 = vld [vmem:[%s13204_s2 + $0x440] sm:$0xff] }
  0x1e   :  { %v249_v8 = vld [vmem:[%s13204_s2 + $0x658] sm:$0xff]  ;;  %v246_v12 = vld [vmem:[%s13204_s2 + $0x640] sm:$0xff]  ;;  %v7572_v13 = vpack.c.bf16 %v247_v5, %v183_v4  ;;  %v184_v15 = vld [vmem:[%s13204_s2 + $0x450] sm:$0xff] }
  0x1f   :  { %v7580_v14 = vpack.c.bf16 %v249_v8, %v185_v6  ;;  %v248_v16 = vld [vmem:[%s13204_s2 + $0x650] sm:$0xff]  ;;  %v59_v17 = vld [vmem:[%s13204_s2 + $0x68] sm:$0xff]  ;;  %v61_v19 = vld [vmem:[%s13204_s2 + $0x78] sm:$0xff]  ;;  %v7574_v21 = vpack.c.bf16 %v246_v12, %v182_v11 }
  0x20   :  { %v8822_v33 = vpop.eup %8821  ;;  %v123_v18 = vld [vmem:[%s13204_s2 + $0x268] sm:$0xff]  ;;  %v125_v20 = vld [vmem:[%s13204_s2 + $0x278] sm:$0xff]  ;;  %v7582_v22 = vpack.c.bf16 %v248_v16, %v184_v15  ;;  %v58_v23 = vld [vmem:[%s13204_s2 + $0x60] sm:$0xff] }
  0x21   :  { %v40_v34 = vmul.f32 %v8822_v33, %v37_v32  ;;  %v122_v24 = vld [vmem:[%s13204_s2 + $0x260] sm:$0xff]  ;;  %v7584_v25 = vpack.c.bf16 %v123_v18, %v59_v17  ;;  %v7592_v26 = vpack.c.bf16 %v125_v20, %v61_v19  ;;  %v60_v27 = vld [vmem:[%s13204_s2 + $0x70] sm:$0xff]  ;;  %v187_v29 = vld [vmem:[%s13204_s2 + $0x468] sm:$0xff] }
  0x22   :  { %v124_v28 = vld [vmem:[%s13204_s2 + $0x270] sm:$0xff]  ;;  %v251_v30 = vld [vmem:[%s13204_s2 + $0x668] sm:$0xff]  ;;  %v189_v31 = vld [vmem:[%s13204_s2 + $0x478] sm:$0xff]  ;;  %v7586_v33 = vpack.c.bf16 %v122_v24, %v58_v23 }
  0x23   :  { %v8816_v36 = vround.rtne.f32 %v40_v34  ;;  %v253_v32 = vld [vmem:[%s13204_s2 + $0x678] sm:$0xff]  ;;  %v7594_v34 = vpack.c.bf16 %v124_v28, %v60_v27  ;;  %v7588_v37 = vpack.c.bf16 %v251_v30, %v187_v29  ;;  %v252_v40 = vld [vmem:[%s13204_s2 + $0x670] sm:$0xff]  ;;  %v63_v41 = vld [vmem:[%s13204_s2 + $0x88] sm:$0xff] }
  0x24   :  { %v7596_v38 = vpack.c.bf16 %v253_v32, %v189_v31  ;;  %v127_v42 = vld [vmem:[%s13204_s2 + $0x288] sm:$0xff]  ;;  %v65_v43 = vld [vmem:[%s13204_s2 + $0x98] sm:$0xff] }
  0x25   :  { %v43_v39 = vadd.f32 %v8816_v36, %v42_v35  ;;  %v186_v35 = vld [vmem:[%s13204_s2 + $0x460] sm:$0xff]  ;;  %v129_v44 = vld [vmem:[%s13204_s2 + $0x298] sm:$0xff]  ;;  %v7600_v49 = vpack.c.bf16 %v127_v42, %v63_v41  ;;  %v191_v54 = vld [vmem:[%s13204_s2 + $0x488] sm:$0xff] }
  0x26   :  { %v250_v36 = vld [vmem:[%s13204_s2 + $0x660] sm:$0xff]  ;;  %v7608_v50 = vpack.c.bf16 %v129_v44, %v65_v43  ;;  %v255_v55 = vld [vmem:[%s13204_s2 + $0x688] sm:$0xff]  ;;  %v193_v56 = vld [vmem:[%s13204_s2 + $0x498] sm:$0xff] }
  0x27   :  { %v44_v46 = vmax.f32 %v43_v39, 0.0  ;;  %v188_v39 = vld [vmem:[%s13204_s2 + $0x470] sm:$0xff]  ;;  %v7590_v45 = vpack.c.bf16 %v250_v36, %v186_v35  ;;  %v257_v57 = vld [vmem:[%s13204_s2 + $0x698] sm:$0xff]  ;;  %v7604_v62 = vpack.c.bf16 %v255_v55, %v191_v54  ;;  %v67_v2 = vld [vmem:[%s13204_s2 + $0xa8] sm:$0xff] }
  0x28   :  { %v7612_v63 = vpack.c.bf16 %v257_v57, %v193_v56  ;;  %v131_v3 = vld [vmem:[%s13204_s2 + $0x2a8] sm:$0xff]  ;;  %v69_v4 = vld [vmem:[%s13204_s2 + $0xb8] sm:$0xff] }
  0x29   :  { %v8996_v51 = vmin.f32 %v44_v46, 255.0  ;;  %v7598_v46 = vpack.c.bf16 %v252_v40, %v188_v39  ;;  %v133_v5 = vld [vmem:[%s13204_s2 + $0x2b8] sm:$0xff]  ;;  %v7616_v11 = vpack.c.bf16 %v131_v3, %v67_v2  ;;  %v195_v15 = vld [vmem:[%s13204_s2 + $0x4a8] sm:$0xff] }
  0x2a   :  { %v7624_v12 = vpack.c.bf16 %v133_v5, %v69_v4  ;;  %v259_v16 = vld [vmem:[%s13204_s2 + $0x6a8] sm:$0xff]  ;;  %v197_v17 = vld [vmem:[%s13204_s2 + $0x4b8] sm:$0xff] }
  0x2b   :  { %6255 = vmatmul.mubr.msk.f32.vlgmr.msra.gmra.mrb[0].mxu0 %vm302_vm0, %v8996_v51  ;;  %6256 = vmatmul.mubr.msk.f32.vlgmr.msra.gmra.mrb[0].mxu1 %vm302_vm0, %v8996_v51  ;;  %v261_v18 = vld [vmem:[%s13204_s2 + $0x6b8] sm:$0xff]  ;;  %v7620_v23 = vpack.c.bf16 %v259_v16, %v195_v15  ;;  %v71_v27 = vld [vmem:[%s13204_s2 + $0xc8] sm:$0xff] }
  0x2c   :  { %7555 = vmatpush1.bf16.msra.mxu0 %v7554_v47  ;;  %7563 = vmatpush1.bf16.msra.mxu1 %v7562_v48  ;;  %v62_v47 = vld [vmem:[%s13204_s2 + $0x80] sm:$0xff]  ;;  %v7628_v24 = vpack.c.bf16 %v261_v18, %v197_v17  ;;  %v135_v28 = vld [vmem:[%s13204_s2 + $0x2c8] sm:$0xff]  ;;  %v73_v29 = vld [vmem:[%s13204_s2 + $0xd8] sm:$0xff] }
  0x2d   :  { %7557 = vmatprep.subr.bf16.mxu0 %v7556_v52  ;;  %7565 = vmatprep.subr.bf16.mxu1 %v7564_v53  ;;  %v126_v48 = vld [vmem:[%s13204_s2 + $0x280] sm:$0xff]  ;;  %v64_v52 = vld [vmem:[%s13204_s2 + $0x90] sm:$0xff]  ;;  %v137_v30 = vld [vmem:[%s13204_s2 + $0x2d8] sm:$0xff]  ;;  %v7632_v35 = vpack.c.bf16 %v135_v28, %v71_v27 }
  0x2e   :  { %512 = vmatprep.mubr.f32.mxu0 %v8862_v7  ;;  %583 = vmatprep.mubr.f32.mxu1 %v8862_v7  ;;  %v128_v53 = vld [vmem:[%s13204_s2 + $0x290] sm:$0xff]  ;;  %v7602_v58 = vpack.c.bf16 %v126_v48, %v62_v47  ;;  %v7640_v36 = vpack.c.bf16 %v137_v30, %v73_v29  ;;  %v199_v39 = vld [vmem:[%s13204_s2 + $0x4c8] sm:$0xff]  ;;  %v201_v41 = vld [vmem:[%s13204_s2 + $0x4d8] sm:$0xff] }
  0x2f   :  { %v7610_v59 = vpack.c.bf16 %v128_v53, %v64_v52  ;;  %v263_v40 = vld [vmem:[%s13204_s2 + $0x6c8] sm:$0xff]  ;;  %v265_v42 = vld [vmem:[%s13204_s2 + $0x6d8] sm:$0xff] }
  0x30   :  { %7559 = vmatpush1.bf16.msra.mxu0 %v7558_v60  ;;  %7567 = vmatpush1.bf16.msra.mxu1 %v7566_v61  ;;  %v190_v60 = vld [vmem:[%s13204_s2 + $0x480] sm:$0xff]  ;;  %v7636_v47 = vpack.c.bf16 %v263_v40, %v199_v39  ;;  %v7644_v48 = vpack.c.bf16 %v265_v42, %v201_v41  ;;  %v75_v52 = vld [vmem:[%s13204_s2 + $0xe8] sm:$0xff]  ;;  %v77_v54 = vld [vmem:[%s13204_s2 + $0xf8] sm:$0xff] }
  0x31   :  { %7569 = vmatprep.subr.bf16.mxu0 %v7568_v0  ;;  %7577 = vmatprep.subr.bf16.mxu1 %v7576_v1  ;;  %v254_v61 = vld [vmem:[%s13204_s2 + $0x680] sm:$0xff]  ;;  %v192_v0 = vld [vmem:[%s13204_s2 + $0x490] sm:$0xff]  ;;  %v139_v53 = vld [vmem:[%s13204_s2 + $0x2e8] sm:$0xff] }
  0x32   :  { %v256_v1 = vld [vmem:[%s13204_s2 + $0x690] sm:$0xff]  ;;  %v7606_v6 = vpack.c.bf16 %v254_v61, %v190_v60  ;;  %v141_v55 = vld [vmem:[%s13204_s2 + $0x2f8] sm:$0xff]  ;;  %v7648_v60 = vpack.c.bf16 %v139_v53, %v75_v52 }
  0x33   :  { %6257 = vmatmul.mubr.msk.f32.vlgmr.msra.gmra.mrb[2].mxu0 %vm302_vm0, %v8996_v51  ;;  %6258 = vmatmul.mubr.msk.f32.vlgmr.msra.gmra.mrb[2].mxu1 %vm302_vm0, %v8996_v51  ;;  %v7614_v8 = vpack.c.bf16 %v256_v1, %v192_v0  ;;  %v7656_v61 = vpack.c.bf16 %v141_v55, %v77_v54  ;;  %v203_v0 = vld [vmem:[%s13204_s2 + $0x4e8] sm:$0xff]  ;;  %v205_v2 = vld [vmem:[%s13204_s2 + $0x4f8] sm:$0xff] }
  0x34   :  { %7571 = vmatpush1.bf16.msra.mxu0 %v7570_v9  ;;  %7579 = vmatpush1.bf16.msra.mxu1 %v7578_v10  ;;  %v66_v9 = vld [vmem:[%s13204_s2 + $0xa0] sm:$0xff]  ;;  %v267_v1 = vld [vmem:[%s13204_s2 + $0x6e8] sm:$0xff]  ;;  %v269_v3 = vld [vmem:[%s13204_s2 + $0x6f8] sm:$0xff] }
  0x35   :  { %7573 = vmatprep.subr.bf16.mxu0 %v7572_v13  ;;  %7581 = vmatprep.subr.bf16.mxu1 %v7580_v14  ;;  %v130_v10 = vld [vmem:[%s13204_s2 + $0x2a0] sm:$0xff]  ;;  %v68_v13 = vld [vmem:[%s13204_s2 + $0xb0] sm:$0xff]  ;;  %v81_v15 = vld [vmem:[%s13204_s2 + $0x118] sm:$0xff] }
  0x36   :  { %654 = vmatprep.mubr.f32.mxu0 %v8862_v7  ;;  %725 = vmatprep.mubr.f32.mxu1 %v8862_v7  ;;  %v132_v14 = vld [vmem:[%s13204_s2 + $0x2b0] sm:$0xff]  ;;  %v7618_v19 = vpack.c.bf16 %v130_v10, %v66_v9  ;;  %v7652_v9 = vpack.c.bf16 %v267_v1, %v203_v0  ;;  %v7660_v10 = vpack.c.bf16 %v269_v3, %v205_v2  ;;  %v145_v16 = vld [vmem:[%s13204_s2 + $0x318] sm:$0xff] }
  0x37   :  { %v7626_v20 = vpack.c.bf16 %v132_v14, %v68_v13  ;;  %v79_v13 = vld [vmem:[%s13204_s2 + $0x108] sm:$0xff]  ;;  %v209_v27 = vld [vmem:[%s13204_s2 + $0x518] sm:$0xff] }
  0x38   :  { %7575 = vmatpush1.bf16.msra.mxu0 %v7574_v21  ;;  %7583 = vmatpush1.bf16.msra.mxu1 %v7582_v22  ;;  %v194_v21 = vld [vmem:[%s13204_s2 + $0x4a0] sm:$0xff]  ;;  %v143_v14 = vld [vmem:[%s13204_s2 + $0x308] sm:$0xff]  ;;  %v273_v28 = vld [vmem:[%s13204_s2 + $0x718] sm:$0xff] }
  0x39   :  { %7585 = vmatprep.subr.bf16.mxu0 %v7584_v25  ;;  %7593 = vmatprep.subr.bf16.mxu1 %v7592_v26  ;;  %v258_v22 = vld [vmem:[%s13204_s2 + $0x6a0] sm:$0xff]  ;;  %v196_v25 = vld [vmem:[%s13204_s2 + $0x4b0] sm:$0xff]  ;;  %v85_v39 = vld [vmem:[%s13204_s2 + $0x138] sm:$0xff] }
  0x3a   :  { %v260_v26 = vld [vmem:[%s13204_s2 + $0x6b0] sm:$0xff]  ;;  %v7622_v31 = vpack.c.bf16 %v258_v22, %v194_v21  ;;  %v7664_v21 = vpack.c.bf16 %v143_v14, %v79_v13  ;;  %v7672_v22 = vpack.c.bf16 %v145_v16, %v81_v15  ;;  %v149_v40 = vld [vmem:[%s13204_s2 + $0x338] sm:$0xff] }
  0x3b   :  { %6259 = vmatmul.mubr.msk.f32.vlgmr.msra.gmra.mrb[4].mxu0 %vm302_vm0, %v8996_v51  ;;  %6260 = vmatmul.mubr.msk.f32.vlgmr.msra.gmra.mrb[4].mxu1 %vm302_vm0, %v8996_v51  ;;  %v7630_v32 = vpack.c.bf16 %v260_v26, %v196_v25  ;;  %v207_v25 = vld [vmem:[%s13204_s2 + $0x508] sm:$0xff]  ;;  %v213_v52 = vld [vmem:[%s13204_s2 + $0x538] sm:$0xff] }
  0x3c   :  { %7587 = vmatpush1.bf16.msra.mxu0 %v7586_v33  ;;  %7595 = vmatpush1.bf16.msra.mxu1 %v7594_v34  ;;  %v70_v33 = vld [vmem:[%s13204_s2 + $0xc0] sm:$0xff]  ;;  %v271_v26 = vld [vmem:[%s13204_s2 + $0x708] sm:$0xff]  ;;  %v277_v53 = vld [vmem:[%s13204_s2 + $0x738] sm:$0xff] }
  0x3d   :  { %7589 = vmatprep.subr.bf16.mxu0 %v7588_v37  ;;  %7597 = vmatprep.subr.bf16.mxu1 %v7596_v38  ;;  %v134_v34 = vld [vmem:[%s13204_s2 + $0x2c0] sm:$0xff]  ;;  %v72_v37 = vld [vmem:[%s13204_s2 + $0xd0] sm:$0xff]  ;;  %v89_v0 = vld [vmem:[%s13204_s2 + $0x158] sm:$0xff] }
  0x3e   :  { %796 = vmatprep.mubr.f32.mxu0 %v8862_v7  ;;  %867 = vmatprep.mubr.f32.mxu1 %v8862_v7  ;;  %v136_v38 = vld [vmem:[%s13204_s2 + $0x2d0] sm:$0xff]  ;;  %v7634_v43 = vpack.c.bf16 %v134_v34, %v70_v33  ;;  %v7668_v33 = vpack.c.bf16 %v271_v26, %v207_v25  ;;  %v7676_v34 = vpack.c.bf16 %v273_v28, %v209_v27  ;;  %v153_v1 = vld [vmem:[%s13204_s2 + $0x358] sm:$0xff] }
  0x3f   :  { %v7642_v44 = vpack.c.bf16 %v136_v38, %v72_v37  ;;  %v83_v37 = vld [vmem:[%s13204_s2 + $0x128] sm:$0xff]  ;;  %v217_v13 = vld [vmem:[%s13204_s2 + $0x558] sm:$0xff] }
  0x40   :  { %7591 = vmatpush1.bf16.msra.mxu0 %v7590_v45  ;;  %7599 = vmatpush1.bf16.msra.mxu1 %v7598_v46  ;;  %v198_v45 = vld [vmem:[%s13204_s2 + $0x4c0] sm:$0xff]  ;;  %v147_v38 = vld [vmem:[%s13204_s2 + $0x328] sm:$0xff]  ;;  %v281_v14 = vld [vmem:[%s13204_s2 + $0x758] sm:$0xff] }
  0x41   :  { %7601 = vmatprep.subr.bf16.mxu0 %v7600_v49  ;;  %7609 = vmatprep.subr.bf16.mxu1 %v7608_v50  ;;  %v262_v46 = vld [vmem:[%s13204_s2 + $0x6c0] sm:$0xff]  ;;  %v200_v49 = vld [vmem:[%s13204_s2 + $0x4d0] sm:$0xff]  ;;  %v93_v25 = vld [vmem:[%s13204_s2 + $0x178] sm:$0xff] }
  0x42   :  { %v264_v50 = vld [vmem:[%s13204_s2 + $0x6d0] sm:$0xff]  ;;  %v7638_v56 = vpack.c.bf16 %v262_v46, %v198_v45  ;;  %v7680_v45 = vpack.c.bf16 %v147_v38, %v83_v37  ;;  %v7688_v46 = vpack.c.bf16 %v149_v40, %v85_v39  ;;  %v157_v26 = vld [vmem:[%s13204_s2 + $0x378] sm:$0xff] }
  0x43   :  { %6261 = vmatmul.mubr.msk.f32.vlgmr.msra.gmra.mrb[6].mxu0 %vm302_vm0, %v8996_v51  ;;  %6262 = vmatmul.mubr.msk.f32.vlgmr.msra.gmra.mrb[6].mxu1 %vm302_vm0, %v8996_v51  ;;  %v7646_v57 = vpack.c.bf16 %v264_v50, %v200_v49  ;;  %v211_v49 = vld [vmem:[%s13204_s2 + $0x528] sm:$0xff]  ;;  %v221_v37 = vld [vmem:[%s13204_s2 + $0x578] sm:$0xff] }
  0x44   :  { %7603 = vmatpush1.bf16.msra.mxu0 %v7602_v58  ;;  %7611 = vmatpush1.bf16.msra.mxu1 %v7610_v59  ;;  %v74_v58 = vld [vmem:[%s13204_s2 + $0xe0] sm:$0xff]  ;;  %v275_v50 = vld [vmem:[%s13204_s2 + $0x728] sm:$0xff]  ;;  %v285_v38 = vld [vmem:[%s13204_s2 + $0x778] sm:$0xff] }
  0x45   :  { %7605 = vmatprep.subr.bf16.mxu0 %v7604_v62  ;;  %7613 = vmatprep.subr.bf16.mxu1 %v7612_v63  ;;  %v138_v59 = vld [vmem:[%s13204_s2 + $0x2e0] sm:$0xff]  ;;  %v76_v62 = vld [vmem:[%s13204_s2 + $0xf0] sm:$0xff] }
  0x46   :  { %938 = vmatprep.mubr.f32.mxu0 %v8862_v7  ;;  %1009 = vmatprep.mubr.f32.mxu1 %v8862_v7  ;;  %v140_v63 = vld [vmem:[%s13204_s2 + $0x2f0] sm:$0xff]  ;;  %v7650_v4 = vpack.c.bf16 %v138_v59, %v74_v58  ;;  %v7684_v58 = vpack.c.bf16 %v275_v50, %v211_v49  ;;  %v7692_v59 = vpack.c.bf16 %v277_v53, %v213_v52  ;;  %v97_v49 = vld [vmem:[%s13204_s2 + $0x198] sm:$0xff] }
  0x47   :  { %v7658_v5 = vpack.c.bf16 %v140_v63, %v76_v62  ;;  %v87_v62 = vld [vmem:[%s13204_s2 + $0x148] sm:$0xff]  ;;  %v161_v50 = vld [vmem:[%s13204_s2 + $0x398] sm:$0xff] }
  0x48   :  { %7607 = vmatpush1.bf16.msra.mxu0 %v7606_v6  ;;  %7615 = vmatpush1.bf16.msra.mxu1 %v7614_v8  ;;  %v202_v6 = vld [vmem:[%s13204_s2 + $0x4e0] sm:$0xff]  ;;  %v151_v63 = vld [vmem:[%s13204_s2 + $0x348] sm:$0xff] }
  0x49   :  { %7617 = vmatprep.subr.bf16.mxu0 %v7616_v11  ;;  %7625 = vmatprep.subr.bf16.mxu1 %v7624_v12  ;;  %v266_v8 = vld [vmem:[%s13204_s2 + $0x6e0] sm:$0xff]  ;;  %v204_v11 = vld [vmem:[%s13204_s2 + $0x4f0] sm:$0xff] }
  0x4a   :  { %v268_v12 = vld [vmem:[%s13204_s2 + $0x6f0] sm:$0xff]  ;;  %v7654_v17 = vpack.c.bf16 %v266_v8, %v202_v6  ;;  %v7696_v6 = vpack.c.bf16 %v151_v63, %v87_v62  ;;  %v7704_v8 = vpack.c.bf16 %v153_v1, %v89_v0  ;;  %v225_v62 = vld [vmem:[%s13204_s2 + $0x598] sm:$0xff] }
  0x4b   :  { %6263 = vmatmul.mubr.msk.f32.vlgmr.msra.gmra.mrb[8].mxu0 %vm302_vm0, %v8996_v51  ;;  %6264 = vmatmul.mubr.msk.f32.vlgmr.msra.gmra.mrb[8].mxu1 %vm302_vm0, %v8996_v51  ;;  %v7662_v18 = vpack.c.bf16 %v268_v12, %v204_v11  ;;  %v215_v11 = vld [vmem:[%s13204_s2 + $0x548] sm:$0xff]  ;;  %v289_v63 = vld [vmem:[%s13204_s2 + $0x798] sm:$0xff] }
  0x4c   :  { %7619 = vmatpush1.bf16.msra.mxu0 %v7618_v19  ;;  %7627 = vmatpush1.bf16.msra.mxu1 %v7626_v20  ;;  %v78_v19 = vld [vmem:[%s13204_s2 + $0x100] sm:$0xff]  ;;  %v279_v12 = vld [vmem:[%s13204_s2 + $0x748] sm:$0xff] }
  0x4d   :  { %7621 = vmatprep.subr.bf16.mxu0 %v7620_v23  ;;  %7629 = vmatprep.subr.bf16.mxu1 %v7628_v24  ;;  %v142_v20 = vld [vmem:[%s13204_s2 + $0x300] sm:$0xff]  ;;  %v80_v23 = vld [vmem:[%s13204_s2 + $0x110] sm:$0xff] }
  0x4e   :  { %1080 = vmatprep.mubr.f32.mxu0 %v8862_v7  ;;  %1151 = vmatprep.mubr.f32.mxu1 %v8862_v7  ;;  %v144_v24 = vld [vmem:[%s13204_s2 + $0x310] sm:$0xff]  ;;  %v7666_v29 = vpack.c.bf16 %v142_v20, %v78_v19  ;;  %v7700_v19 = vpack.c.bf16 %v279_v12, %v215_v11  ;;  %v7708_v20 = vpack.c.bf16 %v281_v14, %v217_v13  ;;  %v101_v11 = vld [vmem:[%s13204_s2 + $0x1b8] sm:$0xff] }
  0x4f   :  { %v7674_v30 = vpack.c.bf16 %v144_v24, %v80_v23  ;;  %v91_v23 = vld [vmem:[%s13204_s2 + $0x168] sm:$0xff]  ;;  %v165_v12 = vld [vmem:[%s13204_s2 + $0x3b8] sm:$0xff] }
  0x50   :  { %7623 = vmatpush1.bf16.msra.mxu0 %v7622_v31  ;;  %7631 = vmatpush1.bf16.msra.mxu1 %v7630_v32  ;;  %v206_v31 = vld [vmem:[%s13204_s2 + $0x500] sm:$0xff]  ;;  %v155_v24 = vld [vmem:[%s13204_s2 + $0x368] sm:$0xff] }
  0x51   :  { %7633 = vmatprep.subr.bf16.mxu0 %v7632_v35  ;;  %7641 = vmatprep.subr.bf16.mxu1 %v7640_v36  ;;  %v270_v32 = vld [vmem:[%s13204_s2 + $0x700] sm:$0xff]  ;;  %v208_v35 = vld [vmem:[%s13204_s2 + $0x510] sm:$0xff] }
  0x52   :  { %v272_v36 = vld [vmem:[%s13204_s2 + $0x710] sm:$0xff]  ;;  %v7670_v41 = vpack.c.bf16 %v270_v32, %v206_v31  ;;  %v7712_v31 = vpack.c.bf16 %v155_v24, %v91_v23  ;;  %v7720_v32 = vpack.c.bf16 %v157_v26, %v93_v25  ;;  %v229_v23 = vld [vmem:[%s13204_s2 + $0x5b8] sm:$0xff] }
  0x53   :  { %6265 = vmatmul.mubr.msk.f32.vlgmr.msra.gmra.mrb[10].mxu0 %vm302_vm0, %v8996_v51  ;;  %6266 = vmatmul.mubr.msk.f32.vlgmr.msra.gmra.mrb[10].mxu1 %vm302_vm0, %v8996_v51  ;;  %v7678_v42 = vpack.c.bf16 %v272_v36, %v208_v35  ;;  %v219_v35 = vld [vmem:[%s13204_s2 + $0x568] sm:$0xff]  ;;  %v293_v24 = vld [vmem:[%s13204_s2 + $0x7b8] sm:$0xff] }
  0x54   :  { %7635 = vmatpush1.bf16.msra.mxu0 %v7634_v43  ;;  %7643 = vmatpush1.bf16.msra.mxu1 %v7642_v44  ;;  %v82_v43 = vld [vmem:[%s13204_s2 + $0x120] sm:$0xff]  ;;  %v283_v36 = vld [vmem:[%s13204_s2 + $0x768] sm:$0xff] }
  0x55   :  { %7637 = vmatprep.subr.bf16.mxu0 %v7636_v47  ;;  %7645 = vmatprep.subr.bf16.mxu1 %v7644_v48  ;;  %v146_v44 = vld [vmem:[%s13204_s2 + $0x320] sm:$0xff]  ;;  %v84_v47 = vld [vmem:[%s13204_s2 + $0x130] sm:$0xff] }
  0x56   :  { %1222 = vmatprep.mubr.f32.mxu0 %v8862_v7  ;;  %1293 = vmatprep.mubr.f32.mxu1 %v8862_v7  ;;  %v148_v48 = vld [vmem:[%s13204_s2 + $0x330] sm:$0xff]  ;;  %v7682_v54 = vpack.c.bf16 %v146_v44, %v82_v43  ;;  %v7716_v43 = vpack.c.bf16 %v283_v36, %v219_v35  ;;  %v7724_v44 = vpack.c.bf16 %v285_v38, %v221_v37  ;;  %v105_v35 = vld [vmem:[%s13204_s2 + $0x1d8] sm:$0xff] }
  0x57   :  { %v7690_v55 = vpack.c.bf16 %v148_v48, %v84_v47  ;;  %v95_v47 = vld [vmem:[%s13204_s2 + $0x188] sm:$0xff]  ;;  %v169_v36 = vld [vmem:[%s13204_s2 + $0x3d8] sm:$0xff] }
  0x58   :  { %7639 = vmatpush1.bf16.msra.mxu0 %v7638_v56  ;;  %7647 = vmatpush1.bf16.msra.mxu1 %v7646_v57  ;;  %v210_v56 = vld [vmem:[%s13204_s2 + $0x520] sm:$0xff]  ;;  %v159_v48 = vld [vmem:[%s13204_s2 + $0x388] sm:$0xff] }
  0x59   :  { %7649 = vmatprep.subr.bf16.mxu0 %v7648_v60  ;;  %7657 = vmatprep.subr.bf16.mxu1 %v7656_v61  ;;  %v274_v57 = vld [vmem:[%s13204_s2 + $0x720] sm:$0xff]  ;;  %v212_v60 = vld [vmem:[%s13204_s2 + $0x530] sm:$0xff] }
  0x5a   :  { %v276_v61 = vld [vmem:[%s13204_s2 + $0x730] sm:$0xff]  ;;  %v7686_v2 = vpack.c.bf16 %v274_v57, %v210_v56  ;;  %v7728_v56 = vpack.c.bf16 %v159_v48, %v95_v47  ;;  %v7736_v57 = vpack.c.bf16 %v161_v50, %v97_v49  ;;  %v233_v47 = vld [vmem:[%s13204_s2 + $0x5d8] sm:$0xff] }
  0x5b   :  { %6267 = vmatmul.mubr.msk.f32.vlgmr.msra.gmra.mrb[12].mxu0 %vm302_vm0, %v8996_v51  ;;  %6268 = vmatmul.mubr.msk.f32.vlgmr.msra.gmra.mrb[12].mxu1 %vm302_vm0, %v8996_v51  ;;  %v7694_v3 = vpack.c.bf16 %v276_v61, %v212_v60  ;;  %v223_v60 = vld [vmem:[%s13204_s2 + $0x588] sm:$0xff]  ;;  %v297_v48 = vld [vmem:[%s13204_s2 + $0x7d8] sm:$0xff] }
  0x5c   :  { %7651 = vmatpush1.bf16.msra.mxu0 %v7650_v4  ;;  %7659 = vmatpush1.bf16.msra.mxu1 %v7658_v5  ;;  %v86_v4 = vld [vmem:[%s13204_s2 + $0x140] sm:$0xff]  ;;  %v287_v61 = vld [vmem:[%s13204_s2 + $0x788] sm:$0xff] }
  0x5d   :  { %7653 = vmatprep.subr.bf16.mxu0 %v7652_v9  ;;  %7661 = vmatprep.subr.bf16.mxu1 %v7660_v10  ;;  %v150_v5 = vld [vmem:[%s13204_s2 + $0x340] sm:$0xff]  ;;  %v88_v9 = vld [vmem:[%s13204_s2 + $0x150] sm:$0xff] }
  0x5e   :  { %1364 = vmatprep.mubr.f32.mxu0 %v8862_v7  ;;  %1435 = vmatprep.mubr.f32.mxu1 %v8862_v7  ;;  %v152_v10 = vld [vmem:[%s13204_s2 + $0x350] sm:$0xff]  ;;  %v7698_v15 = vpack.c.bf16 %v150_v5, %v86_v4  ;;  %v7732_v4 = vpack.c.bf16 %v287_v61, %v223_v60  ;;  %v7740_v5 = vpack.c.bf16 %v289_v63, %v225_v62  ;;  %v109_v60 = vld [vmem:[%s13204_s2 + $0x1f8] sm:$0xff] }
  0x5f   :  { %v7706_v16 = vpack.c.bf16 %v152_v10, %v88_v9  ;;  %v99_v9 = vld [vmem:[%s13204_s2 + $0x1a8] sm:$0xff]  ;;  %v173_v61 = vld [vmem:[%s13204_s2 + $0x3f8] sm:$0xff] }
  0x60   :  { %7655 = vmatpush1.bf16.msra.mxu0 %v7654_v17  ;;  %7663 = vmatpush1.bf16.msra.mxu1 %v7662_v18  ;;  %v214_v17 = vld [vmem:[%s13204_s2 + $0x540] sm:$0xff]  ;;  %v163_v10 = vld [vmem:[%s13204_s2 + $0x3a8] sm:$0xff] }
  0x61   :  { %7665 = vmatprep.subr.bf16.mxu0 %v7664_v21  ;;  %7673 = vmatprep.subr.bf16.mxu1 %v7672_v22  ;;  %v278_v18 = vld [vmem:[%s13204_s2 + $0x740] sm:$0xff]  ;;  %v216_v21 = vld [vmem:[%s13204_s2 + $0x550] sm:$0xff] }
  0x62   :  { %v280_v22 = vld [vmem:[%s13204_s2 + $0x750] sm:$0xff]  ;;  %v7702_v27 = vpack.c.bf16 %v278_v18, %v214_v17  ;;  %v7744_v17 = vpack.c.bf16 %v163_v10, %v99_v9  ;;  %v7752_v18 = vpack.c.bf16 %v165_v12, %v101_v11  ;;  %v237_v9 = vld [vmem:[%s13204_s2 + $0x5f8] sm:$0xff] }
  0x63   :  { %6269 = vmatmul.mubr.msk.f32.vlgmr.msra.gmra.mrb[14].mxu0 %vm302_vm0, %v8996_v51  ;;  %6270 = vmatmul.mubr.msk.f32.vlgmr.msra.gmra.mrb[14].mxu1 %vm302_vm0, %v8996_v51  ;;  %v7710_v28 = vpack.c.bf16 %v280_v22, %v216_v21  ;;  %v227_v21 = vld [vmem:[%s13204_s2 + $0x5a8] sm:$0xff]  ;;  %v301_v10 = vld [vmem:[%s13204_s2 + $0x7f8] sm:$0xff] }
  0x64   :  { %7667 = vmatpush1.bf16.msra.mxu0 %v7666_v29  ;;  %7675 = vmatpush1.bf16.msra.mxu1 %v7674_v30  ;;  %v90_v29 = vld [vmem:[%s13204_s2 + $0x160] sm:$0xff]  ;;  %v291_v22 = vld [vmem:[%s13204_s2 + $0x7a8] sm:$0xff] }
  0x65   :  { %7669 = vmatprep.subr.bf16.mxu0 %v7668_v33  ;;  %7677 = vmatprep.subr.bf16.mxu1 %v7676_v34  ;;  %v154_v30 = vld [vmem:[%s13204_s2 + $0x360] sm:$0xff]  ;;  %v92_v33 = vld [vmem:[%s13204_s2 + $0x170] sm:$0xff] }
  0x66   :  { %1506 = vmatprep.mubr.f32.mxu0 %v8862_v7  ;;  %1577 = vmatprep.mubr.f32.mxu1 %v8862_v7  ;;  %v156_v34 = vld [vmem:[%s13204_s2 + $0x370] sm:$0xff]  ;;  %v7714_v39 = vpack.c.bf16 %v154_v30, %v90_v29  ;;  %v7748_v29 = vpack.c.bf16 %v291_v22, %v227_v21  ;;  %v7756_v30 = vpack.c.bf16 %v293_v24, %v229_v23  ;;  %v3011_v21 = vld [vmem:[%s13205_s3 + $0x180] sm:$0xff]  ;;  %v3012_v22 = vld [vmem:[%s13205_s3 + $0x188] sm:$0xff] }
  0x67   :  { %v7722_v40 = vpack.c.bf16 %v156_v34, %v92_v33  ;;  %v103_v33 = vld [vmem:[%s13204_s2 + $0x1c8] sm:$0xff] }
  0x68   :  { %7671 = vmatpush1.bf16.msra.mxu0 %v7670_v41  ;;  %7679 = vmatpush1.bf16.msra.mxu1 %v7678_v42  ;;  %v218_v41 = vld [vmem:[%s13204_s2 + $0x560] sm:$0xff]  ;;  %v167_v34 = vld [vmem:[%s13204_s2 + $0x3c8] sm:$0xff] }
  0x69   :  { %7681 = vmatprep.subr.bf16.mxu0 %v7680_v45  ;;  %7689 = vmatprep.subr.bf16.mxu1 %v7688_v46  ;;  %v282_v42 = vld [vmem:[%s13204_s2 + $0x760] sm:$0xff]  ;;  %v220_v45 = vld [vmem:[%s13204_s2 + $0x570] sm:$0xff] }
  0x6a   :  { %v284_v46 = vld [vmem:[%s13204_s2 + $0x770] sm:$0xff]  ;;  %v7718_v52 = vpack.c.bf16 %v282_v42, %v218_v41  ;;  %v7760_v41 = vpack.c.bf16 %v167_v34, %v103_v33  ;;  %v7768_v42 = vpack.c.bf16 %v169_v36, %v105_v35  ;;  %v3014_v34 = vld [vmem:[%s13205_s3 + $0x198] sm:$0xff] }
  0x6b   :  { %6271 = vmatmul.mubr.msk.f32.vlgmr.msra.gmra.mrb[16].mxu0 %vm302_vm0, %v8996_v51  ;;  %6272 = vmatmul.mubr.msk.f32.vlgmr.msra.gmra.mrb[16].mxu1 %vm302_vm0, %v8996_v51  ;;  %v7726_v53 = vpack.c.bf16 %v284_v46, %v220_v45  ;;  %v231_v45 = vld [vmem:[%s13204_s2 + $0x5c8] sm:$0xff]  ;;  %v3013_v33 = vld [vmem:[%s13205_s3 + $0x190] sm:$0xff] }
  0x6c   :  { %7683 = vmatpush1.bf16.msra.mxu0 %v7682_v54  ;;  %7691 = vmatpush1.bf16.msra.mxu1 %v7690_v55  ;;  %v94_v54 = vld [vmem:[%s13204_s2 + $0x180] sm:$0xff]  ;;  %v295_v46 = vld [vmem:[%s13204_s2 + $0x7c8] sm:$0xff] }
  0x6d   :  { %7685 = vmatprep.subr.bf16.mxu0 %v7684_v58  ;;  %7693 = vmatprep.subr.bf16.mxu1 %v7692_v59  ;;  %v158_v55 = vld [vmem:[%s13204_s2 + $0x380] sm:$0xff]  ;;  %v96_v58 = vld [vmem:[%s13204_s2 + $0x190] sm:$0xff] }
  0x6e   :  { %1648 = vmatprep.mubr.f32.mxu0 %v8862_v7  ;;  %1719 = vmatprep.mubr.f32.mxu1 %v8862_v7  ;;  %v160_v59 = vld [vmem:[%s13204_s2 + $0x390] sm:$0xff]  ;;  %v7730_v0 = vpack.c.bf16 %v158_v55, %v94_v54  ;;  %v7764_v54 = vpack.c.bf16 %v295_v46, %v231_v45  ;;  %v7772_v55 = vpack.c.bf16 %v297_v48, %v233_v47  ;;  %v3016_v45 = vld [vmem:[%s13205_s3 + $0x1a8] sm:$0xff]  ;;  %v2967_v48 = vld [vmem:[%s13205_s3 + $0x20] sm:$0xff] }
  0x6f   :  { %v7738_v1 = vpack.c.bf16 %v160_v59, %v96_v58  ;;  %v107_v58 = vld [vmem:[%s13204_s2 + $0x1e8] sm:$0xff] }
  0x70   :  { %7687 = vmatpush1.bf16.msra.mxu0 %v7686_v2  ;;  %7695 = vmatpush1.bf16.msra.mxu1 %v7694_v3  ;;  %v222_v2 = vld [vmem:[%s13204_s2 + $0x580] sm:$0xff]  ;;  %v171_v59 = vld [vmem:[%s13204_s2 + $0x3e8] sm:$0xff] }
  0x71   :  { %7697 = vmatprep.subr.bf16.mxu0 %v7696_v6  ;;  %7705 = vmatprep.subr.bf16.mxu1 %v7704_v8  ;;  %v286_v3 = vld [vmem:[%s13204_s2 + $0x780] sm:$0xff]  ;;  %v224_v6 = vld [vmem:[%s13204_s2 + $0x590] sm:$0xff] }
  0x72   :  { %v288_v8 = vld [vmem:[%s13204_s2 + $0x790] sm:$0xff]  ;;  %v7734_v13 = vpack.c.bf16 %v286_v3, %v222_v2  ;;  %v7776_v2 = vpack.c.bf16 %v171_v59, %v107_v58  ;;  %v7784_v3 = vpack.c.bf16 %v173_v61, %v109_v60  ;;  %v2970_v61 = vld [vmem:[%s13205_s3 + $0x38] sm:$0xff] }
  0x73   :  { %6273 = vmatmul.mubr.msk.f32.vlgmr.msra.gmra.mrb[18].mxu0 %vm302_vm0, %v8996_v51  ;;  %6274 = vmatmul.mubr.msk.f32.vlgmr.msra.gmra.mrb[18].mxu1 %vm302_vm0, %v8996_v51  ;;  %v7742_v14 = vpack.c.bf16 %v288_v8, %v224_v6  ;;  %v235_v6 = vld [vmem:[%s13204_s2 + $0x5e8] sm:$0xff]  ;;  %v2969_v60 = vld [vmem:[%s13205_s3 + $0x30] sm:$0xff] }
  0x74   :  { %7699 = vmatpush1.bf16.msra.mxu0 %v7698_v15  ;;  %7707 = vmatpush1.bf16.msra.mxu1 %v7706_v16  ;;  %v98_v15 = vld [vmem:[%s13204_s2 + $0x1a0] sm:$0xff]  ;;  %v299_v8 = vld [vmem:[%s13204_s2 + $0x7e8] sm:$0xff] }
  0x75   :  { %7701 = vmatprep.subr.bf16.mxu0 %v7700_v19  ;;  %7709 = vmatprep.subr.bf16.mxu1 %v7708_v20  ;;  %v162_v16 = vld [vmem:[%s13204_s2 + $0x3a0] sm:$0xff]  ;;  %v100_v19 = vld [vmem:[%s13204_s2 + $0x1b0] sm:$0xff] }
  0x76   :  { %1790 = vmatprep.mubr.f32.mxu0 %v8862_v7  ;;  %1861 = vmatprep.mubr.f32.mxu1 %v8862_v7  ;;  %v164_v20 = vld [vmem:[%s13204_s2 + $0x3b0] sm:$0xff]  ;;  %v7746_v25 = vpack.c.bf16 %v162_v16, %v98_v15  ;;  %v7780_v15 = vpack.c.bf16 %v299_v8, %v235_v6  ;;  %v7788_v16 = vpack.c.bf16 %v301_v10, %v237_v9  ;;  %v2971_v9 = vld [vmem:[%s13205_s3 + $0x40] sm:$0xff]  ;;  %v2972_v10 = vld [vmem:[%s13205_s3 + $0x48] sm:$0xff] }
  0x77   :  { %v7754_v26 = vpack.c.bf16 %v164_v20, %v100_v19  ;;  %v2979_v19 = vld [vmem:[%s13205_s3 + $0x80] sm:$0xff]  ;;  %v2980_v20 = vld [vmem:[%s13205_s3 + $0x88] sm:$0xff]  ;;  %v7806_v6 = vpack.c.bf16 %v2970_v61, %v2969_v60 }
  0x78   :  { %7703 = vmatpush1.bf16.msra.mxu0 %v7702_v27  ;;  %7711 = vmatpush1.bf16.msra.mxu1 %v7710_v28  ;;  %v226_v27 = vld [vmem:[%s13204_s2 + $0x5a0] sm:$0xff] }
  0x79   :  { %7713 = vmatprep.subr.bf16.mxu0 %v7712_v31  ;;  %7721 = vmatprep.subr.bf16.mxu1 %v7720_v32  ;;  %v290_v28 = vld [vmem:[%s13204_s2 + $0x7a0] sm:$0xff]  ;;  %v228_v31 = vld [vmem:[%s13204_s2 + $0x5b0] sm:$0xff] }
  0x7a   :  { %v292_v32 = vld [vmem:[%s13204_s2 + $0x7b0] sm:$0xff]  ;;  %v7750_v37 = vpack.c.bf16 %v290_v28, %v226_v27  ;;  %v7792_v27 = vpack.c.bf16 %v2980_v20, %v2979_v19  ;;  %v7824_v28 = vpack.c.bf16 %v3012_v22, %v3011_v21  ;;  %v7810_v19 = vpack.c.bf16 %v2972_v10, %v2971_v9  ;;  %v2974_v22 = vld [vmem:[%s13205_s3 + $0x58] sm:$0xff] }
  0x7b   :  { %6275 = vmatmul.mubr.msk.f32.vlgmr.msra.gmra.mrb[20].mxu0 %vm302_vm0, %v8996_v51  ;;  %6276 = vmatmul.mubr.msk.f32.vlgmr.msra.gmra.mrb[20].mxu1 %vm302_vm0, %v8996_v51  ;;  %v7758_v38 = vpack.c.bf16 %v292_v32, %v228_v31  ;;  %v2981_v31 = vld [vmem:[%s13205_s3 + $0x90] sm:$0xff]  ;;  %v2982_v32 = vld [vmem:[%s13205_s3 + $0x98] sm:$0xff] }
  0x7c   :  { %7715 = vmatpush1.bf16.msra.mxu0 %v7714_v39  ;;  %7723 = vmatpush1.bf16.msra.mxu1 %v7722_v40  ;;  %v102_v39 = vld [vmem:[%s13204_s2 + $0x1c0] sm:$0xff]  ;;  %v2973_v21 = vld [vmem:[%s13205_s3 + $0x50] sm:$0xff] }
  0x7d   :  { %7717 = vmatprep.subr.bf16.mxu0 %v7716_v43  ;;  %7725 = vmatprep.subr.bf16.mxu1 %v7724_v44  ;;  %v166_v40 = vld [vmem:[%s13204_s2 + $0x3c0] sm:$0xff]  ;;  %v104_v43 = vld [vmem:[%s13204_s2 + $0x1d0] sm:$0xff] }
  0x7e   :  { %1932 = vmatprep.mubr.f32.mxu0 %v8862_v7  ;;  %2003 = vmatprep.mubr.f32.mxu1 %v8862_v7  ;;  %v168_v44 = vld [vmem:[%s13204_s2 + $0x3d0] sm:$0xff]  ;;  %v7762_v49 = vpack.c.bf16 %v166_v40, %v102_v39  ;;  %v7828_v39 = vpack.c.bf16 %v3014_v34, %v3013_v33  ;;  %v2975_v33 = vld [vmem:[%s13205_s3 + $0x60] sm:$0xff]  ;;  %v2976_v34 = vld [vmem:[%s13205_s3 + $0x68] sm:$0xff] }
  0x7f   :  { %v7770_v50 = vpack.c.bf16 %v168_v44, %v104_v43  ;;  %v2997_v40 = vld [vmem:[%s13205_s3 + $0x110] sm:$0xff]  ;;  %v2984_v43 = vld [vmem:[%s13205_s3 + $0xa8] sm:$0xff]  ;;  %v3015_v44 = vld [vmem:[%s13205_s3 + $0x1a0] sm:$0xff] }
  0x80   :  { %7719 = vmatpush1.bf16.msra.mxu0 %v7718_v52  ;;  %7727 = vmatpush1.bf16.msra.mxu1 %v7726_v53  ;;  %v230_v52 = vld [vmem:[%s13204_s2 + $0x5c0] sm:$0xff]  ;;  %v3045_v9 = vld [vmem:[%s13205_s3 + $0x290] sm:$0xff] }
  0x81   :  { %7729 = vmatprep.subr.bf16.mxu0 %v7728_v56  ;;  %7737 = vmatprep.subr.bf16.mxu1 %v7736_v57  ;;  %v294_v53 = vld [vmem:[%s13204_s2 + $0x7c0] sm:$0xff]  ;;  %v232_v56 = vld [vmem:[%s13204_s2 + $0x5d0] sm:$0xff] }
  0x82   :  { %v296_v57 = vld [vmem:[%s13204_s2 + $0x7d0] sm:$0xff]  ;;  %v7766_v62 = vpack.c.bf16 %v294_v53, %v230_v52  ;;  %v7832_v52 = vpack.c.bf16 %v3016_v45, %v3015_v44  ;;  %v3000_v53 = vld [vmem:[%s13205_s3 + $0x128] sm:$0xff]  ;;  %v2978_v45 = vld [vmem:[%s13205_s3 + $0x78] sm:$0xff] }
  0x83   :  { %6277 = vmatmul.mubr.msk.f32.vlgmr.msra.gmra.mrb[22].mxu0 %vm302_vm0, %v8996_v51  ;;  %6278 = vmatmul.mubr.msk.f32.vlgmr.msra.gmra.mrb[22].mxu1 %vm302_vm0, %v8996_v51  ;;  %v7774_v63 = vpack.c.bf16 %v296_v57, %v232_v56  ;;  %v3017_v56 = vld [vmem:[%s13205_s3 + $0x1b0] sm:$0xff]  ;;  %v3018_v57 = vld [vmem:[%s13205_s3 + $0x1b8] sm:$0xff] }
  0x84   :  { %7731 = vmatpush1.bf16.msra.mxu0 %v7730_v0  ;;  %7739 = vmatpush1.bf16.msra.mxu1 %v7738_v1  ;;  %v106_v0 = vld [vmem:[%s13204_s2 + $0x1e0] sm:$0xff]  ;;  %v2977_v44 = vld [vmem:[%s13205_s3 + $0x70] sm:$0xff] }
  0x85   :  { %7733 = vmatprep.subr.bf16.mxu0 %v7732_v4  ;;  %7741 = vmatprep.subr.bf16.mxu1 %v7740_v5  ;;  %v170_v1 = vld [vmem:[%s13204_s2 + $0x3e0] sm:$0xff]  ;;  %v108_v4 = vld [vmem:[%s13204_s2 + $0x1f0] sm:$0xff] }
  0x86   :  { %2074 = vmatprep.mubr.f32.mxu0 %v8862_v7  ;;  %2145 = vmatprep.mubr.f32.mxu1 %v8862_v7  ;;  %v172_v5 = vld [vmem:[%s13204_s2 + $0x3f0] sm:$0xff]  ;;  %v7778_v11 = vpack.c.bf16 %v170_v1, %v106_v0  ;;  %v3002_v1 = vld [vmem:[%s13205_s3 + $0x138] sm:$0xff] }
  0x87   :  { %v7786_v12 = vpack.c.bf16 %v172_v5, %v108_v4  ;;  %v3001_v0 = vld [vmem:[%s13205_s3 + $0x130] sm:$0xff]  ;;  %v3019_v4 = vld [vmem:[%s13205_s3 + $0x1c0] sm:$0xff]  ;;  %v3020_v5 = vld [vmem:[%s13205_s3 + $0x1c8] sm:$0xff] }
  0x88   :  { %7735 = vmatpush1.bf16.msra.mxu0 %v7734_v13  ;;  %7743 = vmatpush1.bf16.msra.mxu1 %v7742_v14  ;;  %v234_v13 = vld [vmem:[%s13204_s2 + $0x5e0] sm:$0xff]  ;;  %v7838_v8 = vpack.c.bf16 %v3002_v1, %v3001_v0 }
  0x89   :  { %7745 = vmatprep.subr.bf16.mxu0 %v7744_v17  ;;  %7753 = vmatprep.subr.bf16.mxu1 %v7752_v18  ;;  %v298_v14 = vld [vmem:[%s13204_s2 + $0x7e0] sm:$0xff]  ;;  %v236_v17 = vld [vmem:[%s13204_s2 + $0x5f0] sm:$0xff] }
  0x8a   :  { %v300_v18 = vld [vmem:[%s13204_s2 + $0x7f0] sm:$0xff]  ;;  %v7782_v23 = vpack.c.bf16 %v298_v14, %v234_v13  ;;  %v3003_v13 = vld [vmem:[%s13205_s3 + $0x140] sm:$0xff]  ;;  %v3004_v14 = vld [vmem:[%s13205_s3 + $0x148] sm:$0xff]  ;;  %s8835_s2 = scalar_lea.vmem %s6245_s9, 128 }
  0x8b   :  { %6279 = vmatmul.mubr.msk.f32.vlgmr.msra.gmra.mrb[24].mxu0 %vm302_vm0, %v8996_v51  ;;  %6280 = vmatmul.mubr.msk.f32.vlgmr.msra.gmra.mrb[24].mxu1 %vm302_vm0, %v8996_v51  ;;  %v7790_v24 = vpack.c.bf16 %v300_v18, %v236_v17  ;;  %v3021_v17 = vld [vmem:[%s13205_s3 + $0x1d0] sm:$0xff]  ;;  %v3022_v18 = vld [vmem:[%s13205_s3 + $0x1d8] sm:$0xff]  ;;  %v7842_v20 = vpack.c.bf16 %v3004_v14, %v3003_v13  ;;  %p8836_p5 = scmp.ne.s32.totalorder %s6245_s9, %s8835_s2  ;;  %p8841_p7 = scmp.lt.s32.totalorder %s8835_s2, %s8835_s2 }
  0x8c   :  { %7747 = vmatpush1.bf16.msra.mxu0 %v7746_v25  ;;  %7755 = vmatpush1.bf16.msra.mxu1 %v7754_v26  ;;  %v2963_v25 = vld [vmem:[%s13205_s3] sm:$0xff]  ;;  %v2964_v26 = vld [vmem:[%s13205_s3 + $0x8] sm:$0xff]  ;;  %v3077_v13 = vld [vmem:[%s13205_s3 + $0x390] sm:$0xff] }
  0x8d   :  { %7749 = vmatprep.subr.bf16.mxu0 %v7748_v29  ;;  %7757 = vmatprep.subr.bf16.mxu1 %v7756_v30  ;;  %v2995_v29 = vld [vmem:[%s13205_s3 + $0x100] sm:$0xff]  ;;  %v2996_v30 = vld [vmem:[%s13205_s3 + $0x108] sm:$0xff]  ;;  %v7794_v35 = vpack.c.bf16 %v2964_v26, %v2963_v25  ;;  %v3005_v25 = vld [vmem:[%s13205_s3 + $0x150] sm:$0xff]  ;;  %p8842_p8 = por %p8841_p7, %p8840_p6 }
  0x8e   :  { %2216 = vmatprep.mubr.f32.mxu0 %v8862_v7  ;;  %2287 = vmatprep.mubr.f32.mxu1 %v8862_v7  ;;  %v7826_v36 = vpack.c.bf16 %v2996_v30, %v2995_v29  ;;  %v3006_v26 = vld [vmem:[%s13205_s3 + $0x158] sm:$0xff]  ;;  %v3023_v29 = vld [vmem:[%s13205_s3 + $0x1e0] sm:$0xff]  ;;  %v3024_v30 = vld [vmem:[%s13205_s3 + $0x1e8] sm:$0xff] }
  0x8f   :  { %v3078_v14 = vld [vmem:[%s13205_s3 + $0x398] sm:$0xff]  ;;  %p8843_p9 = pnand %p8842_p8, %p8836_p5 }
  0x90   :  { %7751 = vmatpush1.bf16.msra.mxu0 %v7750_v37  ;;  %7759 = vmatpush1.bf16.msra.mxu1 %v7758_v38  ;;  %v2966_v37 = vld [vmem:[%s13205_s3 + $0x18] sm:$0xff]  ;;  %v7796_v38 = vpack.c.bf16 %v2982_v32, %v2981_v31  ;;  %v7814_v31 = vpack.c.bf16 %v2974_v22, %v2973_v21  ;;  %v7846_v32 = vpack.c.bf16 %v3006_v26, %v3005_v25  ;;  %v3029_v26 = vld [vmem:[%s13205_s3 + $0x210] sm:$0xff] }
  0x91   :  { %7761 = vmatprep.subr.bf16.mxu0 %v7760_v41  ;;  %7769 = vmatprep.subr.bf16.mxu1 %v7768_v42  ;;  %v2998_v41 = vld [vmem:[%s13205_s3 + $0x118] sm:$0xff]  ;;  %v2983_v42 = vld [vmem:[%s13205_s3 + $0xa0] sm:$0xff]  ;;  %v7892_v25 = vpack.c.bf16 %v3078_v14, %v3077_v13  ;;  %v3085_v14 = vld [vmem:[%s13205_s3 + $0x3d0] sm:$0xff] }
  0x92   :  { %v7830_v47 = vpack.c.bf16 %v2998_v41, %v2997_v40  ;;  %v3025_v40 = vld [vmem:[%s13205_s3 + $0x1f0] sm:$0xff]  ;;  %v3026_v41 = vld [vmem:[%s13205_s3 + $0x1f8] sm:$0xff] }
  0x93   :  { %6281 = vmatmul.mubr.msk.f32.vlgmr.msra.gmra.mrb[26].mxu0 %vm302_vm0, %v8996_v51  ;;  %6282 = vmatmul.mubr.msk.f32.vlgmr.msra.gmra.mrb[26].mxu1 %vm302_vm0, %v8996_v51  ;;  %v3054_v13 = vld [vmem:[%s13205_s3 + $0x2d8] sm:$0xff] }
  0x94   :  { %7763 = vmatpush1.bf16.msra.mxu0 %v7762_v49  ;;  %7771 = vmatpush1.bf16.msra.mxu1 %v7770_v50  ;;  %v2968_v49 = vld [vmem:[%s13205_s3 + $0x28] sm:$0xff]  ;;  %v7800_v50 = vpack.c.bf16 %v2984_v43, %v2983_v42  ;;  %v7818_v42 = vpack.c.bf16 %v2976_v34, %v2975_v33  ;;  %v13208_v33 = vmov 1.0  }
  0x95   :  { %7765 = vmatprep.subr.bf16.mxu0 %v7764_v54  ;;  %7773 = vmatprep.subr.bf16.mxu1 %v7772_v55  ;;  %v2985_v54 = vld [vmem:[%s13205_s3 + $0xb0] sm:$0xff]  ;;  %v2986_v55 = vld [vmem:[%s13205_s3 + $0xb8] sm:$0xff]  ;;  %v7802_v58 = vpack.c.bf16 %v2968_v49, %v2967_v48  ;;  %v3048_v34 = vld [vmem:[%s13205_s3 + $0x2a8] sm:$0xff] }
  0x96   :  { %2358 = vmatprep.mubr.f32.mxu0 %v8862_v7  ;;  %2429 = vmatprep.mubr.f32.mxu1 %v8862_v7  ;;  %v3009_v48 = vld [vmem:[%s13205_s3 + $0x170] sm:$0xff]  ;;  %v3010_v49 = vld [vmem:[%s13205_s3 + $0x178] sm:$0xff] }
  0x98   :  { %7767 = vmatpush1.bf16.msra.mxu0 %v7766_v62  ;;  %7775 = vmatpush1.bf16.msra.mxu1 %v7774_v63  ;;  %v7804_v62 = vpack.c.bf16 %v2986_v55, %v2985_v54  ;;  %v7836_v63 = vpack.c.bf16 %v3018_v57, %v3017_v56  ;;  %v7822_v54 = vpack.c.bf16 %v2978_v45, %v2977_v44  ;;  %v3049_v44 = vld [vmem:[%s13205_s3 + $0x2b0] sm:$0xff]  ;;  %v3050_v45 = vld [vmem:[%s13205_s3 + $0x2b8] sm:$0xff] }
  0x99   :  { %7777 = vmatprep.subr.bf16.mxu0 %v7776_v2  ;;  %7785 = vmatprep.subr.bf16.mxu1 %v7784_v3  ;;  %v2987_v2 = vld [vmem:[%s13205_s3 + $0xc0] sm:$0xff]  ;;  %v2988_v3 = vld [vmem:[%s13205_s3 + $0xc8] sm:$0xff]  ;;  %v7854_v55 = vpack.c.bf16 %v3010_v49, %v3009_v48  ;;  %v3081_v48 = vld [vmem:[%s13205_s3 + $0x3b0] sm:$0xff] }
  0x9a   :  { %v3082_v49 = vld [vmem:[%s13205_s3 + $0x3b8] sm:$0xff] }
  0x9b   :  { %6283 = vmatmul.mubr.msk.f32.vlgmr.msra.gmra.mrb[28].mxu0 %vm302_vm0, %v8996_v51  ;;  %6284 = vmatmul.mubr.msk.f32.vlgmr.msra.gmra.mrb[28].mxu1 %vm302_vm0, %v8996_v51 }
  0x9c   :  { %7779 = vmatpush1.bf16.msra.mxu0 %v7778_v11  ;;  %7787 = vmatpush1.bf16.msra.mxu1 %v7786_v12  ;;  %v7808_v11 = vpack.c.bf16 %v2988_v3, %v2987_v2  ;;  %v7840_v12 = vpack.c.bf16 %v3020_v5, %v3019_v4  ;;  %v3027_v3 = vld [vmem:[%s13205_s3 + $0x200] sm:$0xff]  ;;  %v3028_v4 = vld [vmem:[%s13205_s3 + $0x208] sm:$0xff] }
  0x9d   :  { %7781 = vmatprep.subr.bf16.mxu0 %v7780_v15  ;;  %7789 = vmatprep.subr.bf16.mxu1 %v7788_v16  ;;  %v2989_v15 = vld [vmem:[%s13205_s3 + $0xd0] sm:$0xff]  ;;  %v2990_v16 = vld [vmem:[%s13205_s3 + $0xd8] sm:$0xff] }
  0x9e   :  { %2500 = vmatprep.mubr.f32.mxu0 %v8862_v7  ;;  %2571 = vmatprep.mubr.f32.mxu1 %v8862_v7  ;;  %v2965_v7 = vld [vmem:[%s13205_s3 + $0x10] sm:$0xff] }
  0x9f   :  { %v7798_v46 = vpack.c.bf16 %v2966_v37, %v2965_v7  ;;  %v3007_v7 = vld [vmem:[%s13205_s3 + $0x160] sm:$0xff]  ;;  %v3008_v37 = vld [vmem:[%s13205_s3 + $0x168] sm:$0xff] }
  0xa0   :  { %7783 = vmatpush1.bf16.msra.mxu0 %v7782_v23  ;;  %7791 = vmatpush1.bf16.msra.mxu1 %v7790_v24  ;;  %v7812_v23 = vpack.c.bf16 %v2990_v16, %v2989_v15  ;;  %v7844_v24 = vpack.c.bf16 %v3022_v18, %v3021_v17  ;;  %v7850_v43 = vpack.c.bf16 %v3008_v37, %v3007_v7 }
  0xa1   :  { %7793 = vmatprep.subr.bf16.mxu0 %v7792_v27  ;;  %7825 = vmatprep.subr.bf16.mxu1 %v7824_v28  ;;  %v2991_v27 = vld [vmem:[%s13205_s3 + $0xe0] sm:$0xff]  ;;  %v2992_v28 = vld [vmem:[%s13205_s3 + $0xe8] sm:$0xff] }
  0xa3   :  { %6285 = vmatmul.mubr.msk.f32.vlgmr.msra.gmra.mrb[30].mxu0 %vm302_vm0, %v8996_v51  ;;  %6286 = vmatmul.mubr.msk.f32.vlgmr.msra.gmra.mrb[30].mxu1 %vm302_vm0, %v8996_v51  ;;  %v2999_v51 = vld [vmem:[%s13205_s3 + $0x120] sm:$0xff] }
  0xa4   :  { %7795 = vmatpush3.bf16.msra.mxu0 %v7794_v35  ;;  %7827 = vmatpush3.bf16.msra.mxu1 %v7826_v36  ;;  %v7834_v59 = vpack.c.bf16 %v3000_v53, %v2999_v51  ;;  %v7816_v35 = vpack.c.bf16 %v2992_v28, %v2991_v27  ;;  %v7848_v36 = vpack.c.bf16 %v3024_v30, %v3023_v29  ;;  %v3075_v51 = vld [vmem:[%s13205_s3 + $0x380] sm:$0xff]  ;;  %v3076_v53 = vld [vmem:[%s13205_s3 + $0x388] sm:$0xff]  ;;  %v3030_v27 = vld [vmem:[%s13205_s3 + $0x218] sm:$0xff] }
  0xa5   :  { %7797 = vmatprep.subr.bf16.mxu0 %v7796_v38  ;;  %7829 = vmatprep.subr.bf16.mxu1 %v7828_v39  ;;  %v2993_v38 = vld [vmem:[%s13205_s3 + $0xf0] sm:$0xff]  ;;  %v2994_v39 = vld [vmem:[%s13205_s3 + $0xf8] sm:$0xff]  ;;  %v7888_v57 = vpack.c.bf16 %v3076_v53, %v3075_v51  ;;  %v3047_v30 = vld [vmem:[%s13205_s3 + $0x2a0] sm:$0xff]  ;;  %v7862_v7 = vpack.c.bf16 %v3030_v27, %v3029_v26 }
  0xa6   :  { %v3061_v28 = vld [vmem:[%s13205_s3 + $0x310] sm:$0xff]  ;;  %v3062_v29 = vld [vmem:[%s13205_s3 + $0x318] sm:$0xff] }
  0xa7   :  { %v7894_v37 = vpack.c.bf16 %v3062_v29, %v3061_v28  ;;  %v3069_v26 = vld [vmem:[%s13205_s3 + $0x350] sm:$0xff]  ;;  %v3070_v27 = vld [vmem:[%s13205_s3 + $0x358] sm:$0xff]  ;;  %v3055_v28 = vld [vmem:[%s13205_s3 + $0x2e0] sm:$0xff] }
  0xa8   :  { %7799 = vmatpush3.bf16.msra.mxu0 %v7798_v46  ;;  %7831 = vmatpush3.bf16.msra.mxu1 %v7830_v47  ;;  %v7820_v46 = vpack.c.bf16 %v2994_v39, %v2993_v38  ;;  %v7852_v47 = vpack.c.bf16 %v3026_v41, %v3025_v40  ;;  %v3031_v38 = vld [vmem:[%s13205_s3 + $0x220] sm:$0xff]  ;;  %v3032_v39 = vld [vmem:[%s13205_s3 + $0x228] sm:$0xff]  ;;  %v7864_v41 = vpack.c.bf16 %v3048_v34, %v3047_v30 }
  0xa9   :  { %7801 = vmatprep.subr.bf16.mxu0 %v7800_v50  ;;  %7833 = vmatprep.subr.bf16.mxu1 %v7832_v52  ;;  %v3043_v50 = vld [vmem:[%s13205_s3 + $0x280] sm:$0xff]  ;;  %v3044_v52 = vld [vmem:[%s13205_s3 + $0x288] sm:$0xff]  ;;  %v7866_v51 = vpack.c.bf16 %v3032_v39, %v3031_v38  ;;  %v7910_v34 = vpack.c.bf16 %v3070_v27, %v3069_v26 }
  0xaa   :  { %v7856_v56 = vpack.c.bf16 %v3044_v52, %v3043_v50  ;;  %v3063_v40 = vld [vmem:[%s13205_s3 + $0x320] sm:$0xff]  ;;  %v3056_v29 = vld [vmem:[%s13205_s3 + $0x2e8] sm:$0xff] }
  0xab   :  { %v3087_v30 = vld [vmem:[%s13205_s3 + $0x3e0] sm:$0xff]  ;;  %v7880_v38 = vpack.c.bf16 %v3056_v29, %v3055_v28 }
  0xac   :  { %7803 = vmatpush3.bf16.msra.mxu0 %v7802_v58  ;;  %7835 = vmatpush3.bf16.msra.mxu1 %v7834_v59  ;;  %v2578_v58 = vlaneseq }
  0xad   :  { %7805 = vmatprep.subr.bf16.mxu0 %v7804_v62  ;;  %7837 = vmatprep.subr.bf16.mxu1 %v7836_v63 }
  0xae   :  { %v9974_v59 = vand.u32 127, %v2578_v58 }
  0xb0   :  { %7807 = vmatpush3.bf16.msra.mxu0 %v7806_v6  ;;  %7839 = vmatpush3.bf16.msra.mxu1 %v7838_v8  ;;  %v2581_v60 = vadd.s32 256, %v9974_v59  ;;  %v2580_v61 = vadd.s32 128, %v9974_v59  ;;  %v2582_v62 = vadd.s32 384, %v9974_v59  ;;  %v2643_v2 = vand.u32 255, %v9974_v59  ;;  %v3059_v6 = vld [vmem:[%s13205_s3 + $0x300] sm:$0xff]  ;;  %v3060_v8 = vld [vmem:[%s13205_s3 + $0x308] sm:$0xff] }
  0xb1   :  { %7809 = vmatprep.subr.bf16.mxu0 %v7808_v11  ;;  %7841 = vmatprep.subr.bf16.mxu1 %v7840_v12  ;;  %v3046_v12 = vld [vmem:[%s13205_s3 + $0x298] sm:$0xff]  ;;  %v2584_v15 = vadd.s32 640, %v9974_v59  ;;  %v2586_v16 = vadd.s32 896, %v9974_v59 }
  0xb2   :  { %v2645_v63 = vand.u32 255, %v2581_v60  ;;  %v2644_v0 = vand.u32 255, %v2580_v61  ;;  %v2646_v1 = vand.u32 255, %v2582_v62  ;;  %v2707_v17 = vcvt.s32.f32 %v2643_v2  ;;  %v3065_v61 = vld [vmem:[%s13205_s3 + $0x330] sm:$0xff]  ;;  %v3066_v62 = vld [vmem:[%s13205_s3 + $0x338] sm:$0xff]  ;;  %v3084_v2 = vld [vmem:[%s13205_s3 + $0x3c8] sm:$0xff] }
  0xb3   :  { %v7900_v60 = vpack.c.bf16 %v3082_v49, %v3081_v48 }
  0xb4   :  { %7811 = vmatpush3.bf16.msra.mxu0 %v7810_v19  ;;  %7843 = vmatpush3.bf16.msra.mxu1 %v7842_v20  ;;  %v2709_v5 = vcvt.s32.f32 %v2645_v63  ;;  %v2708_v10 = vcvt.s32.f32 %v2644_v0  ;;  %v2710_v11 = vcvt.s32.f32 %v2646_v1  ;;  %v7858_v20 = vpack.c.bf16 %v3028_v4, %v3027_v3  ;;  %v3051_v63 = vld [vmem:[%s13205_s3 + $0x2c0] sm:$0xff]  ;;  %v3052_v0 = vld [vmem:[%s13205_s3 + $0x2c8] sm:$0xff] }
  0xb5   :  { %7813 = vmatprep.subr.bf16.mxu0 %v7812_v23  ;;  %7845 = vmatprep.subr.bf16.mxu1 %v7844_v24  ;;  %v7890_v23 = vpack.c.bf16 %v3060_v8, %v3059_v6  ;;  %v7860_v24 = vpack.c.bf16 %v3046_v12, %v3045_v9  ;;  %v3083_v1 = vld [vmem:[%s13205_s3 + $0x3c0] sm:$0xff]  ;;  %v7902_v4 = vpack.c.bf16 %v3066_v62, %v3065_v61  ;;  %v3036_v6 = vld [vmem:[%s13205_s3 + $0x248] sm:$0xff]  ;;  %v3053_v12 = vld [vmem:[%s13205_s3 + $0x2d0] sm:$0xff] }
  0xb6   :  { %v7872_v8 = vpack.c.bf16 %v3052_v0, %v3051_v63  ;;  %v7904_v9 = vpack.c.bf16 %v3084_v2, %v3083_v1  ;;  %v3073_v63 = vld [vmem:[%s13205_s3 + $0x370] sm:$0xff]  ;;  %v3074_v0 = vld [vmem:[%s13205_s3 + $0x378] sm:$0xff]  ;;  %v3107_v1 = vld [vmem:[%s13205_s3 + $0x480] sm:$0xff] }
  0xb7   :  { %v3108_v2 = vld [vmem:[%s13205_s3 + $0x488] sm:$0xff] }
  0xb8   :  { %7815 = vmatpush3.bf16.msra.mxu0 %v7814_v31  ;;  %7847 = vmatpush3.bf16.msra.mxu1 %v7846_v32  ;;  %v2648_v31 = vand.u32 255, %v2584_v15  ;;  %v2650_v32 = vand.u32 255, %v2586_v16  ;;  %v3086_v15 = vld [vmem:[%s13205_s3 + $0x3d8] sm:$0xff] }
  0xb9   :  { %7817 = vmatprep.subr.bf16.mxu0 %v7816_v35  ;;  %7849 = vmatprep.subr.bf16.mxu1 %v7848_v36  ;;  %v3079_v35 = vld [vmem:[%s13205_s3 + $0x3a0] sm:$0xff]  ;;  %v3080_v36 = vld [vmem:[%s13205_s3 + $0x3a8] sm:$0xff] }
  0xbc   :  { %7819 = vmatpush3.bf16.msra.mxu0 %v7818_v42  ;;  %7851 = vmatpush3.bf16.msra.mxu1 %v7850_v43  ;;  %v7896_v42 = vpack.c.bf16 %v3080_v36, %v3079_v35  ;;  %v3064_v43 = vld [vmem:[%s13205_s3 + $0x328] sm:$0xff]  ;;  %v3039_v35 = vld [vmem:[%s13205_s3 + $0x260] sm:$0xff] }
  0xbd   :  { %7821 = vmatprep.subr.bf16.mxu0 %v7820_v46  ;;  %7853 = vmatprep.subr.bf16.mxu1 %v7852_v47  ;;  %v2712_v46 = vcvt.s32.f32 %v2648_v31  ;;  %v2714_v47 = vcvt.s32.f32 %v2650_v32  ;;  %v7898_v53 = vpack.c.bf16 %v3064_v43, %v3063_v40  ;;  %v3088_v31 = vld [vmem:[%s13205_s3 + $0x3e8] sm:$0xff]  ;;  %v3071_v40 = vld [vmem:[%s13205_s3 + $0x360] sm:$0xff]  ;;  %v3058_v43 = vld [vmem:[%s13205_s3 + $0x2f8] sm:$0xff] }
  0xbe   :  { %v3040_v36 = vld [vmem:[%s13205_s3 + $0x268] sm:$0xff]  ;;  %v7912_v39 = vpack.c.bf16 %v3088_v31, %v3087_v30 }
  0xc0   :  { %7823 = vmatpush3.bf16.msra.mxu0 %v7822_v54  ;;  %7855 = vmatpush3.bf16.msra.mxu1 %v7854_v55  ;;  %v7868_v54 = vpack.c.bf16 %v3050_v45, %v3049_v44  ;;  %v3033_v55 = vld [vmem:[%s13205_s3 + $0x230] sm:$0xff]  ;;  %v3090_v45 = vld [vmem:[%s13205_s3 + $0x3f8] sm:$0xff] }
  0xc1   :  { %7857 = vmatprep.subr.bf16.mxu0 %v7856_v56  ;;  %7889 = vmatprep.subr.bf16.mxu1 %v7888_v57  ;;  %v3034_v56 = vld [vmem:[%s13205_s3 + $0x238] sm:$0xff]  ;;  %v3089_v44 = vld [vmem:[%s13205_s3 + $0x3f0] sm:$0xff] }
  0xc2   :  { %v7870_v3 = vpack.c.bf16 %v3034_v56, %v3033_v55  ;;  %v3041_v56 = vld [vmem:[%s13205_s3 + $0x270] sm:$0xff]  ;;  %v7916_v62 = vpack.c.bf16 %v3090_v45, %v3089_v44 }
  0xfe   :  { %v372_v18 = vpop.f32.mrb[0].mxu0  ;;  %v443_v19 = vpop.f32.mrb[0].mxu1 }
  0xff   :  { %vm2773_vm1 = vcmp.eq.f32.partialorder %v443_v19, %v2709_v5  ;;  %v374_v21 = vpop.f32.mrb[1].mxu0  ;;  %v445_v22 = vpop.f32.mrb[1].mxu1  ;;  %vm2771_vm4 = vcmp.eq.f32.partialorder %v372_v18, %v2707_v17  ;;  %v3035_v5 = vld [vmem:[%s13205_s3 + $0x240] sm:$0xff] }
 0x100   :  { %vm2772_vm2 = vcmp.eq.f32.partialorder %v374_v21, %v2708_v10  ;;  %vm2774_vm3 = vcmp.eq.f32.partialorder %v445_v22, %v2710_v11  ;;  %v3067_v10 = vld [vmem:[%s13205_s3 + $0x340] sm:$0xff]  ;;  %v3068_v11 = vld [vmem:[%s13205_s3 + $0x348] sm:$0xff]  ;;  %v7874_v18 = vpack.c.bf16 %v3036_v6, %v3035_v5  ;;  %v3038_v21 = vld [vmem:[%s13205_s3 + $0x258] sm:$0xff] }
 0x101   :  { %6351 = vmatprep.mubr.msk.f32.mxu0 %vm2772_vm2, %v13208_v33  ;;  %6353 = vmatprep.mubr.msk.f32.mxu1 %vm2774_vm3, %v13208_v33  ;;  %v7906_v19 = vpack.c.bf16 %v3068_v11, %v3067_v10  ;;  %v7918_v11 = vpack.c.bf16 %v3074_v0, %v3073_v63 }
 0x102   :  { %6352 = vmatmul.mubr.msk.f32.vlgmr.msra.gmra.mrb[32].mxu0 %vm2771_vm4, %v13208_v33  ;;  %6354 = vmatmul.mubr.msk.f32.vlgmr.msra.gmra.mrb[32].mxu1 %vm2773_vm1, %v13208_v33 }
 0x103   :  { %7859 = vmatpush3.bf16.msra.mxu0 %v7858_v20  ;;  %7891 = vmatpush3.bf16.msra.mxu1 %v7890_v23  ;;  %v3037_v20 = vld [vmem:[%s13205_s3 + $0x250] sm:$0xff] }
 0x104   :  { %7861 = vmatprep.subr.bf16.mxu0 %v7860_v24  ;;  %7893 = vmatprep.subr.bf16.mxu1 %v7892_v25  ;;  %v7876_v24 = vpack.c.bf16 %v3054_v13, %v3053_v12  ;;  %v7908_v25 = vpack.c.bf16 %v3086_v15, %v3085_v14  ;;  %v7878_v32 = vpack.c.bf16 %v3038_v21, %v3037_v20  ;;  %v3091_v12 = vld [vmem:[%s13205_s3 + $0x400] sm:$0xff]  ;;  %v3092_v13 = vld [vmem:[%s13205_s3 + $0x408] sm:$0xff]  ;;  %v3109_v20 = vld [vmem:[%s13205_s3 + $0x490] sm:$0xff] }
 0x105   :  { %v7920_v14 = vpack.c.bf16 %v3108_v2, %v3107_v1  ;;  %v3110_v21 = vld [vmem:[%s13205_s3 + $0x498] sm:$0xff]  ;;  %v7922_v26 = vpack.c.bf16 %v3092_v13, %v3091_v12  ;;  %v3097_v1 = vld [vmem:[%s13205_s3 + $0x430] sm:$0xff] }
 0x106   :  { %v10059_v50 = vpop.f32.mrb[2].mxu0  ;;  %v10061_v52 = vpop.f32.mrb[2].mxu1 }
 0x107   :  { %7863 = vmatpush3.bf16.msra.mxu0 %v7862_v7  ;;  %7895 = vmatpush3.bf16.msra.mxu1 %v7894_v37  ;;  %v516_v57 = vpop.f32.mrb[3].mxu0  ;;  %v587_v58 = vpop.f32.mrb[3].mxu1  ;;  %v2583_v7 = vadd.s32 512, %v9974_v59  ;;  %v2585_v37 = vadd.s32 768, %v9974_v59 }
 0x108   :  { %7865 = vmatprep.subr.bf16.mxu0 %v7864_v41  ;;  %7897 = vmatprep.subr.bf16.mxu1 %v7896_v42  ;;  %vm2776_vm5 = vcmp.eq.f32.partialorder %v516_v57, %v2712_v46  ;;  %vm2778_vm6 = vcmp.eq.f32.partialorder %v587_v58, %v2714_v47  ;;  %v3072_v41 = vld [vmem:[%s13205_s3 + $0x368] sm:$0xff]  ;;  %v3057_v42 = vld [vmem:[%s13205_s3 + $0x2f0] sm:$0xff]  ;;  %v2588_v46 = vadd.s32 1152, %v9974_v59  ;;  %v2590_v47 = vadd.s32 1408, %v9974_v59  ;;  %v3042_v57 = vld [vmem:[%s13205_s3 + $0x278] sm:$0xff] }
 0x109   :  { %6355 = vmatprep.mubr.msk.f32.mxu0 %vm2776_vm5, %v13208_v33  ;;  %6357 = vmatprep.mubr.msk.f32.mxu1 %vm2778_vm6, %v13208_v33  ;;  %v2649_v55 = vand.u32 255, %v2585_v37  ;;  %v7884_v61 = vpack.c.bf16 %v3058_v43, %v3057_v42  ;;  %v7886_v10 = vpack.c.bf16 %v3042_v57, %v3041_v56  ;;  %v3143_v42 = vld [vmem:[%s13205_s3 + $0x5a0] sm:$0xff]  ;;  %v3144_v43 = vld [vmem:[%s13205_s3 + $0x5a8] sm:$0xff]  ;;  %v3145_v56 = vld [vmem:[%s13205_s3 + $0x5b0] sm:$0xff] }
 0x10a   :  { %v2652_v5 = vand.u32 255, %v2588_v46  ;;  %v2654_v6 = vand.u32 255, %v2590_v47  ;;  %v3095_v46 = vld [vmem:[%s13205_s3 + $0x420] sm:$0xff]  ;;  %v7960_v47 = vpack.c.bf16 %v3144_v43, %v3143_v42  ;;  %v3146_v57 = vld [vmem:[%s13205_s3 + $0x5b8] sm:$0xff]  ;;  %v3133_v42 = vld [vmem:[%s13205_s3 + $0x550] sm:$0xff] }
 0x10b   :  { %7867 = vmatpush3.bf16.msra.mxu0 %v7866_v51  ;;  %7899 = vmatpush3.bf16.msra.mxu1 %v7898_v53  ;;  %v7882_v51 = vpack.c.bf16 %v3040_v36, %v3039_v35  ;;  %v7914_v53 = vpack.c.bf16 %v3072_v41, %v3071_v40  ;;  %v3111_v40 = vld [vmem:[%s13205_s3 + $0x4a0] sm:$0xff]  ;;  %v3112_v41 = vld [vmem:[%s13205_s3 + $0x4a8] sm:$0xff]  ;;  %v3134_v43 = vld [vmem:[%s13205_s3 + $0x558] sm:$0xff] }
 0x10c   :  { %7869 = vmatprep.subr.bf16.mxu0 %v7868_v54  ;;  %7901 = vmatprep.subr.bf16.mxu1 %v7900_v60  ;;  %v2647_v54 = vand.u32 255, %v2583_v7  ;;  %v2716_v27 = vcvt.s32.f32 %v2652_v5  ;;  %v2718_v28 = vcvt.s32.f32 %v2654_v6  ;;  %v7924_v7 = vpack.c.bf16 %v3110_v21, %v3109_v20  ;;  %v3129_v5 = vld [vmem:[%s13205_s3 + $0x530] sm:$0xff]  ;;  %v3130_v6 = vld [vmem:[%s13205_s3 + $0x538] sm:$0xff]  ;;  %v3131_v20 = vld [vmem:[%s13205_s3 + $0x540] sm:$0xff] }
 0x10d   :  { %v7966_v13 = vpack.c.bf16 %v3130_v6, %v3129_v5  ;;  %v3132_v21 = vld [vmem:[%s13205_s3 + $0x548] sm:$0xff]  ;;  %v2592_v5 = vadd.s32 1664, %v9974_v59  ;;  %v2594_v6 = vadd.s32 1920, %v9974_v59 }
 0x10e   :  { %v10113_v16 = vpop.f32.mrb[4].mxu0  ;;  %v10115_v17 = vpop.f32.mrb[4].mxu1 }
 0x10f   :  { %7871 = vmatpush3.bf16.msra.mxu0 %v7870_v3  ;;  %7903 = vmatpush3.bf16.msra.mxu1 %v7902_v4  ;;  %v10123_v22 = vpop.f32.mrb[5].mxu0  ;;  %v10125_v23 = vpop.f32.mrb[5].mxu1  ;;  %v3139_v3 = vld [vmem:[%s13205_s3 + $0x580] sm:$0xff]  ;;  %v3140_v4 = vld [vmem:[%s13205_s3 + $0x588] sm:$0xff] }
 0x110   :  { %7873 = vmatprep.subr.bf16.mxu0 %v7872_v8  ;;  %7905 = vmatprep.subr.bf16.mxu1 %v7904_v9  ;;  %v2711_v8 = vcvt.s32.f32 %v2647_v54  ;;  %v2713_v9 = vcvt.s32.f32 %v2649_v55  ;;  %v7952_v15 = vpack.c.bf16 %v3140_v4, %v3139_v3  ;;  %vm2780_vm9 = vcmp.eq.f32.partialorder %v10123_v22, %v2716_v27  ;;  %v3113_v54 = vld [vmem:[%s13205_s3 + $0x4b0] sm:$0xff]  ;;  %v3114_v55 = vld [vmem:[%s13205_s3 + $0x4b8] sm:$0xff] }
 0x111   :  { %vm2782_vm10 = vcmp.eq.f32.partialorder %v10125_v23, %v2718_v28  ;;  %v3098_v22 = vld [vmem:[%s13205_s3 + $0x438] sm:$0xff]  ;;  %v7932_v3 = vpack.c.bf16 %v3114_v55, %v3113_v54  ;;  %v7964_v4 = vpack.c.bf16 %v3146_v57, %v3145_v56  ;;  %v2587_v54 = vadd.s32 1024, %v9974_v59 }
 0x112   :  { %vm2775_vm7 = vcmp.eq.f32.partialorder %v10059_v50, %v2711_v8  ;;  %vm2777_vm8 = vcmp.eq.f32.partialorder %v10061_v52, %v2713_v9  ;;  %v3096_v50 = vld [vmem:[%s13205_s3 + $0x428] sm:$0xff]  ;;  %v7928_v52 = vpack.c.bf16 %v3112_v41, %v3111_v40  ;;  %v3115_v8 = vld [vmem:[%s13205_s3 + $0x4c0] sm:$0xff]  ;;  %v7934_v12 = vpack.c.bf16 %v3098_v22, %v3097_v1  ;;  %v3150_v27 = vld [vmem:[%s13205_s3 + $0x5d8] sm:$0xff] }
 0x113   :  { %7875 = vmatpush3.bf16.msra.mxu0 %v7874_v18  ;;  %7907 = vmatpush3.bf16.msra.mxu1 %v7906_v19  ;;  %v3123_v18 = vld [vmem:[%s13205_s3 + $0x500] sm:$0xff]  ;;  %v3124_v19 = vld [vmem:[%s13205_s3 + $0x508] sm:$0xff]  ;;  %v7930_v63 = vpack.c.bf16 %v3096_v50, %v3095_v46  ;;  %v2589_v55 = vadd.s32 1280, %v9974_v59  ;;  %v3121_v1 = vld [vmem:[%s13205_s3 + $0x4f0] sm:$0xff] }
 0x114   :  { %7877 = vmatprep.subr.bf16.mxu0 %v7876_v24  ;;  %7909 = vmatprep.subr.bf16.mxu1 %v7908_v25  ;;  %v3141_v24 = vld [vmem:[%s13205_s3 + $0x590] sm:$0xff]  ;;  %v3142_v25 = vld [vmem:[%s13205_s3 + $0x598] sm:$0xff]  ;;  %v7954_v31 = vpack.c.bf16 %v3124_v19, %v3123_v18  ;;  %v3116_v9 = vld [vmem:[%s13205_s3 + $0x4c8] sm:$0xff] }
 0x115   :  { %v7956_v37 = vpack.c.bf16 %v3142_v25, %v3141_v24  ;;  %v7936_v18 = vpack.c.bf16 %v3116_v9, %v3115_v8  ;;  %v3117_v24 = vld [vmem:[%s13205_s3 + $0x4d0] sm:$0xff]  ;;  %v3118_v25 = vld [vmem:[%s13205_s3 + $0x4d8] sm:$0xff]  ;;  %v3151_v46 = vld [vmem:[%s13205_s3 + $0x5e0] sm:$0xff] }
 0x116   :  { %v10173_v48 = vpop.f32.mrb[6].mxu0  ;;  %v10175_v49 = vpop.f32.mrb[6].mxu1  ;;  %v7940_v40 = vpack.c.bf16 %v3118_v25, %v3117_v24  ;;  %v3152_v50 = vld [vmem:[%s13205_s3 + $0x5e8] sm:$0xff]  ;;  %v3122_v22 = vld [vmem:[%s13205_s3 + $0x4f8] sm:$0xff]  ;;  %v3137_v24 = vld [vmem:[%s13205_s3 + $0x570] sm:$0xff] }
 0x117   :  { %7879 = vmatpush3.bf16.msra.mxu0 %v7878_v32  ;;  %7911 = vmatpush3.bf16.msra.mxu1 %v7910_v34  ;;  %v10183_v58 = vpop.f32.mrb[7].mxu0  ;;  %v10185_v60 = vpop.f32.mrb[7].mxu1  ;;  %v3093_v32 = vld [vmem:[%s13205_s3 + $0x410] sm:$0xff]  ;;  %v3094_v34 = vld [vmem:[%s13205_s3 + $0x418] sm:$0xff]  ;;  %v7976_v57 = vpack.c.bf16 %v3152_v50, %v3151_v46 }
 0x118   :  { %7881 = vmatprep.subr.bf16.mxu0 %v7880_v38  ;;  %7913 = vmatprep.subr.bf16.mxu1 %v7912_v39  ;;  %v3125_v38 = vld [vmem:[%s13205_s3 + $0x510] sm:$0xff]  ;;  %v3126_v39 = vld [vmem:[%s13205_s3 + $0x518] sm:$0xff]  ;;  %v7926_v44 = vpack.c.bf16 %v3094_v34, %v3093_v32  ;;  %v7970_v34 = vpack.c.bf16 %v3132_v21, %v3131_v20  ;;  %v7948_v20 = vpack.c.bf16 %v3122_v22, %v3121_v1 }
 0x119   :  { %v7958_v45 = vpack.c.bf16 %v3126_v39, %v3125_v38  ;;  %v3138_v25 = vld [vmem:[%s13205_s3 + $0x578] sm:$0xff] }
 0x11b   :  { %7883 = vmatpush3.bf16.msra.mxu0 %v7882_v51  ;;  %7915 = vmatpush3.bf16.msra.mxu1 %v7914_v53  ;;  %v3127_v51 = vld [vmem:[%s13205_s3 + $0x520] sm:$0xff]  ;;  %v3128_v53 = vld [vmem:[%s13205_s3 + $0x528] sm:$0xff] }
 0x11c   :  { %7885 = vmatprep.subr.bf16.mxu0 %v7884_v61  ;;  %7917 = vmatprep.subr.bf16.mxu1 %v7916_v62  ;;  %v7962_v0 = vpack.c.bf16 %v3128_v53, %v3127_v51  ;;  %v3103_v51 = vld [vmem:[%s13205_s3 + $0x460] sm:$0xff]  ;;  %v3104_v53 = vld [vmem:[%s13205_s3 + $0x468] sm:$0xff] }
 0x11e   :  { %v10229_v29 = vpop.f32.mrb[8].mxu0  ;;  %v10231_v30 = vpop.f32.mrb[8].mxu1 }
 0x11f   :  { %7887 = vmatpush3.bf16.msra.mxu0 %v7886_v10  ;;  %7919 = vmatpush3.bf16.msra.mxu1 %v7918_v11  ;;  %v10241_v35 = vpop.f32.mrb[9].mxu0  ;;  %v10243_v36 = vpop.f32.mrb[9].mxu1  ;;  %v3147_v10 = vld [vmem:[%s13205_s3 + $0x5c0] sm:$0xff]  ;;  %v3148_v11 = vld [vmem:[%s13205_s3 + $0x5c8] sm:$0xff] }
 0x120   :  { %7921 = vmatprep.subr.bf16.mxu0 %v7920_v14  ;;  %7953 = vmatprep.subr.bf16.mxu1 %v7952_v15  ;;  %v3099_v14 = vld [vmem:[%s13205_s3 + $0x440] sm:$0xff]  ;;  %v3100_v15 = vld [vmem:[%s13205_s3 + $0x448] sm:$0xff]  ;;  %v7968_v19 = vpack.c.bf16 %v3148_v11, %v3147_v10  ;;  %v7946_v10 = vpack.c.bf16 %v3104_v53, %v3103_v51  ;;  %v3173_v51 = vld [vmem:[%s13205_s3 + $0x690] sm:$0xff] }
 0x121   :  { %v7938_v32 = vpack.c.bf16 %v3100_v15, %v3099_v14  ;;  %v3105_v14 = vld [vmem:[%s13205_s3 + $0x470] sm:$0xff]  ;;  %v3106_v15 = vld [vmem:[%s13205_s3 + $0x478] sm:$0xff] }
 0x122   :  { %6356 = vmatmul.mubr.msk.f32.vlgmr.msra.gmra.mrb[34].mxu0 %vm2775_vm7, %v13208_v33  ;;  %6358 = vmatmul.mubr.msk.f32.vlgmr.msra.gmra.mrb[34].mxu1 %vm2777_vm8, %v13208_v33  ;;  %v3174_v53 = vld [vmem:[%s13205_s3 + $0x698] sm:$0xff] }
 0x123   :  { %7923 = vmatpush3.bf16.msra.mxu0 %v7922_v26  ;;  %7955 = vmatpush3.bf16.msra.mxu1 %v7954_v31  ;;  %v3149_v26 = vld [vmem:[%s13205_s3 + $0x5d0] sm:$0xff] }
 0x124   :  { %7925 = vmatprep.subr.bf16.mxu0 %v7924_v7  ;;  %7957 = vmatprep.subr.bf16.mxu1 %v7956_v37  ;;  %v3101_v7 = vld [vmem:[%s13205_s3 + $0x450] sm:$0xff]  ;;  %v3102_v37 = vld [vmem:[%s13205_s3 + $0x458] sm:$0xff]  ;;  %v7972_v41 = vpack.c.bf16 %v3150_v27, %v3149_v26  ;;  %v3171_v26 = vld [vmem:[%s13205_s3 + $0x680] sm:$0xff] }
 0x125   :  { %6359 = vmatprep.mubr.msk.f32.mxu0 %vm2780_vm9, %v13208_v33  ;;  %6361 = vmatprep.mubr.msk.f32.mxu1 %vm2782_vm10, %v13208_v33  ;;  %v3172_v27 = vld [vmem:[%s13205_s3 + $0x688] sm:$0xff] }
 0x126   :  { %v10301_v61 = vpop.f32.mrb[10].mxu0  ;;  %v10303_v62 = vpop.f32.mrb[10].mxu1  ;;  %v7984_v46 = vpack.c.bf16 %v3172_v27, %v3171_v26  ;;  %v3159_v26 = vld [vmem:[%s13205_s3 + $0x620] sm:$0xff] }
 0x127   :  { %7927 = vmatpush3.bf16.msra.mxu0 %v7926_v44  ;;  %7959 = vmatpush3.bf16.msra.mxu1 %v7958_v45  ;;  %v10311_v2 = vpop.f32.mrb[11].mxu0  ;;  %v10313_v23 = vpop.f32.mrb[11].mxu1  ;;  %v3119_v44 = vld [vmem:[%s13205_s3 + $0x4e0] sm:$0xff]  ;;  %v3120_v45 = vld [vmem:[%s13205_s3 + $0x4e8] sm:$0xff] }
 0x128   :  { %7929 = vmatprep.subr.bf16.mxu0 %v7928_v52  ;;  %7961 = vmatprep.subr.bf16.mxu1 %v7960_v47  ;;  %v7942_v52 = vpack.c.bf16 %v3102_v37, %v3101_v7  ;;  %v7974_v47 = vpack.c.bf16 %v3134_v43, %v3133_v42  ;;  %v7944_v56 = vpack.c.bf16 %v3120_v45, %v3119_v44  ;;  %v2656_v7 = vand.u32 255, %v2592_v5  ;;  %v3155_v44 = vld [vmem:[%s13205_s3 + $0x600] sm:$0xff]  ;;  %v3156_v45 = vld [vmem:[%s13205_s3 + $0x608] sm:$0xff] }
 0x129   :  { %v2658_v37 = vand.u32 255, %v2594_v6  ;;  %v7950_v42 = vpack.c.bf16 %v3106_v15, %v3105_v14  ;;  %v7982_v43 = vpack.c.bf16 %v3138_v25, %v3137_v24  ;;  %v3175_v14 = vld [vmem:[%s13205_s3 + $0x6a0] sm:$0xff]  ;;  %v3176_v15 = vld [vmem:[%s13205_s3 + $0x6a8] sm:$0xff] }
 0x12b   :  { %7931 = vmatpush3.bf16.msra.mxu0 %v7930_v63  ;;  %7963 = vmatpush3.bf16.msra.mxu1 %v7962_v0  ;;  %v3135_v63 = vld [vmem:[%s13205_s3 + $0x560] sm:$0xff]  ;;  %v3136_v0 = vld [vmem:[%s13205_s3 + $0x568] sm:$0xff] }
 0x12c   :  { %7933 = vmatprep.subr.bf16.mxu0 %v7932_v3  ;;  %7965 = vmatprep.subr.bf16.mxu1 %v7964_v4  ;;  %v3153_v3 = vld [vmem:[%s13205_s3 + $0x5f0] sm:$0xff]  ;;  %v3154_v4 = vld [vmem:[%s13205_s3 + $0x5f8] sm:$0xff]  ;;  %v7978_v11 = vpack.c.bf16 %v3136_v0, %v3135_v63  ;;  %v2722_v63 = vcvt.s32.f32 %v2658_v37 }
 0x12d   :  { %v7980_v21 = vpack.c.bf16 %v3154_v4, %v3153_v3  ;;  %v3157_v3 = vld [vmem:[%s13205_s3 + $0x610] sm:$0xff]  ;;  %v3158_v4 = vld [vmem:[%s13205_s3 + $0x618] sm:$0xff] }
 0x12e   :  { %v10357_v28 = vpop.f32.mrb[12].mxu0  ;;  %v10359_v31 = vpop.f32.mrb[12].mxu1  ;;  %vm2786_vm14 = vcmp.eq.f32.partialorder %v10185_v60, %v2722_v63  ;;  %v7990_v24 = vpack.c.bf16 %v3158_v4, %v3157_v3  ;;  %v3178_v37 = vld [vmem:[%s13205_s3 + $0x6b8] sm:$0xff]  ;;  %v3163_v3 = vld [vmem:[%s13205_s3 + $0x640] sm:$0xff]  ;;  %v3164_v4 = vld [vmem:[%s13205_s3 + $0x648] sm:$0xff] }
 0x12f   :  { %7935 = vmatpush3.bf16.msra.mxu0 %v7934_v12  ;;  %7967 = vmatpush3.bf16.msra.mxu1 %v7966_v13  ;;  %v10367_v38 = vpop.f32.mrb[13].mxu0  ;;  %v10369_v39 = vpop.f32.mrb[13].mxu1  ;;  %v2651_v12 = vand.u32 255, %v2587_v54  ;;  %v2653_v13 = vand.u32 255, %v2589_v55  ;;  %v3205_v54 = vld [vmem:[%s13205_s3 + $0x790] sm:$0xff]  ;;  %v3206_v55 = vld [vmem:[%s13205_s3 + $0x798] sm:$0xff] }
 0x130   :  { %7937 = vmatprep.subr.bf16.mxu0 %v7936_v18  ;;  %7969 = vmatprep.subr.bf16.mxu1 %v7968_v19 }
 0x133   :  { %7939 = vmatpush3.bf16.msra.mxu0 %v7938_v32  ;;  %7971 = vmatpush3.bf16.msra.mxu1 %v7970_v34  ;;  %v3203_v32 = vld [vmem:[%s13205_s3 + $0x780] sm:$0xff]  ;;  %v3204_v34 = vld [vmem:[%s13205_s3 + $0x788] sm:$0xff] }
 0x134   :  { %7941 = vmatprep.subr.bf16.mxu0 %v7940_v40  ;;  %7973 = vmatprep.subr.bf16.mxu1 %v7972_v41  ;;  %v2715_v40 = vcvt.s32.f32 %v2651_v12  ;;  %v2717_v41 = vcvt.s32.f32 %v2653_v13  ;;  %v8016_v50 = vpack.c.bf16 %v3204_v34, %v3203_v32  ;;  %v3189_v12 = vld [vmem:[%s13205_s3 + $0x710] sm:$0xff]  ;;  %v3190_v13 = vld [vmem:[%s13205_s3 + $0x718] sm:$0xff]  ;;  %v3191_v32 = vld [vmem:[%s13205_s3 + $0x720] sm:$0xff] }
 0x135   :  { %v8022_v25 = vpack.c.bf16 %v3190_v13, %v3189_v12  ;;  %v3192_v34 = vld [vmem:[%s13205_s3 + $0x728] sm:$0xff]  ;;  %v3195_v12 = vld [vmem:[%s13205_s3 + $0x740] sm:$0xff] }
 0x136   :  { %v10417_v8 = vpop.f32.mrb[14].mxu0  ;;  %v10419_v9 = vpop.f32.mrb[14].mxu1  ;;  %vm2779_vm11 = vcmp.eq.f32.partialorder %v10113_v16, %v2715_v40  ;;  %vm2781_vm12 = vcmp.eq.f32.partialorder %v10115_v17, %v2717_v41  ;;  %v3160_v16 = vld [vmem:[%s13205_s3 + $0x628] sm:$0xff]  ;;  %v7992_v17 = vpack.c.bf16 %v3176_v15, %v3175_v14  ;;  %v3209_v40 = vld [vmem:[%s13205_s3 + $0x7b0] sm:$0xff]  ;;  %v3210_v41 = vld [vmem:[%s13205_s3 + $0x7b8] sm:$0xff] }
 0x137   :  { %7943 = vmatpush3.bf16.msra.mxu0 %v7942_v52  ;;  %7975 = vmatpush3.bf16.msra.mxu1 %v7974_v47  ;;  %v10427_v18 = vpop.f32.mrb[15].mxu0  ;;  %v10429_v19 = vpop.f32.mrb[15].mxu1  ;;  %v3187_v52 = vld [vmem:[%s13205_s3 + $0x700] sm:$0xff]  ;;  %v3188_v47 = vld [vmem:[%s13205_s3 + $0x708] sm:$0xff]  ;;  %v3181_v14 = vld [vmem:[%s13205_s3 + $0x6d0] sm:$0xff] }
 0x138   :  { %7945 = vmatprep.subr.bf16.mxu0 %v7944_v56  ;;  %7977 = vmatprep.subr.bf16.mxu1 %v7976_v57  ;;  %v7986_v56 = vpack.c.bf16 %v3156_v45, %v3155_v44  ;;  %v2720_v57 = vcvt.s32.f32 %v2656_v7  ;;  %v8018_v22 = vpack.c.bf16 %v3188_v47, %v3187_v52  ;;  %v3177_v7 = vld [vmem:[%s13205_s3 + $0x6b0] sm:$0xff]  ;;  %v7994_v44 = vpack.c.bf16 %v3160_v16, %v3159_v26  ;;  %v3196_v13 = vld [vmem:[%s13205_s3 + $0x748] sm:$0xff]  ;;  %v3182_v15 = vld [vmem:[%s13205_s3 + $0x6d8] sm:$0xff] }
 0x139   :  { %v8026_v45 = vpack.c.bf16 %v3192_v34, %v3191_v32  ;;  %v7996_v52 = vpack.c.bf16 %v3178_v37, %v3177_v7  ;;  %v8028_v47 = vpack.c.bf16 %v3210_v41, %v3209_v40  ;;  %v8002_v26 = vpack.c.bf16 %v3164_v4, %v3163_v3  ;;  %v3197_v40 = vld [vmem:[%s13205_s3 + $0x750] sm:$0xff]  ;;  %v3198_v41 = vld [vmem:[%s13205_s3 + $0x758] sm:$0xff] }
 0x13a   :  { %vm2784_vm13 = vcmp.eq.f32.partialorder %v10183_v58, %v2720_v57  ;;  %v3162_v58 = vld [vmem:[%s13205_s3 + $0x638] sm:$0xff]  ;;  %v3212_v57 = vld [vmem:[%s13205_s3 + $0x7c8] sm:$0xff]  ;;  %v8034_v16 = vpack.c.bf16 %v3196_v13, %v3195_v12  ;;  %v8004_v7 = vpack.c.bf16 %v3182_v15, %v3181_v14  ;;  %v2593_v3 = vadd.s32 1792, %v9974_v59 }
 0x13b   :  { %7947 = vmatpush3.bf16.msra.mxu0 %v7946_v10  ;;  %7979 = vmatpush3.bf16.msra.mxu1 %v7978_v11  ;;  %v7988_v10 = vpack.c.bf16 %v3174_v53, %v3173_v51  ;;  %v8020_v11 = vpack.c.bf16 %v3206_v55, %v3205_v54  ;;  %v3193_v51 = vld [vmem:[%s13205_s3 + $0x730] sm:$0xff]  ;;  %v3194_v53 = vld [vmem:[%s13205_s3 + $0x738] sm:$0xff]  ;;  %v3179_v54 = vld [vmem:[%s13205_s3 + $0x6c0] sm:$0xff]  ;;  %v2598_v12 = vadd.s32 2432, %v9974_v59  ;;  %v2596_v13 = vadd.s32 2176, %v9974_v59 }
 0x13c   :  { %7949 = vmatprep.subr.bf16.mxu0 %v7948_v20  ;;  %7981 = vmatprep.subr.bf16.mxu1 %v7980_v21  ;;  %v3207_v20 = vld [vmem:[%s13205_s3 + $0x7a0] sm:$0xff]  ;;  %v3208_v21 = vld [vmem:[%s13205_s3 + $0x7a8] sm:$0xff]  ;;  %v3186_v4 = vld [vmem:[%s13205_s3 + $0x6f8] sm:$0xff] }
 0x13d   :  { %v8024_v27 = vpack.c.bf16 %v3208_v21, %v3207_v20  ;;  %v3180_v55 = vld [vmem:[%s13205_s3 + $0x6c8] sm:$0xff]  ;;  %v3213_v20 = vld [vmem:[%s13205_s3 + $0x7d0] sm:$0xff]  ;;  %v3214_v21 = vld [vmem:[%s13205_s3 + $0x7d8] sm:$0xff] }
 0x13e   :  { %v10473_v0 = vpop.f32.mrb[16].mxu0  ;;  %v10475_v1 = vpop.f32.mrb[16].mxu1  ;;  %v8036_v37 = vpack.c.bf16 %v3214_v21, %v3213_v20 }
 0x13f   :  { %7951 = vmatpush3.bf16.msra.mxu0 %v7950_v42  ;;  %7983 = vmatpush3.bf16.msra.mxu1 %v7982_v43  ;;  %v10485_v5 = vpop.f32.mrb[17].mxu0  ;;  %v10487_v6 = vpop.f32.mrb[17].mxu1 }
 0x140   :  { %7985 = vmatprep.subr.bf16.mxu0 %v7984_v46  ;;  %8017 = vmatprep.subr.bf16.mxu1 %v8016_v50  ;;  %v3161_v46 = vld [vmem:[%s13205_s3 + $0x630] sm:$0xff] }
 0x141   :  { %v7998_v63 = vpack.c.bf16 %v3162_v58, %v3161_v46  ;;  %v3215_v46 = vld [vmem:[%s13205_s3 + $0x7e0] sm:$0xff]  ;;  %v3216_v58 = vld [vmem:[%s13205_s3 + $0x7e8] sm:$0xff] }
 0x142   :  { %6360 = vmatmul.mubr.msk.f32.vlgmr.msra.gmra.mrb[36].mxu0 %vm2779_vm11, %v13208_v33  ;;  %6362 = vmatmul.mubr.msk.f32.vlgmr.msra.gmra.mrb[36].mxu1 %vm2781_vm12, %v13208_v33 }
 0x143   :  { %7987 = vmatpush3.bf16.msra.mxu0 %v7986_v56  ;;  %8019 = vmatpush3.bf16.msra.mxu1 %v8018_v22  ;;  %v3211_v56 = vld [vmem:[%s13205_s3 + $0x7c0] sm:$0xff]  ;;  %v8030_v22 = vpack.c.bf16 %v3194_v53, %v3193_v51  ;;  %v3168_v53 = vld [vmem:[%s13205_s3 + $0x668] sm:$0xff] }
 0x144   :  { %7989 = vmatprep.subr.bf16.mxu0 %v7988_v10  ;;  %8021 = vmatprep.subr.bf16.mxu1 %v8020_v11  ;;  %v8000_v10 = vpack.c.bf16 %v3180_v55, %v3179_v54  ;;  %v8032_v11 = vpack.c.bf16 %v3212_v57, %v3211_v56  ;;  %v3167_v51 = vld [vmem:[%s13205_s3 + $0x660] sm:$0xff]  ;;  %v8040_v55 = vpack.c.bf16 %v3216_v58, %v3215_v46  ;;  %v3200_v57 = vld [vmem:[%s13205_s3 + $0x768] sm:$0xff]  ;;  %v2657_v46 = vand.u32 255, %v2593_v3 }
 0x145   :  { %6363 = vmatprep.mubr.msk.f32.mxu0 %vm2784_vm13, %v13208_v33  ;;  %6365 = vmatprep.mubr.msk.f32.mxu1 %vm2786_vm14, %v13208_v33  ;;  %v3199_v56 = vld [vmem:[%s13205_s3 + $0x760] sm:$0xff]  ;;  %v8010_v20 = vpack.c.bf16 %v3168_v53, %v3167_v51  ;;  %v2662_v58 = vand.u32 255, %v2598_v12  ;;  %v3268_v51 = vld [vmem:[%s13205_s3 + $0x988] sm:$0xff]  ;;  %v2660_v53 = vand.u32 255, %v2596_v13  ;;  %v3237_v13 = vld [vmem:[%s13205_s3 + $0x890] sm:$0xff] }
 0x146   :  { %v10545_v42 = vpop.f32.mrb[18].mxu0  ;;  %v10547_v43 = vpop.f32.mrb[18].mxu1  ;;  %v8042_v21 = vpack.c.bf16 %v3200_v57, %v3199_v56  ;;  %v3251_v3 = vld [vmem:[%s13205_s3 + $0x900] sm:$0xff]  ;;  %v3252_v12 = vld [vmem:[%s13205_s3 + $0x908] sm:$0xff] }
 0x147   :  { %7991 = vmatpush3.bf16.msra.mxu0 %v7990_v24  ;;  %8023 = vmatpush3.bf16.msra.mxu1 %v8022_v25  ;;  %v10555_v50 = vpop.f32.mrb[19].mxu0  ;;  %v10557_v60 = vpop.f32.mrb[19].mxu1 }
 0x148   :  { %7993 = vmatprep.subr.bf16.mxu0 %v7992_v17  ;;  %8025 = vmatprep.subr.bf16.mxu1 %v8024_v27  ;;  %v3165_v17 = vld [vmem:[%s13205_s3 + $0x650] sm:$0xff]  ;;  %v3166_v27 = vld [vmem:[%s13205_s3 + $0x658] sm:$0xff] }
 0x14b   :  { %7995 = vmatpush3.bf16.msra.mxu0 %v7994_v44  ;;  %8027 = vmatpush3.bf16.msra.mxu1 %v8026_v45  ;;  %v3183_v44 = vld [vmem:[%s13205_s3 + $0x6e0] sm:$0xff]  ;;  %v3184_v45 = vld [vmem:[%s13205_s3 + $0x6e8] sm:$0xff] }
 0x14c   :  { %7997 = vmatprep.subr.bf16.mxu0 %v7996_v52  ;;  %8029 = vmatprep.subr.bf16.mxu1 %v8028_v47  ;;  %v8006_v52 = vpack.c.bf16 %v3166_v27, %v3165_v17  ;;  %v8038_v47 = vpack.c.bf16 %v3198_v41, %v3197_v40  ;;  %v8008_v54 = vpack.c.bf16 %v3184_v45, %v3183_v44  ;;  %v3201_v40 = vld [vmem:[%s13205_s3 + $0x770] sm:$0xff]  ;;  %v3202_v41 = vld [vmem:[%s13205_s3 + $0x778] sm:$0xff]  ;;  %v3235_v44 = vld [vmem:[%s13205_s3 + $0x880] sm:$0xff] }
 0x14e   :  { %v10601_v24 = vpop.f32.mrb[20].mxu0  ;;  %v10603_v25 = vpop.f32.mrb[20].mxu1 }
 0x14f   :  { %7999 = vmatpush3.bf16.msra.mxu0 %v7998_v63  ;;  %8031 = vmatpush3.bf16.msra.mxu1 %v8030_v22  ;;  %v10611_v32 = vpop.f32.mrb[21].mxu0  ;;  %v10613_v34 = vpop.f32.mrb[21].mxu1  ;;  %v3185_v63 = vld [vmem:[%s13205_s3 + $0x6f0] sm:$0xff]  ;;  %v2591_v22 = vadd.s32 1536, %v9974_v59 }
 0x150   :  { %8001 = vmatprep.subr.bf16.mxu0 %v8000_v10  ;;  %8033 = vmatprep.subr.bf16.mxu1 %v8032_v11  ;;  %v3217_v10 = vld [vmem:[%s13205_s3 + $0x7f0] sm:$0xff]  ;;  %v3218_v11 = vld [vmem:[%s13205_s3 + $0x7f8] sm:$0xff] }
 0x151   :  { %v2655_v45 = vand.u32 255, %v2591_v22  ;;  %v3220_v22 = vld [vmem:[%s13205_s3 + $0x808] sm:$0xff] }
 0x153   :  { %8003 = vmatpush3.bf16.msra.mxu0 %v8002_v26  ;;  %8035 = vmatpush3.bf16.msra.mxu1 %v8034_v16  ;;  %v3169_v26 = vld [vmem:[%s13205_s3 + $0x670] sm:$0xff]  ;;  %v3170_v16 = vld [vmem:[%s13205_s3 + $0x678] sm:$0xff] }
 0x154   :  { %8005 = vmatprep.subr.bf16.mxu0 %v8004_v7  ;;  %8037 = vmatprep.subr.bf16.mxu1 %v8036_v37  ;;  %v8012_v7 = vpack.c.bf16 %v3186_v4, %v3185_v63  ;;  %v8044_v37 = vpack.c.bf16 %v3218_v11, %v3217_v10  ;;  %v3219_v63 = vld [vmem:[%s13205_s3 + $0x800] sm:$0xff]  ;;  %v2719_v4 = vcvt.s32.f32 %v2655_v45  ;;  %v2721_v10 = vcvt.s32.f32 %v2657_v46 }
 0x155   :  { %v2726_v11 = vcvt.s32.f32 %v2662_v58  ;;  %v8082_v45 = vpack.c.bf16 %v3252_v12, %v3251_v3  ;;  %v3221_v58 = vld [vmem:[%s13205_s3 + $0x810] sm:$0xff] }
 0x156   :  { %v10661_v14 = vpop.f32.mrb[22].mxu0  ;;  %v10663_v15 = vpop.f32.mrb[22].mxu1  ;;  %vm2783_vm15 = vcmp.eq.f32.partialorder %v10173_v48, %v2719_v4  ;;  %vm2785_vm0 = vcmp.eq.f32.partialorder %v10175_v49, %v2721_v10  ;;  %v3271_v48 = vld [vmem:[%s13205_s3 + $0x9a0] sm:$0xff]  ;;  %v3272_v49 = vld [vmem:[%s13205_s3 + $0x9a8] sm:$0xff]  ;;  %v3241_v10 = vld [vmem:[%s13205_s3 + $0x8b0] sm:$0xff] }
 0x157   :  { %8007 = vmatpush3.bf16.msra.mxu0 %v8006_v52  ;;  %8039 = vmatpush3.bf16.msra.mxu1 %v8038_v47  ;;  %v10671_v17 = vpop.f32.mrb[23].mxu0  ;;  %v10673_v27 = vpop.f32.mrb[23].mxu1  ;;  %v3236_v52 = vld [vmem:[%s13205_s3 + $0x888] sm:$0xff]  ;;  %v3267_v47 = vld [vmem:[%s13205_s3 + $0x980] sm:$0xff]  ;;  %vm2790_vm1 = vcmp.eq.f32.partialorder %v10243_v36, %v2726_v11  ;;  %v8088_v3 = vpack.c.bf16 %v3272_v49, %v3271_v48  ;;  %v3242_v11 = vld [vmem:[%s13205_s3 + $0x8b8] sm:$0xff] }
 0x158   :  { %8009 = vmatprep.subr.bf16.mxu0 %v8008_v54  ;;  %8041 = vmatprep.subr.bf16.mxu1 %v8040_v55  ;;  %v8014_v54 = vpack.c.bf16 %v3170_v16, %v3169_v26  ;;  %v8046_v55 = vpack.c.bf16 %v3202_v41, %v3201_v40  ;;  %v8048_v56 = vpack.c.bf16 %v3236_v52, %v3235_v44  ;;  %v3269_v26 = vld [vmem:[%s13205_s3 + $0x990] sm:$0xff]  ;;  %v3270_v16 = vld [vmem:[%s13205_s3 + $0x998] sm:$0xff]  ;;  %v3256_v4 = vld [vmem:[%s13205_s3 + $0x928] sm:$0xff] }
 0x159   :  { %v8080_v57 = vpack.c.bf16 %v3268_v51, %v3267_v47  ;;  %v8050_v40 = vpack.c.bf16 %v3220_v22, %v3219_v63  ;;  %v3222_v52 = vld [vmem:[%s13205_s3 + $0x818] sm:$0xff]  ;;  %v3253_v47 = vld [vmem:[%s13205_s3 + $0x910] sm:$0xff]  ;;  %v8084_v51 = vpack.c.bf16 %v3270_v16, %v3269_v26  ;;  %v3224_v63 = vld [vmem:[%s13205_s3 + $0x828] sm:$0xff] }
 0x15a   :  { %v8054_v36 = vpack.c.bf16 %v3222_v52, %v3221_v58  ;;  %v3255_v22 = vld [vmem:[%s13205_s3 + $0x920] sm:$0xff]  ;;  %v3273_v12 = vld [vmem:[%s13205_s3 + $0x9b0] sm:$0xff]  ;;  %v3226_v52 = vld [vmem:[%s13205_s3 + $0x838] sm:$0xff] }
 0x15b   :  { %8011 = vmatpush3.bf16.msra.mxu0 %v8010_v20  ;;  %8043 = vmatpush3.bf16.msra.mxu1 %v8042_v21  ;;  %v3238_v20 = vld [vmem:[%s13205_s3 + $0x898] sm:$0xff]  ;;  %v2724_v21 = vcvt.s32.f32 %v2660_v53  ;;  %v3225_v58 = vld [vmem:[%s13205_s3 + $0x830] sm:$0xff]  ;;  %v3275_v48 = vld [vmem:[%s13205_s3 + $0x9c0] sm:$0xff] }
 0x15c   :  { %8013 = vmatprep.subr.bf16.mxu0 %v8012_v7  ;;  %8045 = vmatprep.subr.bf16.mxu1 %v8044_v37  ;;  %v8052_v46 = vpack.c.bf16 %v3238_v20, %v3237_v13  ;;  %v3254_v53 = vld [vmem:[%s13205_s3 + $0x918] sm:$0xff]  ;;  %v3276_v49 = vld [vmem:[%s13205_s3 + $0x9c8] sm:$0xff] }
 0x15d   :  { %vm2788_vm2 = vcmp.eq.f32.partialorder %v10241_v35, %v2724_v21  ;;  %v8086_v35 = vpack.c.bf16 %v3254_v53, %v3253_v47  ;;  %v3274_v13 = vld [vmem:[%s13205_s3 + $0x9b8] sm:$0xff]  ;;  %v3257_v47 = vld [vmem:[%s13205_s3 + $0x930] sm:$0xff] }
 0x15e   :  { %v10717_v7 = vpop.f32.mrb[24].mxu0  ;;  %v10719_v37 = vpop.f32.mrb[24].mxu1  ;;  %v3258_v53 = vld [vmem:[%s13205_s3 + $0x938] sm:$0xff] }
 0x15f   :  { %8015 = vmatpush3.bf16.msra.mxu0 %v8014_v54  ;;  %8047 = vmatpush3.bf16.msra.mxu1 %v8046_v55  ;;  %v10721_v41 = vpop.f32.mrb[25].mxu0  ;;  %v10723_v44 = vpop.f32.mrb[25].mxu1  ;;  %v3239_v54 = vld [vmem:[%s13205_s3 + $0x8a0] sm:$0xff]  ;;  %v3240_v55 = vld [vmem:[%s13205_s3 + $0x8a8] sm:$0xff] }
 0x160   :  { %8049 = vmatprep.subr.bf16.mxu0 %v8048_v56  ;;  %8081 = vmatprep.subr.bf16.mxu1 %v8080_v57  ;;  %v8056_v56 = vpack.c.bf16 %v3240_v55, %v3239_v54  ;;  %v3223_v57 = vld [vmem:[%s13205_s3 + $0x820] sm:$0xff]  ;;  %v3244_v55 = vld [vmem:[%s13205_s3 + $0x8c8] sm:$0xff] }
 0x161   :  { %v8058_v26 = vpack.c.bf16 %v3224_v63, %v3223_v57  ;;  %v3243_v54 = vld [vmem:[%s13205_s3 + $0x8c0] sm:$0xff]  ;;  %v3228_v63 = vld [vmem:[%s13205_s3 + $0x848] sm:$0xff] }
 0x162   :  { %6364 = vmatmul.mubr.msk.f32.vlgmr.msra.gmra.mrb[38].mxu0 %vm2783_vm15, %v13208_v33  ;;  %6366 = vmatmul.mubr.msk.f32.vlgmr.msra.gmra.mrb[38].mxu1 %vm2785_vm0, %v13208_v33  ;;  %v3227_v57 = vld [vmem:[%s13205_s3 + $0x840] sm:$0xff] }
 0x163   :  { %8051 = vmatpush3.bf16.msra.mxu0 %v8050_v40  ;;  %6367 = vmatprep.mubr.msk.f32.mxu0 %vm2788_vm2, %v13208_v33 }
 0x164   :  { %8083 = vmatpush3.bf16.msra.mxu1 %v8082_v45  ;;  %6369 = vmatprep.mubr.msk.f32.mxu1 %vm2790_vm1, %v13208_v33  ;;  %v8090_v45 = vpack.c.bf16 %v3256_v4, %v3255_v22  ;;  %v3259_v22 = vld [vmem:[%s13205_s3 + $0x940] sm:$0xff]  ;;  %v3260_v4 = vld [vmem:[%s13205_s3 + $0x948] sm:$0xff]  ;;  %v2602_v33 = vadd.s32 2944, %v9974_v59 }
 0x165   :  { %8053 = vmatprep.subr.bf16.mxu0 %v8052_v46  ;;  %8085 = vmatprep.subr.bf16.mxu1 %v8084_v51  ;;  %v8060_v46 = vpack.c.bf16 %v3242_v11, %v3241_v10  ;;  %v8092_v51 = vpack.c.bf16 %v3274_v13, %v3273_v12  ;;  %v3245_v10 = vld [vmem:[%s13205_s3 + $0x8d0] sm:$0xff]  ;;  %v3246_v11 = vld [vmem:[%s13205_s3 + $0x8d8] sm:$0xff] }
 0x166   :  { %v10781_v20 = vpop.f32.mrb[26].mxu0  ;;  %v10783_v21 = vpop.f32.mrb[26].mxu1  ;;  %v3277_v12 = vld [vmem:[%s13205_s3 + $0x9d0] sm:$0xff]  ;;  %v3278_v13 = vld [vmem:[%s13205_s3 + $0x9d8] sm:$0xff] }
 0x167   :  { %8055 = vmatpush3.bf16.msra.mxu0 %v8054_v36  ;;  %v10785_v16 = vpop.f32.mrb[27].mxu0  ;;  %v10787_v40 = vpop.f32.mrb[27].mxu1  ;;  %v8062_v36 = vpack.c.bf16 %v3226_v52, %v3225_v58 }
 0x168   :  { %8087 = vmatpush3.bf16.msra.mxu1 %v8086_v35  ;;  %8057 = vmatprep.subr.bf16.mxu0 %v8056_v56  ;;  %v8094_v35 = vpack.c.bf16 %v3258_v53, %v3257_v47  ;;  %v8064_v56 = vpack.c.bf16 %v3244_v55, %v3243_v54  ;;  %v8098_v47 = vpack.c.bf16 %v3260_v4, %v3259_v22  ;;  %v3229_v53 = vld [vmem:[%s13205_s3 + $0x850] sm:$0xff]  ;;  %v3230_v54 = vld [vmem:[%s13205_s3 + $0x858] sm:$0xff]  ;;  %v3231_v4 = vld [vmem:[%s13205_s3 + $0x860] sm:$0xff] }
 0x169   :  { %8089 = vmatprep.subr.bf16.mxu1 %v8088_v3  ;;  %v8096_v3 = vpack.c.bf16 %v3276_v49, %v3275_v48  ;;  %v3261_v55 = vld [vmem:[%s13205_s3 + $0x950] sm:$0xff]  ;;  %v8100_v48 = vpack.c.bf16 %v3278_v13, %v3277_v12  ;;  %v3262_v49 = vld [vmem:[%s13205_s3 + $0x958] sm:$0xff]  ;;  %v2595_v12 = vadd.s32 2048, %v9974_v59 }
 0x16a   :  { %v8102_v22 = vpack.c.bf16 %v3262_v49, %v3261_v55  ;;  %v3282_v55 = vld [vmem:[%s13205_s3 + $0x9f8] sm:$0xff] }
 0x16b   :  { %8059 = vmatpush3.bf16.msra.mxu0 %v8058_v26 }
 0x16c   :  { %8091 = vmatpush3.bf16.msra.mxu1 %v8090_v45  ;;  %8061 = vmatprep.subr.bf16.mxu0 %v8060_v46  ;;  %v8066_v46 = vpack.c.bf16 %v3228_v63, %v3227_v57  ;;  %v3280_v57 = vld [vmem:[%s13205_s3 + $0x9e8] sm:$0xff]  ;;  %v8070_v63 = vpack.c.bf16 %v3230_v54, %v3229_v53  ;;  %v2597_v53 = vadd.s32 2304, %v9974_v59  ;;  %v3281_v54 = vld [vmem:[%s13205_s3 + $0x9f0] sm:$0xff] }
 0x16d   :  { %8093 = vmatprep.subr.bf16.mxu1 %v8092_v51  ;;  %v8068_v51 = vpack.c.bf16 %v3246_v11, %v3245_v10  ;;  %v3232_v10 = vld [vmem:[%s13205_s3 + $0x868] sm:$0xff]  ;;  %v3263_v11 = vld [vmem:[%s13205_s3 + $0x960] sm:$0xff] }
 0x16e   :  { %v10837_v26 = vpop.f32.mrb[28].mxu0  ;;  %v10839_v45 = vpop.f32.mrb[28].mxu1 }
 0x16f   :  { %13210 = vst [vmem:[#allocation8_spill] sm:$0xff] %v10837_v26  ;;  %13211 = vst [vmem:[#allocation9_spill] sm:$0xff] %v10839_v45  ;;  %8063 = vmatpush3.bf16.msra.mxu0 %v8062_v36  ;;  %v10841_v58 = vpop.f32.mrb[29].mxu0  ;;  %v10843_v52 = vpop.f32.mrb[29].mxu1  ;;  %v3247_v36 = vld [vmem:[%s13205_s3 + $0x8e0] sm:$0xff] }
 0x170   :  { %13212 = vst [vmem:[#allocation10_spill] sm:$0xff] %v10841_v58  ;;  %13213 = vst [vmem:[#allocation11_spill] sm:$0xff] %v10843_v52  ;;  %8095 = vmatpush3.bf16.msra.mxu1 %v8094_v35  ;;  %8065 = vmatprep.subr.bf16.mxu0 %v8064_v56  ;;  %v3248_v35 = vld [vmem:[%s13205_s3 + $0x8e8] sm:$0xff]  ;;  %v3279_v56 = vld [vmem:[%s13205_s3 + $0x9e0] sm:$0xff] }
 0x171   :  { %8097 = vmatprep.subr.bf16.mxu1 %v8096_v3  ;;  %v8072_v3 = vpack.c.bf16 %v3248_v35, %v3247_v36  ;;  %v8104_v13 = vpack.c.bf16 %v3280_v57, %v3279_v56  ;;  %v2600_v36 = vadd.s32 2688, %v9974_v59  ;;  %v8074_v35 = vpack.c.bf16 %v3232_v10, %v3231_v4 }
 0x172   :  { %v2659_v4 = vand.u32 255, %v2595_v12  ;;  %v8108_v10 = vpack.c.bf16 %v3282_v55, %v3281_v54  ;;  %v3332_v12 = vld [vmem:[%s13205_s3 + $0xb88] sm:$0xff]  ;;  %v2666_v54 = vand.u32 255, %v2602_v33 }
 0x173   :  { %8067 = vmatpush3.bf16.msra.mxu0 %v8066_v46  ;;  %v3264_v46 = vld [vmem:[%s13205_s3 + $0x968] sm:$0xff] }
 0x174   :  { %8099 = vmatpush3.bf16.msra.mxu1 %v8098_v47  ;;  %8069 = vmatprep.subr.bf16.mxu0 %v8068_v51  ;;  %v3249_v47 = vld [vmem:[%s13205_s3 + $0x8f0] sm:$0xff]  ;;  %v3250_v51 = vld [vmem:[%s13205_s3 + $0x8f8] sm:$0xff]  ;;  %v8106_v45 = vpack.c.bf16 %v3264_v46, %v3263_v11  ;;  %v3300_v11 = vld [vmem:[%s13205_s3 + $0xa88] sm:$0xff]  ;;  %v2661_v46 = vand.u32 255, %v2597_v53  ;;  %v2723_v52 = vcvt.s32.f32 %v2659_v4 }
 0x175   :  { %8101 = vmatprep.subr.bf16.mxu1 %v8100_v48  ;;  %v8076_v26 = vpack.c.bf16 %v3250_v51, %v3249_v47  ;;  %v3331_v47 = vld [vmem:[%s13205_s3 + $0xb80] sm:$0xff]  ;;  %v3316_v33 = vld [vmem:[%s13205_s3 + $0xb08] sm:$0xff]  ;;  %v3334_v4 = vld [vmem:[%s13205_s3 + $0xb98] sm:$0xff] }
 0x176   :  { %v10895_v48 = vpop.f32.mrb[30].mxu0  ;;  %v10897_v49 = vpop.f32.mrb[30].mxu1  ;;  %v3283_v53 = vld [vmem:[%s13205_s3 + $0xa00] sm:$0xff]  ;;  %v8144_v58 = vpack.c.bf16 %v3332_v12, %v3331_v47  ;;  %vm2787_vm3 = vcmp.eq.f32.partialorder %v10229_v29, %v2723_v52  ;;  %v3304_v12 = vld [vmem:[%s13205_s3 + $0xaa8] sm:$0xff] }
 0x177   :  { %13214 = vst [vmem:[#allocation12_spill] sm:$0xff] %v10895_v48  ;;  %13215 = vst [vmem:[#allocation13_spill] sm:$0xff] %v10897_v49  ;;  %8071 = vmatpush3.bf16.msra.mxu0 %v8070_v63  ;;  %v10900_v56 = vpop.f32.mrb[31].mxu0  ;;  %v10902_v57 = vpop.f32.mrb[31].mxu1  ;;  %v3233_v48 = vld [vmem:[%s13205_s3 + $0x870] sm:$0xff]  ;;  %v3234_v49 = vld [vmem:[%s13205_s3 + $0x878] sm:$0xff] }
 0x178   :  { %13216 = vst [vmem:[#allocation14_spill] sm:$0xff] %v10900_v56  ;;  %13217 = vst [vmem:[#allocation15_spill] sm:$0xff] %v10902_v57  ;;  %8103 = vmatpush3.bf16.msra.mxu1 %v8102_v22  ;;  %8073 = vmatprep.subr.bf16.mxu0 %v8072_v3  ;;  %v3265_v63 = vld [vmem:[%s13205_s3 + $0x970] sm:$0xff]  ;;  %v3266_v22 = vld [vmem:[%s13205_s3 + $0x978] sm:$0xff]  ;;  %v8078_v51 = vpack.c.bf16 %v3234_v49, %v3233_v48 }
 0x179   :  { %8105 = vmatprep.subr.bf16.mxu1 %v8104_v13  ;;  %v3299_v3 = vld [vmem:[%s13205_s3 + $0xa80] sm:$0xff]  ;;  %v2664_v13 = vand.u32 255, %v2600_v36  ;;  %v8110_v55 = vpack.c.bf16 %v3266_v22, %v3265_v63  ;;  %v3284_v56 = vld [vmem:[%s13205_s3 + $0xa08] sm:$0xff]  ;;  %v3302_v49 = vld [vmem:[%s13205_s3 + $0xa98] sm:$0xff] }
 0x17a   :  { %v8112_v57 = vpack.c.bf16 %v3300_v11, %v3299_v3  ;;  %v3315_v48 = vld [vmem:[%s13205_s3 + $0xb00] sm:$0xff]  ;;  %v3333_v63 = vld [vmem:[%s13205_s3 + $0xb90] sm:$0xff] }
 0x17b   :  { %8075 = vmatpush3.bf16.msra.mxu0 %v8074_v35  ;;  %v2728_v36 = vcvt.s32.f32 %v2664_v13  ;;  %v8114_v35 = vpack.c.bf16 %v3284_v56, %v3283_v53  ;;  %v8146_v22 = vpack.c.bf16 %v3316_v33, %v3315_v48  ;;  %v3285_v3 = vld [vmem:[%s13205_s3 + $0xa10] sm:$0xff]  ;;  %v3286_v56 = vld [vmem:[%s13205_s3 + $0xa18] sm:$0xff]  ;;  %v3303_v47 = vld [vmem:[%s13205_s3 + $0xaa0] sm:$0xff]  ;;  %v13218_v13 = vmov 1.0  }
 0x17c   :  { %8107 = vmatpush3.bf16.msra.mxu1 %v8106_v45  ;;  %8077 = vmatprep.subr.bf16.mxu0 %v8076_v26  ;;  %v2725_v26 = vcvt.s32.f32 %v2661_v46  ;;  %v3301_v45 = vld [vmem:[%s13205_s3 + $0xa90] sm:$0xff]  ;;  %v3335_v29 = vld [vmem:[%s13205_s3 + $0xba0] sm:$0xff]  ;;  %v8118_v52 = vpack.c.bf16 %v3286_v56, %v3285_v3  ;;  %v3288_v53 = vld [vmem:[%s13205_s3 + $0xa28] sm:$0xff] }
 0x17d   :  { %8109 = vmatprep.subr.bf16.mxu1 %v8108_v10  ;;  %v2730_v10 = vcvt.s32.f32 %v2666_v54  ;;  %v3317_v11 = vld [vmem:[%s13205_s3 + $0xb10] sm:$0xff]  ;;  %v8116_v46 = vpack.c.bf16 %v3302_v49, %v3301_v45  ;;  %vm2792_vm5 = vcmp.eq.f32.partialorder %v10311_v2, %v2728_v36  ;;  %v8120_v54 = vpack.c.bf16 %v3304_v12, %v3303_v47  ;;  %v3319_v2 = vld [vmem:[%s13205_s3 + $0xb20] sm:$0xff]  ;;  %v3320_v48 = vld [vmem:[%s13205_s3 + $0xb28] sm:$0xff] }
 0x17e   :  { %vm2789_vm4 = vcmp.eq.f32.partialorder %v10231_v30, %v2725_v26  ;;  %v3305_v33 = vld [vmem:[%s13205_s3 + $0xab0] sm:$0xff]  ;;  %v3306_v26 = vld [vmem:[%s13205_s3 + $0xab8] sm:$0xff]  ;;  %v3340_v47 = vld [vmem:[%s13205_s3 + $0xbc8] sm:$0xff] }
 0x17f   :  { %8079 = vmatpush3.bf16.msra.mxu0 %v8078_v51  ;;  %v8148_v51 = vpack.c.bf16 %v3334_v4, %v3333_v63  ;;  %vm2794_vm6 = vcmp.eq.f32.partialorder %v10313_v23, %v2730_v10  ;;  %v3337_v45 = vld [vmem:[%s13205_s3 + $0xbb0] sm:$0xff]  ;;  %v3338_v49 = vld [vmem:[%s13205_s3 + $0xbb8] sm:$0xff]  ;;  %v8124_v63 = vpack.c.bf16 %v3306_v26, %v3305_v33 }
 0x180   :  { %8111 = vmatpush3.bf16.msra.mxu1 %v8110_v55  ;;  %8113 = vmatprep.subr.bf16.mxu0 %v8112_v57  ;;  %v3318_v57 = vld [vmem:[%s13205_s3 + $0xb18] sm:$0xff]  ;;  %v3287_v55 = vld [vmem:[%s13205_s3 + $0xa20] sm:$0xff]  ;;  %v3289_v4 = vld [vmem:[%s13205_s3 + $0xa30] sm:$0xff]  ;;  %v8156_v3 = vpack.c.bf16 %v3338_v49, %v3337_v45 }
 0x181   :  { %8145 = vmatprep.subr.bf16.mxu1 %v8144_v58  ;;  %v3336_v58 = vld [vmem:[%s13205_s3 + $0xba8] sm:$0xff]  ;;  %v8150_v30 = vpack.c.bf16 %v3318_v57, %v3317_v11  ;;  %v8122_v36 = vpack.c.bf16 %v3288_v53, %v3287_v55  ;;  %v3290_v10 = vld [vmem:[%s13205_s3 + $0xa38] sm:$0xff]  ;;  %v3307_v11 = vld [vmem:[%s13205_s3 + $0xac0] sm:$0xff] }
 0x182   :  { %6368 = vmatmul.mubr.msk.f32.vlgmr.msra.gmra.mrb[40].mxu0 %vm2787_vm3, %v13218_v13  ;;  %v8152_v23 = vpack.c.bf16 %v3336_v58, %v3335_v29  ;;  %v3322_v56 = vld [vmem:[%s13205_s3 + $0xb38] sm:$0xff]  ;;  %v3339_v57 = vld [vmem:[%s13205_s3 + $0xbc0] sm:$0xff]  ;;  %v8126_v12 = vpack.c.bf16 %v3290_v10, %v3289_v4  ;;  %v3324_v55 = vld [vmem:[%s13205_s3 + $0xb48] sm:$0xff] }
 0x183   :  { %6370 = vmatmul.mubr.msk.f32.vlgmr.msra.gmra.mrb[40].mxu1 %vm2789_vm4, %v13218_v13  ;;  %8115 = vmatpush3.bf16.msra.mxu0 %v8114_v35  ;;  %v8154_v35 = vpack.c.bf16 %v3320_v48, %v3319_v2  ;;  %v3291_v58 = vld [vmem:[%s13205_s3 + $0xa40] sm:$0xff]  ;;  %v3309_v53 = vld [vmem:[%s13205_s3 + $0xad0] sm:$0xff]  ;;  %v3310_v2 = vld [vmem:[%s13205_s3 + $0xad8] sm:$0xff] }
 0x184   :  { %6371 = vmatprep.mubr.msk.f32.mxu0 %vm2792_vm5, %v13218_v13  ;;  %8147 = vmatpush3.bf16.msra.mxu1 %v8146_v22  ;;  %v3321_v22 = vld [vmem:[%s13205_s3 + $0xb30] sm:$0xff]  ;;  %v3342_v48 = vld [vmem:[%s13205_s3 + $0xbd8] sm:$0xff]  ;;  %v8132_v45 = vpack.c.bf16 %v3310_v2, %v3309_v53  ;;  %v3311_v10 = vld [vmem:[%s13205_s3 + $0xae0] sm:$0xff] }
 0x185   :  { %6373 = vmatprep.mubr.msk.f32.mxu1 %vm2794_vm6, %v13218_v13  ;;  %8117 = vmatprep.subr.bf16.mxu0 %v8116_v46  ;;  %v3308_v46 = vld [vmem:[%s13205_s3 + $0xac8] sm:$0xff]  ;;  %v3293_v49 = vld [vmem:[%s13205_s3 + $0xa50] sm:$0xff]  ;;  %v3326_v4 = vld [vmem:[%s13205_s3 + $0xb58] sm:$0xff] }
 0x186   :  { %8149 = vmatprep.subr.bf16.mxu1 %v8148_v51  ;;  %v8158_v51 = vpack.c.bf16 %v3322_v56, %v3321_v22  ;;  %v8128_v29 = vpack.c.bf16 %v3308_v46, %v3307_v11  ;;  %v3312_v22 = vld [vmem:[%s13205_s3 + $0xae8] sm:$0xff]  ;;  %v3345_v53 = vld [vmem:[%s13205_s3 + $0xbf0] sm:$0xff]  ;;  %v3346_v2 = vld [vmem:[%s13205_s3 + $0xbf8] sm:$0xff] }
 0x187   :  { %8119 = vmatpush3.bf16.msra.mxu0 %v8118_v52  ;;  %v3292_v52 = vld [vmem:[%s13205_s3 + $0xa48] sm:$0xff] }
 0x188   :  { %8151 = vmatpush3.bf16.msra.mxu1 %v8150_v30  ;;  %8121 = vmatprep.subr.bf16.mxu0 %v8120_v54  ;;  %v3323_v30 = vld [vmem:[%s13205_s3 + $0xb40] sm:$0xff]  ;;  %v8160_v54 = vpack.c.bf16 %v3340_v47, %v3339_v57  ;;  %v8130_v33 = vpack.c.bf16 %v3292_v52, %v3291_v58  ;;  %v3344_v56 = vld [vmem:[%s13205_s3 + $0xbe8] sm:$0xff]  ;;  %v8136_v57 = vpack.c.bf16 %v3312_v22, %v3311_v10  ;;  %v3330_v10 = vld [vmem:[%s13205_s3 + $0xb78] sm:$0xff] }
 0x189   :  { %8153 = vmatprep.subr.bf16.mxu1 %v8152_v23  ;;  %v3341_v23 = vld [vmem:[%s13205_s3 + $0xbd0] sm:$0xff]  ;;  %v8162_v26 = vpack.c.bf16 %v3324_v55, %v3323_v30  ;;  %v3295_v47 = vld [vmem:[%s13205_s3 + $0xa60] sm:$0xff]  ;;  %v3328_v52 = vld [vmem:[%s13205_s3 + $0xb68] sm:$0xff]  ;;  %v2601_v55 = vadd.s32 2816, %v9974_v59 }
 0x18a   :  { %v3313_v30 = vld [vmem:[%s13205_s3 + $0xaf0] sm:$0xff]  ;;  %v3363_v22 = vld [vmem:[%s13205_s3 + $0xc80] sm:$0xff] }
 0x18b   :  { %8123 = vmatpush3.bf16.msra.mxu0 %v8122_v36  ;;  %v3294_v36 = vld [vmem:[%s13205_s3 + $0xa58] sm:$0xff] }
 0x18c   :  { %8155 = vmatpush3.bf16.msra.mxu1 %v8154_v35  ;;  %8125 = vmatprep.subr.bf16.mxu0 %v8124_v63  ;;  %v3325_v35 = vld [vmem:[%s13205_s3 + $0xb50] sm:$0xff]  ;;  %v8164_v63 = vpack.c.bf16 %v3342_v48, %v3341_v23  ;;  %v8134_v11 = vpack.c.bf16 %v3294_v36, %v3293_v49  ;;  %v2604_v23 = vadd.s32 3200, %v9974_v59  ;;  %v3298_v36 = vld [vmem:[%s13205_s3 + $0xa78] sm:$0xff] }
 0x18d   :  { %8157 = vmatprep.subr.bf16.mxu1 %v8156_v3  ;;  %v3343_v3 = vld [vmem:[%s13205_s3 + $0xbe0] sm:$0xff]  ;;  %v8166_v46 = vpack.c.bf16 %v3326_v4, %v3325_v35  ;;  %v3297_v49 = vld [vmem:[%s13205_s3 + $0xa70] sm:$0xff]  ;;  %v8172_v4 = vpack.c.bf16 %v3346_v2, %v3345_v53  ;;  %v3380_v53 = vld [vmem:[%s13205_s3 + $0xd08] sm:$0xff] }
 0x18e   :  { %v8168_v58 = vpack.c.bf16 %v3344_v56, %v3343_v3  ;;  %v3329_v35 = vld [vmem:[%s13205_s3 + $0xb70] sm:$0xff]  ;;  %v3364_v3 = vld [vmem:[%s13205_s3 + $0xc88] sm:$0xff]  ;;  %v2665_v56 = vand.u32 255, %v2601_v55  ;;  %v3379_v55 = vld [vmem:[%s13205_s3 + $0xd00] sm:$0xff] }
 0x18f   :  { %8127 = vmatpush3.bf16.msra.mxu0 %v8126_v12  ;;  %v3296_v12 = vld [vmem:[%s13205_s3 + $0xa68] sm:$0xff] }
 0x190   :  { %8159 = vmatpush3.bf16.msra.mxu1 %v8158_v51  ;;  %8129 = vmatprep.subr.bf16.mxu0 %v8128_v29  ;;  %v3327_v51 = vld [vmem:[%s13205_s3 + $0xb60] sm:$0xff]  ;;  %v2599_v29 = vadd.s32 2560, %v9974_v59  ;;  %v8138_v48 = vpack.c.bf16 %v3296_v12, %v3295_v47  ;;  %v8142_v47 = vpack.c.bf16 %v3298_v36, %v3297_v49  ;;  %v2729_v2 = vcvt.s32.f32 %v2665_v56  ;;  %v3398_v49 = vld [vmem:[%s13205_s3 + $0xd98] sm:$0xff] }
 0x191   :  { %8161 = vmatprep.subr.bf16.mxu1 %v8160_v54  ;;  %v3314_v54 = vld [vmem:[%s13205_s3 + $0xaf8] sm:$0xff]  ;;  %v3367_v56 = vld [vmem:[%s13205_s3 + $0xca0] sm:$0xff] }
 0x192   :  { %vm2793_vm8 = vcmp.eq.f32.partialorder %v10303_v62, %v2729_v2 }
 0x193   :  { %8131 = vmatpush3.bf16.msra.mxu0 %v8130_v33  ;;  %v2606_v33 = vadd.s32 3456, %v9974_v59 }
 0x194   :  { %8163 = vmatpush3.bf16.msra.mxu1 %v8162_v26  ;;  %8133 = vmatprep.subr.bf16.mxu0 %v8132_v45  ;;  %v8170_v26 = vpack.c.bf16 %v3328_v52, %v3327_v51  ;;  %v8140_v45 = vpack.c.bf16 %v3314_v54, %v3313_v30  ;;  %v8174_v51 = vpack.c.bf16 %v3330_v10, %v3329_v35  ;;  %v3348_v52 = vld [vmem:[%s13205_s3 + $0xc08] sm:$0xff]  ;;  %v3381_v10 = vld [vmem:[%s13205_s3 + $0xd10] sm:$0xff] }
 0x195   :  { %8165 = vmatprep.subr.bf16.mxu1 %v8164_v63  ;;  %v2663_v63 = vand.u32 255, %v2599_v29  ;;  %v2670_v12 = vand.u32 255, %v2606_v33  ;;  %v8176_v29 = vpack.c.bf16 %v3364_v3, %v3363_v22  ;;  %v8210_v35 = vpack.c.bf16 %v3380_v53, %v3379_v55  ;;  %v3382_v3 = vld [vmem:[%s13205_s3 + $0xd18] sm:$0xff] }
 0x196   :  { %v8214_v62 = vpack.c.bf16 %v3382_v3, %v3381_v10  ;;  %v3402_v55 = vld [vmem:[%s13205_s3 + $0xdb8] sm:$0xff] }
 0x197   :  { %8135 = vmatpush3.bf16.msra.mxu0 %v8134_v11  ;;  %v3395_v11 = vld [vmem:[%s13205_s3 + $0xd80] sm:$0xff]  ;;  %v2727_v30 = vcvt.s32.f32 %v2663_v63  ;;  %v2734_v36 = vcvt.s32.f32 %v2670_v12  ;;  %v3349_v63 = vld [vmem:[%s13205_s3 + $0xc10] sm:$0xff] }
 0x198   :  { %8167 = vmatpush3.bf16.msra.mxu1 %v8166_v46  ;;  %8137 = vmatprep.subr.bf16.mxu0 %v8136_v57  ;;  %v3396_v46 = vld [vmem:[%s13205_s3 + $0xd88] sm:$0xff]  ;;  %v2668_v57 = vand.u32 255, %v2604_v23  ;;  %v3365_v23 = vld [vmem:[%s13205_s3 + $0xc90] sm:$0xff] }
 0x199   :  { %8169 = vmatprep.subr.bf16.mxu1 %v8168_v58  ;;  %v3347_v58 = vld [vmem:[%s13205_s3 + $0xc00] sm:$0xff]  ;;  %v8208_v54 = vpack.c.bf16 %v3396_v46, %v3395_v11  ;;  %vm2791_vm7 = vcmp.eq.f32.partialorder %v10301_v61, %v2727_v30  ;;  %v3368_v11 = vld [vmem:[%s13205_s3 + $0xca8] sm:$0xff]  ;;  %vm2798_vm10 = vcmp.eq.f32.partialorder %v10369_v39, %v2734_v36  ;;  %v3370_v30 = vld [vmem:[%s13205_s3 + $0xcb8] sm:$0xff] }
 0x19a   :  { %v2732_v33 = vcvt.s32.f32 %v2668_v57  ;;  %v3399_v61 = vld [vmem:[%s13205_s3 + $0xda0] sm:$0xff]  ;;  %v3400_v57 = vld [vmem:[%s13205_s3 + $0xda8] sm:$0xff]  ;;  %v8184_v12 = vpack.c.bf16 %v3368_v11, %v3367_v56 }
 0x19b   :  { %8139 = vmatpush3.bf16.msra.mxu0 %v8138_v48  ;;  %v3366_v48 = vld [vmem:[%s13205_s3 + $0xc98] sm:$0xff]  ;;  %v8216_v39 = vpack.c.bf16 %v3400_v57, %v3399_v61  ;;  %v3371_v36 = vld [vmem:[%s13205_s3 + $0xcc0] sm:$0xff]  ;;  %v3356_v11 = vld [vmem:[%s13205_s3 + $0xc48] sm:$0xff] }
 0x19c   :  { %8171 = vmatpush3.bf16.msra.mxu1 %v8170_v26  ;;  %8141 = vmatprep.subr.bf16.mxu0 %v8140_v45  ;;  %v8178_v26 = vpack.c.bf16 %v3348_v52, %v3347_v58  ;;  %v3397_v45 = vld [vmem:[%s13205_s3 + $0xd90] sm:$0xff]  ;;  %v8180_v22 = vpack.c.bf16 %v3366_v48, %v3365_v23  ;;  %vm2796_vm9 = vcmp.eq.f32.partialorder %v10367_v38, %v2732_v33  ;;  %v3383_v38 = vld [vmem:[%s13205_s3 + $0xd20] sm:$0xff]  ;;  %v3384_v58 = vld [vmem:[%s13205_s3 + $0xd28] sm:$0xff] }
 0x19d   :  { %8173 = vmatprep.subr.bf16.mxu1 %v8172_v4  ;;  %v3350_v4 = vld [vmem:[%s13205_s3 + $0xc18] sm:$0xff]  ;;  %v8212_v46 = vpack.c.bf16 %v3398_v49, %v3397_v45  ;;  %v3369_v52 = vld [vmem:[%s13205_s3 + $0xcb0] sm:$0xff]  ;;  %v8218_v2 = vpack.c.bf16 %v3384_v58, %v3383_v38  ;;  %v3355_v56 = vld [vmem:[%s13205_s3 + $0xc40] sm:$0xff] }
 0x19e   :  { %v8188_v23 = vpack.c.bf16 %v3370_v30, %v3369_v52  ;;  %v3353_v48 = vld [vmem:[%s13205_s3 + $0xc30] sm:$0xff]  ;;  %v3354_v33 = vld [vmem:[%s13205_s3 + $0xc38] sm:$0xff]  ;;  %v3388_v57 = vld [vmem:[%s13205_s3 + $0xd48] sm:$0xff] }
 0x19f   :  { %8143 = vmatpush3.bf16.msra.mxu0 %v8142_v47  ;;  %v8182_v47 = vpack.c.bf16 %v3350_v4, %v3349_v63  ;;  %v3386_v49 = vld [vmem:[%s13205_s3 + $0xd38] sm:$0xff]  ;;  %v3403_v63 = vld [vmem:[%s13205_s3 + $0xdc0] sm:$0xff]  ;;  %v3404_v4 = vld [vmem:[%s13205_s3 + $0xdc8] sm:$0xff]  ;;  %v8190_v10 = vpack.c.bf16 %v3354_v33, %v3353_v48 }
 0x1a0   :  { %8175 = vmatpush3.bf16.msra.mxu1 %v8174_v51  ;;  %8177 = vmatprep.subr.bf16.mxu0 %v8176_v29  ;;  %v3351_v51 = vld [vmem:[%s13205_s3 + $0xc20] sm:$0xff]  ;;  %v3352_v29 = vld [vmem:[%s13205_s3 + $0xc28] sm:$0xff]  ;;  %v8224_v61 = vpack.c.bf16 %v3404_v4, %v3403_v63  ;;  %v3357_v58 = vld [vmem:[%s13205_s3 + $0xc50] sm:$0xff]  ;;  %v2603_v63 = vadd.s32 3072, %v9974_v59 }
 0x1a1   :  { %8209 = vmatprep.subr.bf16.mxu1 %v8208_v54  ;;  %v3401_v54 = vld [vmem:[%s13205_s3 + $0xdb0] sm:$0xff]  ;;  %v8186_v53 = vpack.c.bf16 %v3352_v29, %v3351_v51  ;;  %v3406_v51 = vld [vmem:[%s13205_s3 + $0xdd8] sm:$0xff]  ;;  %v8194_v29 = vpack.c.bf16 %v3356_v11, %v3355_v56  ;;  %v3408_v48 = vld [vmem:[%s13205_s3 + $0xde8] sm:$0xff]  ;;  %v2605_v56 = vadd.s32 3328, %v9974_v59 }
 0x1a2   :  { %6372 = vmatmul.mubr.msk.f32.vlgmr.msra.gmra.mrb[42].mxu0 %vm2791_vm7, %v13218_v13  ;;  %v8220_v45 = vpack.c.bf16 %v3402_v55, %v3401_v54  ;;  %v3358_v52 = vld [vmem:[%s13205_s3 + $0xc58] sm:$0xff]  ;;  %v3389_v30 = vld [vmem:[%s13205_s3 + $0xd50] sm:$0xff] }
 0x1a3   :  { %6374 = vmatmul.mubr.msk.f32.vlgmr.msra.gmra.mrb[42].mxu1 %vm2793_vm8, %v13218_v13  ;;  %8179 = vmatpush3.bf16.msra.mxu0 %v8178_v26  ;;  %v3385_v26 = vld [vmem:[%s13205_s3 + $0xd30] sm:$0xff]  ;;  %v3390_v55 = vld [vmem:[%s13205_s3 + $0xd58] sm:$0xff]  ;;  %v8198_v33 = vpack.c.bf16 %v3358_v52, %v3357_v58 }
 0x1a4   :  { %6375 = vmatprep.mubr.msk.f32.mxu0 %vm2796_vm9, %v13218_v13  ;;  %8211 = vmatpush3.bf16.msra.mxu1 %v8210_v35  ;;  %v3372_v35 = vld [vmem:[%s13205_s3 + $0xcc8] sm:$0xff]  ;;  %v3409_v11 = vld [vmem:[%s13205_s3 + $0xdf0] sm:$0xff]  ;;  %v3394_v52 = vld [vmem:[%s13205_s3 + $0xd78] sm:$0xff] }
 0x1a5   :  { %6377 = vmatprep.mubr.msk.f32.mxu1 %vm2798_vm10, %v13218_v13  ;;  %8181 = vmatprep.subr.bf16.mxu0 %v8180_v22  ;;  %v8222_v22 = vpack.c.bf16 %v3386_v49, %v3385_v26  ;;  %v8192_v3 = vpack.c.bf16 %v3372_v35, %v3371_v36  ;;  %v8230_v26 = vpack.c.bf16 %v3390_v55, %v3389_v30  ;;  %v3359_v49 = vld [vmem:[%s13205_s3 + $0xc60] sm:$0xff]  ;;  %v3360_v36 = vld [vmem:[%s13205_s3 + $0xc68] sm:$0xff]  ;;  %v2669_v55 = vand.u32 255, %v2605_v56  ;;  %v3430_v56 = vld [vmem:[%s13205_s3 + $0xe98] sm:$0xff] }
 0x1a6   :  { %8213 = vmatprep.subr.bf16.mxu1 %v8212_v46  ;;  %v3387_v46 = vld [vmem:[%s13205_s3 + $0xd40] sm:$0xff] }
 0x1a7   :  { %8183 = vmatpush3.bf16.msra.mxu0 %v8182_v47  ;;  %v3373_v47 = vld [vmem:[%s13205_s3 + $0xcd0] sm:$0xff]  ;;  %v8226_v38 = vpack.c.bf16 %v3388_v57, %v3387_v46  ;;  %v3391_v35 = vld [vmem:[%s13205_s3 + $0xd60] sm:$0xff]  ;;  %v3410_v46 = vld [vmem:[%s13205_s3 + $0xdf8] sm:$0xff]  ;;  %v8202_v57 = vpack.c.bf16 %v3360_v36, %v3359_v49 }
 0x1a8   :  { %8215 = vmatpush3.bf16.msra.mxu1 %v8214_v62  ;;  %8185 = vmatprep.subr.bf16.mxu0 %v8184_v12  ;;  %v3374_v62 = vld [vmem:[%s13205_s3 + $0xcd8] sm:$0xff]  ;;  %v3405_v12 = vld [vmem:[%s13205_s3 + $0xdd0] sm:$0xff]  ;;  %v8236_v58 = vpack.c.bf16 %v3410_v46, %v3409_v11  ;;  %v3427_v30 = vld [vmem:[%s13205_s3 + $0xe80] sm:$0xff] }
 0x1a9   :  { %8217 = vmatprep.subr.bf16.mxu1 %v8216_v39  ;;  %v8196_v39 = vpack.c.bf16 %v3374_v62, %v3373_v47  ;;  %v8228_v54 = vpack.c.bf16 %v3406_v51, %v3405_v12  ;;  %v2610_v47 = vadd.s32 3968, %v9974_v59  ;;  %v3361_v51 = vld [vmem:[%s13205_s3 + $0xc70] sm:$0xff]  ;;  %v3411_v49 = vld [vmem:[%s13205_s3 + $0xe00] sm:$0xff]  ;;  %v3412_v36 = vld [vmem:[%s13205_s3 + $0xe08] sm:$0xff] }
 0x1aa   :  { %v8242_v46 = vpack.c.bf16 %v3412_v36, %v3411_v49  ;;  %v3466_v49 = vld [vmem:[%s13205_s3 + $0xfb8] sm:$0xff] }
 0x1ab   :  { %8187 = vmatpush3.bf16.msra.mxu0 %v8186_v53  ;;  %v3375_v53 = vld [vmem:[%s13205_s3 + $0xce0] sm:$0xff] }
 0x1ac   :  { %8219 = vmatpush3.bf16.msra.mxu1 %v8218_v2  ;;  %8189 = vmatprep.subr.bf16.mxu0 %v8188_v23  ;;  %v3376_v2 = vld [vmem:[%s13205_s3 + $0xce8] sm:$0xff]  ;;  %v3407_v23 = vld [vmem:[%s13205_s3 + $0xde0] sm:$0xff] }
 0x1ad   :  { %8221 = vmatprep.subr.bf16.mxu1 %v8220_v45  ;;  %v8200_v45 = vpack.c.bf16 %v3376_v2, %v3375_v53  ;;  %v8232_v4 = vpack.c.bf16 %v3408_v48, %v3407_v23  ;;  %v3459_v53 = vld [vmem:[%s13205_s3 + $0xf80] sm:$0xff]  ;;  %v3460_v2 = vld [vmem:[%s13205_s3 + $0xf88] sm:$0xff] }
 0x1af   :  { %8191 = vmatpush3.bf16.msra.mxu0 %v8190_v10  ;;  %v3392_v10 = vld [vmem:[%s13205_s3 + $0xd68] sm:$0xff] }
 0x1b0   :  { %8223 = vmatpush3.bf16.msra.mxu1 %v8222_v22  ;;  %8193 = vmatprep.subr.bf16.mxu0 %v8192_v3  ;;  %v3377_v22 = vld [vmem:[%s13205_s3 + $0xcf0] sm:$0xff]  ;;  %v3378_v3 = vld [vmem:[%s13205_s3 + $0xcf8] sm:$0xff]  ;;  %v8234_v62 = vpack.c.bf16 %v3392_v10, %v3391_v35  ;;  %v3444_v10 = vld [vmem:[%s13205_s3 + $0xf08] sm:$0xff] }
 0x1b1   :  { %8225 = vmatprep.subr.bf16.mxu1 %v8224_v61  ;;  %v2608_v61 = vadd.s32 3712, %v9974_v59  ;;  %v8204_v12 = vpack.c.bf16 %v3378_v3, %v3377_v22  ;;  %v2733_v22 = vcvt.s32.f32 %v2669_v55  ;;  %v3429_v3 = vld [vmem:[%s13205_s3 + $0xe90] sm:$0xff] }
 0x1b3   :  { %8195 = vmatpush3.bf16.msra.mxu0 %v8194_v29  ;;  %v3362_v29 = vld [vmem:[%s13205_s3 + $0xc78] sm:$0xff]  ;;  %v2672_v23 = vand.u32 255, %v2608_v61  ;;  %v3461_v61 = vld [vmem:[%s13205_s3 + $0xf90] sm:$0xff]  ;;  %vm2797_vm12 = vcmp.eq.f32.partialorder %v10359_v31, %v2733_v22 }
 0x1b4   :  { %8227 = vmatpush3.bf16.msra.mxu1 %v8226_v38  ;;  %8197 = vmatprep.subr.bf16.mxu0 %v8196_v39  ;;  %v3393_v38 = vld [vmem:[%s13205_s3 + $0xd70] sm:$0xff]  ;;  %v2667_v39 = vand.u32 255, %v2603_v63  ;;  %v8206_v48 = vpack.c.bf16 %v3362_v29, %v3361_v51  ;;  %v8272_v63 = vpack.c.bf16 %v3460_v2, %v3459_v53  ;;  %v3414_v51 = vld [vmem:[%s13205_s3 + $0xe18] sm:$0xff]  ;;  %v3415_v2 = vld [vmem:[%s13205_s3 + $0xe20] sm:$0xff] }
 0x1b5   :  { %8229 = vmatprep.subr.bf16.mxu1 %v8228_v54  ;;  %v3428_v54 = vld [vmem:[%s13205_s3 + $0xe88] sm:$0xff]  ;;  %v2736_v11 = vcvt.s32.f32 %v2672_v23  ;;  %v3445_v29 = vld [vmem:[%s13205_s3 + $0xf10] sm:$0xff] }
 0x1b6   :  { %v2731_v35 = vcvt.s32.f32 %v2667_v39  ;;  %v3446_v39 = vld [vmem:[%s13205_s3 + $0xf18] sm:$0xff]  ;;  %v3416_v23 = vld [vmem:[%s13205_s3 + $0xe28] sm:$0xff]  ;;  %v3449_v22 = vld [vmem:[%s13205_s3 + $0xf30] sm:$0xff] }
 0x1b7   :  { %8199 = vmatpush3.bf16.msra.mxu0 %v8198_v33  ;;  %v2674_v33 = vand.u32 255, %v2610_v47  ;;  %vm2800_vm13 = vcmp.eq.f32.partialorder %v10427_v18, %v2736_v11  ;;  %v8278_v31 = vpack.c.bf16 %v3446_v39, %v3445_v29  ;;  %v3447_v18 = vld [vmem:[%s13205_s3 + $0xf20] sm:$0xff]  ;;  %v8250_v36 = vpack.c.bf16 %v3416_v23, %v3415_v2  ;;  %v3420_v29 = vld [vmem:[%s13205_s3 + $0xe48] sm:$0xff]  ;;  %v3421_v2 = vld [vmem:[%s13205_s3 + $0xe50] sm:$0xff] }
 0x1b8   :  { %8231 = vmatpush3.bf16.msra.mxu1 %v8230_v26  ;;  %8201 = vmatprep.subr.bf16.mxu0 %v8200_v45  ;;  %v8238_v26 = vpack.c.bf16 %v3394_v52, %v3393_v38  ;;  %v8240_v45 = vpack.c.bf16 %v3428_v54, %v3427_v30  ;;  %vm2795_vm11 = vcmp.eq.f32.partialorder %v10357_v28, %v2731_v35  ;;  %v3432_v52 = vld [vmem:[%s13205_s3 + $0xea8] sm:$0xff]  ;;  %v3463_v28 = vld [vmem:[%s13205_s3 + $0xfa0] sm:$0xff]  ;;  %v3422_v23 = vld [vmem:[%s13205_s3 + $0xe58] sm:$0xff] }
 0x1b9   :  { %8233 = vmatprep.subr.bf16.mxu1 %v8232_v4  ;;  %v3443_v4 = vld [vmem:[%s13205_s3 + $0xf00] sm:$0xff]  ;;  %v2738_v47 = vcvt.s32.f32 %v2674_v33  ;;  %v8244_v38 = vpack.c.bf16 %v3430_v56, %v3429_v3  ;;  %v3464_v54 = vld [vmem:[%s13205_s3 + $0xfa8] sm:$0xff]  ;;  %v3433_v33 = vld [vmem:[%s13205_s3 + $0xeb0] sm:$0xff] }
 0x1ba   :  { %v3450_v56 = vld [vmem:[%s13205_s3 + $0xf38] sm:$0xff]  ;;  %v3435_v11 = vld [vmem:[%s13205_s3 + $0xec0] sm:$0xff] }
 0x1bb   :  { %8203 = vmatpush3.bf16.msra.mxu0 %v8202_v57  ;;  %v3462_v57 = vld [vmem:[%s13205_s3 + $0xf98] sm:$0xff]  ;;  %vm2802_vm14 = vcmp.eq.f32.partialorder %v10429_v19, %v2738_v47  ;;  %v8280_v19 = vpack.c.bf16 %v3464_v54, %v3463_v28  ;;  %v3469_v28 = vld [vmem:[%s13205_s3 + $0xfd0] sm:$0xff] }
 0x1bc   :  { %8235 = vmatpush3.bf16.msra.mxu1 %v8234_v62  ;;  %8205 = vmatprep.subr.bf16.mxu0 %v8204_v12  ;;  %v8274_v62 = vpack.c.bf16 %v3444_v10, %v3443_v4  ;;  %v3413_v12 = vld [vmem:[%s13205_s3 + $0xe10] sm:$0xff]  ;;  %v8276_v30 = vpack.c.bf16 %v3462_v57, %v3461_v61  ;;  %v3418_v10 = vld [vmem:[%s13205_s3 + $0xe38] sm:$0xff]  ;;  %v3467_v61 = vld [vmem:[%s13205_s3 + $0xfc0] sm:$0xff] }
 0x1bd   :  { %8237 = vmatprep.subr.bf16.mxu1 %v8236_v58  ;;  %v3431_v58 = vld [vmem:[%s13205_s3 + $0xea0] sm:$0xff]  ;;  %v8246_v55 = vpack.c.bf16 %v3414_v51, %v3413_v12  ;;  %v3417_v4 = vld [vmem:[%s13205_s3 + $0xe30] sm:$0xff]  ;;  %v3468_v57 = vld [vmem:[%s13205_s3 + $0xfc8] sm:$0xff] }
 0x1be   :  { %v8248_v53 = vpack.c.bf16 %v3432_v52, %v3431_v58  ;;  %v8254_v47 = vpack.c.bf16 %v3418_v10, %v3417_v4  ;;  %v3419_v51 = vld [vmem:[%s13205_s3 + $0xe40] sm:$0xff]  ;;  %v8288_v39 = vpack.c.bf16 %v3468_v57, %v3467_v61  ;;  %v3452_v58 = vld [vmem:[%s13205_s3 + $0xf48] sm:$0xff]  ;;  %v3437_v52 = vld [vmem:[%s13205_s3 + $0xed0] sm:$0xff] }
 0x1bf   :  { %8207 = vmatpush3.bf16.msra.mxu0 %v8206_v48  ;;  %v3448_v48 = vld [vmem:[%s13205_s3 + $0xf28] sm:$0xff]  ;;  %v3470_v54 = vld [vmem:[%s13205_s3 + $0xfd8] sm:$0xff]  ;;  %v3423_v4 = vld [vmem:[%s13205_s3 + $0xe60] sm:$0xff] }
 0x1c0   :  { %8239 = vmatpush3.bf16.msra.mxu1 %v8238_v26  ;;  %8241 = vmatprep.subr.bf16.mxu0 %v8240_v45  ;;  %v3434_v26 = vld [vmem:[%s13205_s3 + $0xeb8] sm:$0xff]  ;;  %v3465_v45 = vld [vmem:[%s13205_s3 + $0xfb0] sm:$0xff]  ;;  %v8282_v35 = vpack.c.bf16 %v3448_v48, %v3447_v18  ;;  %v3424_v10 = vld [vmem:[%s13205_s3 + $0xe68] sm:$0xff] }
 0x1c1   :  { %8273 = vmatprep.subr.bf16.mxu1 %v8272_v63  ;;  %v8252_v63 = vpack.c.bf16 %v3434_v26, %v3433_v33  ;;  %v8284_v3 = vpack.c.bf16 %v3466_v49, %v3465_v45  ;;  %v3453_v18 = vld [vmem:[%s13205_s3 + $0xf50] sm:$0xff]  ;;  %v3454_v48 = vld [vmem:[%s13205_s3 + $0xf58] sm:$0xff]  ;;  %v3439_v33 = vld [vmem:[%s13205_s3 + $0xee0] sm:$0xff] }
 0x1c2   :  { %6376 = vmatmul.mubr.msk.f32.vlgmr.msra.gmra.mrb[44].mxu0 %vm2795_vm11, %v13218_v13  ;;  %v3440_v26 = vld [vmem:[%s13205_s3 + $0xee8] sm:$0xff]  ;;  %v3471_v45 = vld [vmem:[%s13205_s3 + $0xfe0] sm:$0xff]  ;;  %v3441_v57 = vld [vmem:[%s13205_s3 + $0xef0] sm:$0xff] }
 0x1c3   :  { %6378 = vmatmul.mubr.msk.f32.vlgmr.msra.gmra.mrb[44].mxu1 %vm2797_vm12, %v13218_v13  ;;  %8243 = vmatpush3.bf16.msra.mxu0 %v8242_v46  ;;  %v3436_v46 = vld [vmem:[%s13205_s3 + $0xec8] sm:$0xff] }
 0x1c4   :  { %6379 = vmatprep.mubr.msk.f32.mxu0 %vm2800_vm13, %v13218_v13  ;;  %8275 = vmatpush3.bf16.msra.mxu1 %v8274_v62  ;;  %v8286_v62 = vpack.c.bf16 %v3450_v56, %v3449_v22  ;;  %v8256_v12 = vpack.c.bf16 %v3436_v46, %v3435_v11  ;;  %v3472_v49 = vld [vmem:[%s13205_s3 + $0xfe8] sm:$0xff]  ;;  %v3455_v22 = vld [vmem:[%s13205_s3 + $0xf60] sm:$0xff] }
 0x1c5   :  { %6381 = vmatprep.mubr.msk.f32.mxu1 %vm2802_vm14, %v13218_v13  ;;  %8245 = vmatprep.subr.bf16.mxu0 %v8244_v38  ;;  %v3451_v38 = vld [vmem:[%s13205_s3 + $0xf40] sm:$0xff]  ;;  %v8296_v46 = vpack.c.bf16 %v3472_v49, %v3471_v45  ;;  %v3456_v61 = vld [vmem:[%s13205_s3 + $0xf68] sm:$0xff] }
 0x1c6   :  { %8277 = vmatprep.subr.bf16.mxu1 %v8276_v30  ;;  %v3438_v30 = vld [vmem:[%s13205_s3 + $0xed8] sm:$0xff]  ;;  %v3523_v49 = vld [vmem:[%s13205_s3 + $0x1180] sm:$0xff] }
 0x1c7   :  { %8247 = vmatpush3.bf16.msra.mxu0 %v8246_v55  ;;  %v8258_v55 = vpack.c.bf16 %v3420_v29, %v3419_v51  ;;  %v3473_v29 = vld [vmem:[%s13205_s3 + $0xff0] sm:$0xff] }
 0x1c8   :  { %8279 = vmatpush3.bf16.msra.mxu1 %v8278_v31  ;;  %8249 = vmatprep.subr.bf16.mxu0 %v8248_v53  ;;  %v8290_v31 = vpack.c.bf16 %v3452_v58, %v3451_v38  ;;  %v8260_v53 = vpack.c.bf16 %v3438_v30, %v3437_v52  ;;  %v3474_v38 = vld [vmem:[%s13205_s3 + $0xff8] sm:$0xff]  ;;  %v8266_v30 = vpack.c.bf16 %v3424_v10, %v3423_v4 }
 0x1c9   :  { %8281 = vmatprep.subr.bf16.mxu1 %v8280_v19  ;;  %v8292_v19 = vpack.c.bf16 %v3470_v54, %v3469_v28  ;;  %v2614_v28 = vadd.s32 4480, %v9974_v59  ;;  %v8298_v54 = vpack.c.bf16 %v3456_v61, %v3455_v22  ;;  %v3507_v61 = vld [vmem:[%s13205_s3 + $0x1100] sm:$0xff] }
 0x1cb   :  { %8251 = vmatpush3.bf16.msra.mxu0 %v8250_v36  ;;  %v8262_v36 = vpack.c.bf16 %v3422_v23, %v3421_v2  ;;  %v3457_v2 = vld [vmem:[%s13205_s3 + $0xf70] sm:$0xff]  ;;  %v2678_v4 = vand.u32 255, %v2614_v28  ;;  %v3478_v28 = vld [vmem:[%s13205_s3 + $0x1018] sm:$0xff] }
 0x1cc   :  { %8283 = vmatpush3.bf16.msra.mxu1 %v8282_v35  ;;  %8253 = vmatprep.subr.bf16.mxu0 %v8252_v63  ;;  %v8294_v35 = vpack.c.bf16 %v3454_v48, %v3453_v18  ;;  %v8264_v63 = vpack.c.bf16 %v3440_v26, %v3439_v33  ;;  %v3458_v48 = vld [vmem:[%s13205_s3 + $0xf78] sm:$0xff]  ;;  %v3491_v33 = vld [vmem:[%s13205_s3 + $0x1080] sm:$0xff]  ;;  %v3492_v26 = vld [vmem:[%s13205_s3 + $0x1088] sm:$0xff] }
 0x1cd   :  { %8285 = vmatprep.subr.bf16.mxu1 %v8284_v3  ;;  %v2607_v3 = vadd.s32 3584, %v9974_v59  ;;  %v8302_v10 = vpack.c.bf16 %v3458_v48, %v3457_v2  ;;  %v8304_v22 = vpack.c.bf16 %v3492_v26, %v3491_v33  ;;  %v3496_v2 = vld [vmem:[%s13205_s3 + $0x10a8] sm:$0xff]  ;;  %v3479_v26 = vld [vmem:[%s13205_s3 + $0x1020] sm:$0xff] }
 0x1cf   :  { %8255 = vmatpush3.bf16.msra.mxu0 %v8254_v47  ;;  %v3442_v47 = vld [vmem:[%s13205_s3 + $0xef8] sm:$0xff]  ;;  %v2671_v23 = vand.u32 255, %v2607_v3  ;;  %v3475_v3 = vld [vmem:[%s13205_s3 + $0x1000] sm:$0xff] }
 0x1d0   :  { %8287 = vmatpush3.bf16.msra.mxu1 %v8286_v62  ;;  %8257 = vmatprep.subr.bf16.mxu0 %v8256_v12  ;;  %v2609_v62 = vadd.s32 3840, %v9974_v59 }
 0x1d1   :  { %8289 = vmatprep.subr.bf16.mxu1 %v8288_v39  ;;  %v2612_v39 = vadd.s32 4224, %v9974_v59 }
 0x1d2   :  { %v2673_v45 = vand.u32 255, %v2609_v62  ;;  %v3493_v62 = vld [vmem:[%s13205_s3 + $0x1090] sm:$0xff] }
 0x1d3   :  { %8259 = vmatpush3.bf16.msra.mxu0 %v8258_v55  ;;  %v8268_v55 = vpack.c.bf16 %v3442_v47, %v3441_v57  ;;  %v3508_v57 = vld [vmem:[%s13205_s3 + $0x1108] sm:$0xff] }
 0x1d4   :  { %8291 = vmatpush3.bf16.msra.mxu1 %v8290_v31  ;;  %8261 = vmatprep.subr.bf16.mxu0 %v8260_v53  ;;  %v3425_v31 = vld [vmem:[%s13205_s3 + $0xe70] sm:$0xff]  ;;  %v3426_v53 = vld [vmem:[%s13205_s3 + $0xe78] sm:$0xff]  ;;  %v2737_v47 = vcvt.s32.f32 %v2673_v45  ;;  %v3480_v45 = vld [vmem:[%s13205_s3 + $0x1028] sm:$0xff] }
 0x1d5   :  { %v6448_v56 = vpop.f32.mrb[32].mxu0  ;;  %v6483_v11 = vpop.f32.mrb[32].mxu1  ;;  %8293 = vmatprep.subr.bf16.mxu1 %v8292_v19  ;;  %v8300_v19 = vpack.c.bf16 %v3474_v38, %v3473_v29  ;;  %v3525_v38 = vld [vmem:[%s13205_s3 + $0x1190] sm:$0xff] }
 0x1d6   :  { %v6449_v12 = vpop.f32.mrb[33].mxu0  ;;  %v6484_v51 = vpop.f32.mrb[33].mxu1  ;;  %vm2801_vm0 = vcmp.eq.f32.partialorder %v10419_v9, %v2737_v47  ;;  %v3499_v47 = vld [vmem:[%s13205_s3 + $0x10c0] sm:$0xff] }
 0x1d7   :  { %v6450_v58 = vadd.f32 %v6449_v12, %v6448_v56  ;;  %v6485_v52 = vadd.f32 %v6484_v51, %v6483_v11  ;;  %8263 = vmatpush3.bf16.msra.mxu0 %v8262_v36  ;;  %v3524_v36 = vld [vmem:[%s13205_s3 + $0x1188] sm:$0xff]  ;;  %v2735_v11 = vcvt.s32.f32 %v2671_v23  ;;  %v3494_v12 = vld [vmem:[%s13205_s3 + $0x1098] sm:$0xff] }
 0x1d8   :  { %8295 = vmatpush3.bf16.msra.mxu1 %v8294_v35  ;;  %8265 = vmatprep.subr.bf16.mxu0 %v8264_v63  ;;  %v2676_v35 = vand.u32 255, %v2612_v39  ;;  %v8270_v63 = vpack.c.bf16 %v3426_v53, %v3425_v31  ;;  %v3476_v56 = vld [vmem:[%s13205_s3 + $0x1008] sm:$0xff]  ;;  %v3526_v39 = vld [vmem:[%s13205_s3 + $0x1198] sm:$0xff]  ;;  %v3495_v53 = vld [vmem:[%s13205_s3 + $0x10a0] sm:$0xff] }
 0x1d9   :  { %v11526_v18 = vadd.f32 %v6485_v52, %v6450_v58  ;;  %8297 = vmatprep.subr.bf16.mxu1 %v8296_v46  ;;  %v8336_v46 = vpack.c.bf16 %v3524_v36, %v3523_v49  ;;  %v8306_v29 = vpack.c.bf16 %v3476_v56, %v3475_v3  ;;  %v2742_v58 = vcvt.s32.f32 %v2678_v4  ;;  %v3510_v31 = vld [vmem:[%s13205_s3 + $0x1118] sm:$0xff]  ;;  %v3512_v49 = vld [vmem:[%s13205_s3 + $0x1128] sm:$0xff]  ;;  %v3497_v36 = vld [vmem:[%s13205_s3 + $0x10b0] sm:$0xff] }
 0x1da   :  { %v2740_v51 = vcvt.s32.f32 %v2676_v35  ;;  %v8338_v52 = vpack.c.bf16 %v3508_v57, %v3507_v61  ;;  %vm2799_vm15 = vcmp.eq.f32.partialorder %v10417_v8, %v2735_v11  ;;  %v8340_v23 = vpack.c.bf16 %v3526_v39, %v3525_v38  ;;  %v3527_v8 = vld [vmem:[%s13205_s3 + $0x11a0] sm:$0xff]  ;;  %v3498_v35 = vld [vmem:[%s13205_s3 + $0x10b8] sm:$0xff]  ;;  %v3481_v56 = vld [vmem:[%s13205_s3 + $0x1030] sm:$0xff] }
 0x1db   :  { %8267 = vmatpush3.bf16.msra.mxu0 %v8266_v30  ;;  %v3477_v30 = vld [vmem:[%s13205_s3 + $0x1010] sm:$0xff]  ;;  %vm2806_vm2 = vcmp.eq.f32.partialorder %v10487_v6, %v2742_v58  ;;  %v8312_v33 = vpack.c.bf16 %v3496_v2, %v3495_v53  ;;  %v3530_v4 = vld [vmem:[%s13205_s3 + $0x11b8] sm:$0xff]  ;;  %v8316_v3 = vpack.c.bf16 %v3498_v35, %v3497_v36  ;;  %v3483_v58 = vld [vmem:[%s13205_s3 + $0x1040] sm:$0xff] }
 0x1dc   :  { %8299 = vmatpush3.bf16.msra.mxu1 %v8298_v54  ;;  %8269 = vmatprep.subr.bf16.mxu0 %v8268_v55  ;;  %v3509_v54 = vld [vmem:[%s13205_s3 + $0x1110] sm:$0xff]  ;;  %v8308_v55 = vpack.c.bf16 %v3494_v12, %v3493_v62  ;;  %vm2804_vm1 = vcmp.eq.f32.partialorder %v10485_v5, %v2740_v51  ;;  %v8310_v48 = vpack.c.bf16 %v3478_v28, %v3477_v30  ;;  %v3511_v5 = vld [vmem:[%s13205_s3 + $0x1120] sm:$0xff]  ;;  %v3482_v11 = vld [vmem:[%s13205_s3 + $0x1038] sm:$0xff] }
 0x1dd   :  { %8301 = vmatprep.subr.bf16.mxu1 %v8300_v19  ;;  %v3528_v19 = vld [vmem:[%s13205_s3 + $0x11a8] sm:$0xff]  ;;  %v8342_v9 = vpack.c.bf16 %v3510_v31, %v3509_v54  ;;  %v3514_v57 = vld [vmem:[%s13205_s3 + $0x1138] sm:$0xff]  ;;  %v3531_v12 = vld [vmem:[%s13205_s3 + $0x11c0] sm:$0xff] }
 0x1de   :  { %v8344_v6 = vpack.c.bf16 %v3528_v19, %v3527_v8  ;;  %v3500_v62 = vld [vmem:[%s13205_s3 + $0x10c8] sm:$0xff]  ;;  %v3515_v30 = vld [vmem:[%s13205_s3 + $0x1140] sm:$0xff]  ;;  %v3502_v31 = vld [vmem:[%s13205_s3 + $0x10d8] sm:$0xff] }
 0x1df   :  { %8271 = vmatpush3.bf16.msra.mxu0 %v8270_v63  ;;  %v3529_v63 = vld [vmem:[%s13205_s3 + $0x11b0] sm:$0xff]  ;;  %v3532_v51 = vld [vmem:[%s13205_s3 + $0x11c8] sm:$0xff]  ;;  %v8320_v39 = vpack.c.bf16 %v3500_v62, %v3499_v47  ;;  %v3534_v2 = vld [vmem:[%s13205_s3 + $0x11d8] sm:$0xff] }
 0x1e0   :  { %8303 = vmatpush3.bf16.msra.mxu1 %v8302_v10  ;;  %8305 = vmatprep.subr.bf16.mxu0 %v8304_v22  ;;  %v8314_v10 = vpack.c.bf16 %v3480_v45, %v3479_v26  ;;  %v8346_v22 = vpack.c.bf16 %v3512_v49, %v3511_v5  ;;  %v8348_v61 = vpack.c.bf16 %v3530_v4, %v3529_v63  ;;  %v3516_v54 = vld [vmem:[%s13205_s3 + $0x1148] sm:$0xff]  ;;  %v3533_v53 = vld [vmem:[%s13205_s3 + $0x11d0] sm:$0xff]  ;;  %v3518_v45 = vld [vmem:[%s13205_s3 + $0x1158] sm:$0xff] }
 0x1e1   :  { %8337 = vmatprep.subr.bf16.mxu1 %v8336_v46  ;;  %v3513_v46 = vld [vmem:[%s13205_s3 + $0x1130] sm:$0xff]  ;;  %v8352_v28 = vpack.c.bf16 %v3532_v51, %v3531_v12  ;;  %v8354_v8 = vpack.c.bf16 %v3516_v54, %v3515_v30  ;;  %v8356_v26 = vpack.c.bf16 %v3534_v2, %v3533_v53  ;;  %v3503_v5 = vld [vmem:[%s13205_s3 + $0x10e0] sm:$0xff]  ;;  %v3536_v36 = vld [vmem:[%s13205_s3 + $0x11e8] sm:$0xff]  ;;  %v2613_v12 = vadd.s32 4352, %v9974_v59 }
 0x1e2   :  { %6380 = vmatmul.mubr.msk.f32.vlgmr.msra.gmra.mrb[46].mxu0 %vm2799_vm15, %v13218_v13  ;;  %v8350_v38 = vpack.c.bf16 %v3514_v57, %v3513_v46  ;;  %v3535_v49 = vld [vmem:[%s13205_s3 + $0x11e0] sm:$0xff]  ;;  %v3520_v57 = vld [vmem:[%s13205_s3 + $0x1168] sm:$0xff]  ;;  %v3505_v47 = vld [vmem:[%s13205_s3 + $0x10f0] sm:$0xff]  ;;  %v2618_v54 = vadd.s32 4992, %v9974_v59 }
 0x1e3   :  { %6382 = vmatmul.mubr.msk.f32.vlgmr.msra.gmra.mrb[46].mxu1 %vm2801_vm0, %v13218_v13  ;;  %8307 = vmatpush3.bf16.msra.mxu0 %v8306_v29  ;;  %v8318_v29 = vpack.c.bf16 %v3482_v11, %v3481_v56  ;;  %v2611_v56 = vadd.s32 4096, %v9974_v59  ;;  %v3506_v62 = vld [vmem:[%s13205_s3 + $0x10f8] sm:$0xff]  ;;  %v3489_v53 = vld [vmem:[%s13205_s3 + $0x1070] sm:$0xff] }
 0x1e4   :  { %6383 = vmatprep.mubr.msk.f32.mxu0 %vm2804_vm1, %v13218_v13  ;;  %8339 = vmatpush3.bf16.msra.mxu1 %v8338_v52  ;;  %v3484_v52 = vld [vmem:[%s13205_s3 + $0x1048] sm:$0xff]  ;;  %v3490_v2 = vld [vmem:[%s13205_s3 + $0x1078] sm:$0xff] }
 0x1e5   :  { %6385 = vmatprep.mubr.msk.f32.mxu1 %vm2806_vm2, %v13218_v13  ;;  %8309 = vmatprep.subr.bf16.mxu0 %v8308_v55  ;;  %v3501_v55 = vld [vmem:[%s13205_s3 + $0x10d0] sm:$0xff] }
 0x1e6   :  { %8341 = vmatprep.subr.bf16.mxu1 %v8340_v23  ;;  %v8322_v23 = vpack.c.bf16 %v3484_v52, %v3483_v58  ;;  %v8324_v19 = vpack.c.bf16 %v3502_v31, %v3501_v55  ;;  %v2616_v58 = vadd.s32 4736, %v9974_v59  ;;  %v8332_v31 = vpack.c.bf16 %v3506_v62, %v3505_v47  ;;  %v3558_v47 = vld [vmem:[%s13205_s3 + $0x1298] sm:$0xff] }
 0x1e7   :  { %8311 = vmatpush3.bf16.msra.mxu0 %v8310_v48  ;;  %v3485_v48 = vld [vmem:[%s13205_s3 + $0x1050] sm:$0xff] }
 0x1e8   :  { %8343 = vmatpush3.bf16.msra.mxu1 %v8342_v9  ;;  %8313 = vmatprep.subr.bf16.mxu0 %v8312_v33  ;;  %v3486_v9 = vld [vmem:[%s13205_s3 + $0x1058] sm:$0xff]  ;;  %v3517_v33 = vld [vmem:[%s13205_s3 + $0x1150] sm:$0xff] }
 0x1e9   :  { %8345 = vmatprep.subr.bf16.mxu1 %v8344_v6  ;;  %v3504_v6 = vld [vmem:[%s13205_s3 + $0x10e8] sm:$0xff]  ;;  %v8326_v35 = vpack.c.bf16 %v3486_v9, %v3485_v48  ;;  %v8358_v63 = vpack.c.bf16 %v3518_v45, %v3517_v33  ;;  %v3522_v9 = vld [vmem:[%s13205_s3 + $0x1178] sm:$0xff]  ;;  %v3555_v33 = vld [vmem:[%s13205_s3 + $0x1280] sm:$0xff]  ;;  %v2677_v45 = vand.u32 255, %v2613_v12 }
 0x1ea   :  { %v8328_v4 = vpack.c.bf16 %v3504_v6, %v3503_v5  ;;  %v3587_v5 = vld [vmem:[%s13205_s3 + $0x1380] sm:$0xff]  ;;  %v2680_v6 = vand.u32 255, %v2616_v58  ;;  %v3541_v58 = vld [vmem:[%s13205_s3 + $0x1210] sm:$0xff] }
 0x1eb   :  { %8315 = vmatpush3.bf16.msra.mxu0 %v8314_v10  ;;  %v3487_v10 = vld [vmem:[%s13205_s3 + $0x1060] sm:$0xff] }
 0x1ec   :  { %8347 = vmatpush3.bf16.msra.mxu1 %v8346_v22  ;;  %8317 = vmatprep.subr.bf16.mxu0 %v8316_v3  ;;  %v3488_v22 = vld [vmem:[%s13205_s3 + $0x1068] sm:$0xff]  ;;  %v3519_v3 = vld [vmem:[%s13205_s3 + $0x1160] sm:$0xff]  ;;  %v2744_v62 = vcvt.s32.f32 %v2680_v6 }
 0x1ed   :  { %8349 = vmatprep.subr.bf16.mxu1 %v8348_v61  ;;  %v8360_v61 = vpack.c.bf16 %v3536_v36, %v3535_v49  ;;  %v8362_v55 = vpack.c.bf16 %v3520_v57, %v3519_v3  ;;  %v8334_v36 = vpack.c.bf16 %v3490_v2, %v3489_v53  ;;  %v3557_v57 = vld [vmem:[%s13205_s3 + $0x1290] sm:$0xff]  ;;  %v3592_v2 = vld [vmem:[%s13205_s3 + $0x13a8] sm:$0xff] }
 0x1ee   :  { %vm2808_vm5 = vcmp.eq.f32.partialorder %v10555_v50, %v2744_v62  ;;  %v3575_v50 = vld [vmem:[%s13205_s3 + $0x1320] sm:$0xff] }
 0x1ef   :  { %8319 = vmatpush3.bf16.msra.mxu0 %v8318_v29  ;;  %v3547_v62 = vld [vmem:[%s13205_s3 + $0x1240] sm:$0xff] }
 0x1f0   :  { %8351 = vmatpush3.bf16.msra.mxu1 %v8350_v38  ;;  %8321 = vmatprep.subr.bf16.mxu0 %v8320_v39  ;;  %v3537_v38 = vld [vmem:[%s13205_s3 + $0x11f0] sm:$0xff]  ;;  %v3538_v39 = vld [vmem:[%s13205_s3 + $0x11f8] sm:$0xff] }
 0x1f1   :  { %8353 = vmatprep.subr.bf16.mxu1 %v8352_v28  ;;  %v8330_v28 = vpack.c.bf16 %v3488_v22, %v3487_v10  ;;  %v8364_v48 = vpack.c.bf16 %v3538_v39, %v3537_v38  ;;  %v3539_v10 = vld [vmem:[%s13205_s3 + $0x1200] sm:$0xff]  ;;  %v3540_v22 = vld [vmem:[%s13205_s3 + $0x1208] sm:$0xff] }
 0x1f2   :  { %v8370_v12 = vpack.c.bf16 %v3540_v22, %v3539_v10  ;;  %v3578_v22 = vld [vmem:[%s13205_s3 + $0x1338] sm:$0xff] }
 0x1f3   :  { %8323 = vmatpush3.bf16.msra.mxu0 %v8322_v23  ;;  %v3521_v23 = vld [vmem:[%s13205_s3 + $0x1170] sm:$0xff] }
 0x1f4   :  { %8355 = vmatpush3.bf16.msra.mxu1 %v8354_v8  ;;  %8325 = vmatprep.subr.bf16.mxu0 %v8324_v19  ;;  %v2675_v8 = vand.u32 255, %v2611_v56 }
 0x1f5   :  { %v6518_v11 = vpop.f32.mrb[34].mxu0  ;;  %v6553_v46 = vpop.f32.mrb[34].mxu1  ;;  %8357 = vmatprep.subr.bf16.mxu1 %v8356_v26  ;;  %v3556_v26 = vld [vmem:[%s13205_s3 + $0x1288] sm:$0xff] }
 0x1f6   :  { %v6519_v51 = vpop.f32.mrb[35].mxu0  ;;  %v6554_v29 = vpop.f32.mrb[35].mxu1  ;;  %v2739_v3 = vcvt.s32.f32 %v2675_v8 }
 0x1f7   :  { %v6520_v52 = vadd.f32 %v6519_v51, %v6518_v11  ;;  %v6555_v30 = vadd.f32 %v6554_v29, %v6553_v46  ;;  %8327 = vmatpush3.bf16.msra.mxu0 %v8326_v35  ;;  %v2682_v35 = vand.u32 255, %v2618_v54  ;;  %v3571_v11 = vld [vmem:[%s13205_s3 + $0x1300] sm:$0xff]  ;;  %v3572_v46 = vld [vmem:[%s13205_s3 + $0x1308] sm:$0xff]  ;;  %v3589_v51 = vld [vmem:[%s13205_s3 + $0x1390] sm:$0xff] }
 0x1f8   :  { %8359 = vmatpush3.bf16.msra.mxu1 %v8358_v63  ;;  %8329 = vmatprep.subr.bf16.mxu0 %v8328_v4  ;;  %v8366_v63 = vpack.c.bf16 %v3522_v9, %v3521_v23  ;;  %v8368_v4 = vpack.c.bf16 %v3556_v26, %v3555_v33  ;;  %v3590_v29 = vld [vmem:[%s13205_s3 + $0x1398] sm:$0xff]  ;;  %v8402_v39 = vpack.c.bf16 %v3572_v46, %v3571_v11  ;;  %v3576_v9 = vld [vmem:[%s13205_s3 + $0x1328] sm:$0xff]  ;;  %v3561_v33 = vld [vmem:[%s13205_s3 + $0x12b0] sm:$0xff] }
 0x1f9   :  { %v4194_v19 = vadd.f32 %v6520_v52, %v11526_v18  ;;  %8361 = vmatprep.subr.bf16.mxu1 %v8360_v61  ;;  %v3588_v18 = vld [vmem:[%s13205_s3 + $0x1388] sm:$0xff]  ;;  %v2741_v61 = vcvt.s32.f32 %v2677_v45  ;;  %v2746_v38 = vcvt.s32.f32 %v2682_v35  ;;  %v3542_v52 = vld [vmem:[%s13205_s3 + $0x1218] sm:$0xff]  ;;  %vm2803_vm3 = vcmp.eq.f32.partialorder %v10473_v0, %v2739_v3  ;;  %v3591_v0 = vld [vmem:[%s13205_s3 + $0x13a0] sm:$0xff] }
 0x1fa   :  { %v8400_v56 = vpack.c.bf16 %v3588_v18, %v3587_v5  ;;  %v3574_v54 = vld [vmem:[%s13205_s3 + $0x1318] sm:$0xff]  ;;  %v8404_v53 = vpack.c.bf16 %v3590_v29, %v3589_v51  ;;  %v8374_v23 = vpack.c.bf16 %v3542_v52, %v3541_v58  ;;  %v3593_v45 = vld [vmem:[%s13205_s3 + $0x13b0] sm:$0xff]  ;;  %v8410_v6 = vpack.c.bf16 %v3576_v9, %v3575_v50  ;;  %v3563_v3 = vld [vmem:[%s13205_s3 + $0x12c0] sm:$0xff] }
 0x1fb   :  { %v11748_v49 = vadd.f32 %v6555_v30, %v4194_v19  ;;  %8331 = vmatpush3.bf16.msra.mxu0 %v8330_v28  ;;  %v3573_v30 = vld [vmem:[%s13205_s3 + $0x1310] sm:$0xff]  ;;  %v8372_v28 = vpack.c.bf16 %v3558_v47, %v3557_v57  ;;  %vm2805_vm4 = vcmp.eq.f32.partialorder %v10475_v1, %v2741_v61  ;;  %vm2810_vm6 = vcmp.eq.f32.partialorder %v10557_v60, %v2746_v38  ;;  %v3543_v19 = vld [vmem:[%s13205_s3 + $0x1220] sm:$0xff]  ;;  %v3562_v26 = vld [vmem:[%s13205_s3 + $0x12b8] sm:$0xff] }
 0x1fc   :  { %8363 = vmatpush3.bf16.msra.mxu1 %v8362_v55  ;;  %8333 = vmatprep.subr.bf16.mxu0 %v8332_v31  ;;  %v3559_v55 = vld [vmem:[%s13205_s3 + $0x12a0] sm:$0xff]  ;;  %v3560_v31 = vld [vmem:[%s13205_s3 + $0x12a8] sm:$0xff]  ;;  %v8406_v1 = vpack.c.bf16 %v3574_v54, %v3573_v30  ;;  %v8408_v60 = vpack.c.bf16 %v3592_v2, %v3591_v0  ;;  %v3594_v5 = vld [vmem:[%s13205_s3 + $0x13b8] sm:$0xff] }
 0x1fd   :  { %8365 = vmatprep.subr.bf16.mxu1 %v8364_v48  ;;  %v8376_v8 = vpack.c.bf16 %v3560_v31, %v3559_v55  ;;  %v3544_v48 = vld [vmem:[%s13205_s3 + $0x1228] sm:$0xff]  ;;  %v3545_v35 = vld [vmem:[%s13205_s3 + $0x1230] sm:$0xff]  ;;  %v8412_v10 = vpack.c.bf16 %v3594_v5, %v3593_v45  ;;  %v3595_v11 = vld [vmem:[%s13205_s3 + $0x13c0] sm:$0xff]  ;;  %v2615_v5 = vadd.s32 4608, %v9974_v59 }
 0x1fe   :  { %v8378_v18 = vpack.c.bf16 %v3544_v48, %v3543_v19  ;;  %v3596_v46 = vld [vmem:[%s13205_s3 + $0x13c8] sm:$0xff]  ;;  %v3579_v51 = vld [vmem:[%s13205_s3 + $0x1340] sm:$0xff]  ;;  %v3566_v58 = vld [vmem:[%s13205_s3 + $0x12d8] sm:$0xff] }
 0x1ff   :  { %8335 = vmatpush3.bf16.msra.mxu0 %v8334_v36  ;;  %v8380_v36 = vpack.c.bf16 %v3562_v26, %v3561_v33  ;;  %v8416_v29 = vpack.c.bf16 %v3596_v46, %v3595_v11  ;;  %v3580_v38 = vld [vmem:[%s13205_s3 + $0x1348] sm:$0xff]  ;;  %v3597_v52 = vld [vmem:[%s13205_s3 + $0x13d0] sm:$0xff]  ;;  %v3598_v30 = vld [vmem:[%s13205_s3 + $0x13d8] sm:$0xff]  ;;  %v2620_v46 = vadd.s32 5248, %v9974_v59 }
 0x200   :  { %8367 = vmatpush3.bf16.msra.mxu1 %v8366_v63  ;;  %8369 = vmatprep.subr.bf16.mxu0 %v8368_v4  ;;  %v3546_v63 = vld [vmem:[%s13205_s3 + $0x1238] sm:$0xff]  ;;  %v3577_v4 = vld [vmem:[%s13205_s3 + $0x1330] sm:$0xff]  ;;  %v8418_v54 = vpack.c.bf16 %v3580_v38, %v3579_v51  ;;  %v8420_v2 = vpack.c.bf16 %v3598_v30, %v3597_v52  ;;  %v3599_v19 = vld [vmem:[%s13205_s3 + $0x13e0] sm:$0xff] }
 0x201   :  { %8401 = vmatprep.subr.bf16.mxu1 %v8400_v56  ;;  %v3564_v56 = vld [vmem:[%s13205_s3 + $0x12c8] sm:$0xff]  ;;  %v8382_v61 = vpack.c.bf16 %v3546_v63, %v3545_v35  ;;  %v8414_v57 = vpack.c.bf16 %v3578_v22, %v3577_v4  ;;  %v3549_v31 = vld [vmem:[%s13205_s3 + $0x1250] sm:$0xff]  ;;  %v3551_v33 = vld [vmem:[%s13205_s3 + $0x1260] sm:$0xff] }
 0x202   :  { %6384 = vmatmul.mubr.msk.f32.vlgmr.msra.gmra.mrb[48].mxu0 %vm2803_vm3, %v13218_v13  ;;  %v8384_v47 = vpack.c.bf16 %v3564_v56, %v3563_v3  ;;  %v3581_v0 = vld [vmem:[%s13205_s3 + $0x1350] sm:$0xff]  ;;  %v3600_v48 = vld [vmem:[%s13205_s3 + $0x13e8] sm:$0xff]  ;;  %v3583_v45 = vld [vmem:[%s13205_s3 + $0x1360] sm:$0xff] }
 0x203   :  { %6386 = vmatmul.mubr.msk.f32.vlgmr.msra.gmra.mrb[48].mxu1 %vm2805_vm4, %v13218_v13  ;;  %8371 = vmatpush3.bf16.msra.mxu0 %v8370_v12  ;;  %v3548_v12 = vld [vmem:[%s13205_s3 + $0x1248] sm:$0xff]  ;;  %v3569_v63 = vld [vmem:[%s13205_s3 + $0x12f0] sm:$0xff]  ;;  %v3570_v4 = vld [vmem:[%s13205_s3 + $0x12f8] sm:$0xff] }
 0x204   :  { %6387 = vmatprep.mubr.msk.f32.mxu0 %vm2808_vm5, %v13218_v13  ;;  %8403 = vmatpush3.bf16.msra.mxu1 %v8402_v39  ;;  %v3565_v39 = vld [vmem:[%s13205_s3 + $0x12d0] sm:$0xff]  ;;  %v3552_v26 = vld [vmem:[%s13205_s3 + $0x1268] sm:$0xff]  ;;  %v3602_v11 = vld [vmem:[%s13205_s3 + $0x13f8] sm:$0xff]  ;;  %v8396_v51 = vpack.c.bf16 %v3570_v4, %v3569_v63 }
 0x205   :  { %6389 = vmatprep.mubr.msk.f32.mxu1 %vm2810_vm6, %v13218_v13  ;;  %8373 = vmatprep.subr.bf16.mxu0 %v8372_v28  ;;  %v8386_v28 = vpack.c.bf16 %v3548_v12, %v3547_v62  ;;  %v8388_v55 = vpack.c.bf16 %v3566_v58, %v3565_v39  ;;  %v3584_v35 = vld [vmem:[%s13205_s3 + $0x1368] sm:$0xff]  ;;  %v3601_v56 = vld [vmem:[%s13205_s3 + $0x13f0] sm:$0xff]  ;;  %v2622_v62 = vadd.s32 5504, %v9974_v59  ;;  %v3554_v38 = vld [vmem:[%s13205_s3 + $0x1278] sm:$0xff]  ;;  %v2679_v58 = vand.u32 255, %v2615_v5 }
 0x206   :  { %8405 = vmatprep.subr.bf16.mxu1 %v8404_v53  ;;  %v3550_v53 = vld [vmem:[%s13205_s3 + $0x1258] sm:$0xff]  ;;  %v8426_v12 = vpack.c.bf16 %v3584_v35, %v3583_v45  ;;  %v3585_v39 = vld [vmem:[%s13205_s3 + $0x1370] sm:$0xff]  ;;  %v8428_v30 = vpack.c.bf16 %v3602_v11, %v3601_v56 }
 0x207   :  { %8375 = vmatpush3.bf16.msra.mxu0 %v8374_v23  ;;  %v3582_v23 = vld [vmem:[%s13205_s3 + $0x1358] sm:$0xff]  ;;  %v8390_v50 = vpack.c.bf16 %v3550_v53, %v3549_v31  ;;  %v3651_v53 = vld [vmem:[%s13205_s3 + $0x1580] sm:$0xff]  ;;  %v3621_v5 = vld [vmem:[%s13205_s3 + $0x1490] sm:$0xff] }
 0x208   :  { %8407 = vmatpush3.bf16.msra.mxu1 %v8406_v1  ;;  %8377 = vmatprep.subr.bf16.mxu0 %v8376_v8  ;;  %v3567_v1 = vld [vmem:[%s13205_s3 + $0x12e0] sm:$0xff]  ;;  %v3568_v8 = vld [vmem:[%s13205_s3 + $0x12e8] sm:$0xff]  ;;  %v3653_v35 = vld [vmem:[%s13205_s3 + $0x1590] sm:$0xff] }
 0x209   :  { %8409 = vmatprep.subr.bf16.mxu1 %v8408_v60  ;;  %v8422_v60 = vpack.c.bf16 %v3582_v23, %v3581_v0  ;;  %v8392_v9 = vpack.c.bf16 %v3568_v8, %v3567_v1  ;;  %v2684_v0 = vand.u32 255, %v2620_v46  ;;  %v2686_v1 = vand.u32 255, %v2622_v62  ;;  %v3654_v63 = vld [vmem:[%s13205_s3 + $0x1598] sm:$0xff]  ;;  %v3637_v56 = vld [vmem:[%s13205_s3 + $0x1510] sm:$0xff]  ;;  %v3656_v62 = vld [vmem:[%s13205_s3 + $0x15a8] sm:$0xff] }
 0x20a   :  { %v3638_v46 = vld [vmem:[%s13205_s3 + $0x1518] sm:$0xff] }
 0x20b   :  { %8379 = vmatpush3.bf16.msra.mxu0 %v8378_v18  ;;  %v2750_v4 = vcvt.s32.f32 %v2686_v1  ;;  %v3642_v1 = vld [vmem:[%s13205_s3 + $0x1538] sm:$0xff] }
 0x20c   :  { %8411 = vmatpush3.bf16.msra.mxu1 %v8410_v6  ;;  %8381 = vmatprep.subr.bf16.mxu0 %v8380_v36  ;;  %v8424_v36 = vpack.c.bf16 %v3600_v48, %v3599_v19  ;;  %v3603_v48 = vld [vmem:[%s13205_s3 + $0x1400] sm:$0xff] }
 0x20d   :  { %8413 = vmatprep.subr.bf16.mxu1 %v8412_v10  ;;  %v2617_v10 = vadd.s32 4864, %v9974_v59  ;;  %vm2814_vm10 = vcmp.eq.f32.partialorder %v10613_v34, %v2750_v4  ;;  %v3662_v4 = vld [vmem:[%s13205_s3 + $0x15d8] sm:$0xff] }
 0x20f   :  { %8383 = vmatpush3.bf16.msra.mxu0 %v8382_v61  ;;  %v2681_v31 = vand.u32 255, %v2617_v10 }
 0x210   :  { %8415 = vmatpush3.bf16.msra.mxu1 %v8414_v57  ;;  %8385 = vmatprep.subr.bf16.mxu0 %v8384_v47  ;;  %v8394_v47 = vpack.c.bf16 %v3552_v26, %v3551_v33  ;;  %v3635_v33 = vld [vmem:[%s13205_s3 + $0x1500] sm:$0xff]  ;;  %v3636_v26 = vld [vmem:[%s13205_s3 + $0x1508] sm:$0xff] }
 0x211   :  { %8417 = vmatprep.subr.bf16.mxu1 %v8416_v29  ;;  %v3553_v29 = vld [vmem:[%s13205_s3 + $0x1270] sm:$0xff]  ;;  %v2745_v45 = vcvt.s32.f32 %v2681_v31  ;;  %v8466_v10 = vpack.c.bf16 %v3636_v26, %v3635_v33  ;;  %v3611_v26 = vld [vmem:[%s13205_s3 + $0x1440] sm:$0xff] }
 0x212   :  { %v8398_v23 = vpack.c.bf16 %v3554_v38, %v3553_v29  ;;  %v3607_v29 = vld [vmem:[%s13205_s3 + $0x1420] sm:$0xff]  ;;  %v3608_v38 = vld [vmem:[%s13205_s3 + $0x1428] sm:$0xff] }
 0x213   :  { %8387 = vmatpush3.bf16.msra.mxu0 %v8386_v28  ;;  %v3586_v28 = vld [vmem:[%s13205_s3 + $0x1378] sm:$0xff]  ;;  %vm2809_vm8 = vcmp.eq.f32.partialorder %v10547_v43, %v2745_v45  ;;  %v8470_v43 = vpack.c.bf16 %v3638_v46, %v3637_v56  ;;  %v3612_v45 = vld [vmem:[%s13205_s3 + $0x1448] sm:$0xff]  ;;  %v3613_v56 = vld [vmem:[%s13205_s3 + $0x1450] sm:$0xff] }
 0x214   :  { %8419 = vmatpush3.bf16.msra.mxu1 %v8418_v54  ;;  %8389 = vmatprep.subr.bf16.mxu0 %v8388_v55  ;;  %v3619_v54 = vld [vmem:[%s13205_s3 + $0x1480] sm:$0xff]  ;;  %v3620_v55 = vld [vmem:[%s13205_s3 + $0x1488] sm:$0xff]  ;;  %v8430_v8 = vpack.c.bf16 %v3586_v28, %v3585_v39  ;;  %v3658_v28 = vld [vmem:[%s13205_s3 + $0x15b8] sm:$0xff] }
 0x215   :  { %v6588_v18 = vpop.f32.mrb[36].mxu0  ;;  %v6623_v6 = vpop.f32.mrb[36].mxu1  ;;  %8421 = vmatprep.subr.bf16.mxu1 %v8420_v2  ;;  %v8432_v19 = vpack.c.bf16 %v3620_v55, %v3619_v54  ;;  %v3640_v39 = vld [vmem:[%s13205_s3 + $0x1528] sm:$0xff]  ;;  %v8442_v54 = vpack.c.bf16 %v3608_v38, %v3607_v29  ;;  %v3645_v46 = vld [vmem:[%s13205_s3 + $0x1550] sm:$0xff]  ;;  %v3615_v38 = vld [vmem:[%s13205_s3 + $0x1460] sm:$0xff] }
 0x216   :  { %v6589_v22 = vpop.f32.mrb[37].mxu0  ;;  %v6624_v3 = vpop.f32.mrb[37].mxu1 }
 0x217   :  { %v6590_v61 = vadd.f32 %v6589_v22, %v6588_v18  ;;  %v6625_v57 = vadd.f32 %v6624_v3, %v6623_v6  ;;  %8391 = vmatpush3.bf16.msra.mxu0 %v8390_v50  ;;  %v3604_v50 = vld [vmem:[%s13205_s3 + $0x1408] sm:$0xff]  ;;  %v3622_v18 = vld [vmem:[%s13205_s3 + $0x1498] sm:$0xff]  ;;  %v2748_v6 = vcvt.s32.f32 %v2684_v0  ;;  %v3605_v22 = vld [vmem:[%s13205_s3 + $0x1410] sm:$0xff] }
 0x218   :  { %8423 = vmatpush3.bf16.msra.mxu1 %v8422_v60  ;;  %8393 = vmatprep.subr.bf16.mxu0 %v8392_v9  ;;  %v2743_v60 = vcvt.s32.f32 %v2679_v58  ;;  %v3606_v3 = vld [vmem:[%s13205_s3 + $0x1418] sm:$0xff]  ;;  %v8436_v11 = vpack.c.bf16 %v3622_v18, %v3621_v5  ;;  %v3625_v58 = vld [vmem:[%s13205_s3 + $0x14b0] sm:$0xff]  ;;  %v3643_v5 = vld [vmem:[%s13205_s3 + $0x1540] sm:$0xff] }
 0x219   :  { %v4334_v52 = vadd.f32 %v6590_v61, %v11748_v49  ;;  %8425 = vmatprep.subr.bf16.mxu1 %v8424_v36  ;;  %v3652_v49 = vld [vmem:[%s13205_s3 + $0x1588] sm:$0xff]  ;;  %v8434_v36 = vpack.c.bf16 %v3604_v50, %v3603_v48  ;;  %v3623_v61 = vld [vmem:[%s13205_s3 + $0x14a0] sm:$0xff]  ;;  %vm2812_vm9 = vcmp.eq.f32.partialorder %v10611_v32, %v2748_v6  ;;  %v3641_v0 = vld [vmem:[%s13205_s3 + $0x1530] sm:$0xff] }
 0x21a   :  { %v8464_v9 = vpack.c.bf16 %v3652_v49, %v3651_v53  ;;  %vm2807_vm7 = vcmp.eq.f32.partialorder %v10545_v42, %v2743_v60  ;;  %v3655_v42 = vld [vmem:[%s13205_s3 + $0x15a0] sm:$0xff]  ;;  %v3609_v53 = vld [vmem:[%s13205_s3 + $0x1430] sm:$0xff]  ;;  %v3610_v49 = vld [vmem:[%s13205_s3 + $0x1438] sm:$0xff] }
 0x21b   :  { %v11955_v2 = vadd.f32 %v6625_v57, %v4334_v52  ;;  %8395 = vmatpush3.bf16.msra.mxu0 %v8394_v47  ;;  %v3624_v57 = vld [vmem:[%s13205_s3 + $0x14a8] sm:$0xff]  ;;  %v8468_v47 = vpack.c.bf16 %v3654_v63, %v3653_v35  ;;  %v3639_v32 = vld [vmem:[%s13205_s3 + $0x1520] sm:$0xff]  ;;  %v8472_v34 = vpack.c.bf16 %v3656_v62, %v3655_v42  ;;  %v3626_v52 = vld [vmem:[%s13205_s3 + $0x14b8] sm:$0xff]  ;;  %v8446_v60 = vpack.c.bf16 %v3610_v49, %v3609_v53 }
 0x21c   :  { %8427 = vmatpush3.bf16.msra.mxu1 %v8426_v12  ;;  %8397 = vmatprep.subr.bf16.mxu0 %v8396_v51  ;;  %v8438_v12 = vpack.c.bf16 %v3606_v3, %v3605_v22  ;;  %v8440_v51 = vpack.c.bf16 %v3624_v57, %v3623_v61  ;;  %v8474_v55 = vpack.c.bf16 %v3640_v39, %v3639_v32  ;;  %v3659_v48 = vld [vmem:[%s13205_s3 + $0x15c0] sm:$0xff]  ;;  %v3660_v50 = vld [vmem:[%s13205_s3 + $0x15c8] sm:$0xff]  ;;  %v3630_v35 = vld [vmem:[%s13205_s3 + $0x14d8] sm:$0xff]  ;;  %v2619_v39 = vadd.s32 5120, %v9974_v59 }
 0x21d   :  { %8429 = vmatprep.subr.bf16.mxu1 %v8428_v30  ;;  %v3657_v30 = vld [vmem:[%s13205_s3 + $0x15b0] sm:$0xff]  ;;  %v8444_v31 = vpack.c.bf16 %v3626_v52, %v3625_v58  ;;  %v8480_v18 = vpack.c.bf16 %v3660_v50, %v3659_v48  ;;  %v3644_v6 = vld [vmem:[%s13205_s3 + $0x1548] sm:$0xff]  ;;  %v3646_v57 = vld [vmem:[%s13205_s3 + $0x1558] sm:$0xff]  ;;  %v2626_v50 = vadd.s32 6016, %v9974_v59 }
 0x21e   :  { %v3661_v63 = vld [vmem:[%s13205_s3 + $0x15d0] sm:$0xff]  ;;  %v8482_v22 = vpack.c.bf16 %v3644_v6, %v3643_v5  ;;  %v3632_v42 = vld [vmem:[%s13205_s3 + $0x14e8] sm:$0xff]  ;;  %v3663_v62 = vld [vmem:[%s13205_s3 + $0x15e0] sm:$0xff]  ;;  %v2683_v5 = vand.u32 255, %v2619_v39 }
 0x21f   :  { %8399 = vmatpush3.bf16.msra.mxu0 %v8398_v23  ;;  %v8476_v23 = vpack.c.bf16 %v3658_v28, %v3657_v30  ;;  %v8484_v61 = vpack.c.bf16 %v3662_v4, %v3661_v63  ;;  %v3616_v32 = vld [vmem:[%s13205_s3 + $0x1468] sm:$0xff]  ;;  %v3717_v39 = vld [vmem:[%s13205_s3 + $0x1790] sm:$0xff] }
 0x220   :  { %8431 = vmatpush3.bf16.msra.mxu1 %v8430_v8  ;;  %8433 = vmatprep.subr.bf16.mxu0 %v8432_v19  ;;  %v3627_v8 = vld [vmem:[%s13205_s3 + $0x14c0] sm:$0xff]  ;;  %v3628_v19 = vld [vmem:[%s13205_s3 + $0x14c8] sm:$0xff]  ;;  %v8458_v48 = vpack.c.bf16 %v3616_v32, %v3615_v38  ;;  %v3686_v38 = vld [vmem:[%s13205_s3 + $0x1698] sm:$0xff] }
 0x221   :  { %8465 = vmatprep.subr.bf16.mxu1 %v8464_v9  ;;  %v8478_v9 = vpack.c.bf16 %v3642_v1, %v3641_v0  ;;  %v8448_v33 = vpack.c.bf16 %v3628_v19, %v3627_v8  ;;  %v3648_v28 = vld [vmem:[%s13205_s3 + $0x1568] sm:$0xff]  ;;  %v3665_v0 = vld [vmem:[%s13205_s3 + $0x15f0] sm:$0xff]  ;;  %v2624_v1 = vadd.s32 5760, %v9974_v59 }
 0x222   :  { %6388 = vmatmul.mubr.msk.f32.vlgmr.msra.gmra.mrb[50].mxu0 %vm2807_vm7, %v13218_v13  ;;  %v3684_v63 = vld [vmem:[%s13205_s3 + $0x1688] sm:$0xff] }
 0x223   :  { %6390 = vmatmul.mubr.msk.f32.vlgmr.msra.gmra.mrb[50].mxu1 %vm2809_vm8, %v13218_v13  ;;  %8435 = vmatpush3.bf16.msra.mxu0 %v8434_v36  ;;  %v3629_v36 = vld [vmem:[%s13205_s3 + $0x14d0] sm:$0xff] }
 0x224   :  { %6391 = vmatprep.mubr.msk.f32.mxu0 %vm2812_vm9, %v13218_v13  ;;  %8467 = vmatpush3.bf16.msra.mxu1 %v8466_v10  ;;  %v8450_v10 = vpack.c.bf16 %v3612_v45, %v3611_v26  ;;  %v8452_v3 = vpack.c.bf16 %v3630_v35, %v3629_v36  ;;  %v3618_v26 = vld [vmem:[%s13205_s3 + $0x1478] sm:$0xff]  ;;  %v3649_v45 = vld [vmem:[%s13205_s3 + $0x1570] sm:$0xff]  ;;  %v3683_v35 = vld [vmem:[%s13205_s3 + $0x1680] sm:$0xff] }
 0x225   :  { %6393 = vmatprep.mubr.msk.f32.mxu1 %vm2814_vm10, %v13218_v13  ;;  %8437 = vmatprep.subr.bf16.mxu0 %v8436_v11  ;;  %v3614_v11 = vld [vmem:[%s13205_s3 + $0x1458] sm:$0xff] }
 0x226   :  { %8469 = vmatprep.subr.bf16.mxu1 %v8468_v47  ;;  %v3631_v47 = vld [vmem:[%s13205_s3 + $0x14e0] sm:$0xff]  ;;  %v3650_v36 = vld [vmem:[%s13205_s3 + $0x1578] sm:$0xff] }
 0x227   :  { %8439 = vmatpush3.bf16.msra.mxu0 %v8438_v12  ;;  %v3664_v12 = vld [vmem:[%s13205_s3 + $0x15e8] sm:$0xff]  ;;  %v8456_v29 = vpack.c.bf16 %v3632_v42, %v3631_v47  ;;  %v2747_v42 = vcvt.s32.f32 %v2683_v5 }
 0x228   :  { %8471 = vmatpush3.bf16.msra.mxu1 %v8470_v43  ;;  %8441 = vmatprep.subr.bf16.mxu0 %v8440_v51  ;;  %v8454_v43 = vpack.c.bf16 %v3614_v11, %v3613_v56  ;;  %v8486_v51 = vpack.c.bf16 %v3646_v57, %v3645_v46  ;;  %v8488_v30 = vpack.c.bf16 %v3664_v12, %v3663_v62  ;;  %v2690_v11 = vand.u32 255, %v2626_v50  ;;  %v3667_v57 = vld [vmem:[%s13205_s3 + $0x1600] sm:$0xff]  ;;  %v3668_v47 = vld [vmem:[%s13205_s3 + $0x1608] sm:$0xff] }
 0x229   :  { %8473 = vmatprep.subr.bf16.mxu1 %v8472_v34  ;;  %v3647_v34 = vld [vmem:[%s13205_s3 + $0x1560] sm:$0xff]  ;;  %v8494_v46 = vpack.c.bf16 %v3650_v36, %v3649_v45  ;;  %vm2811_vm11 = vcmp.eq.f32.partialorder %v10601_v24, %v2747_v42  ;;  %v3672_v50 = vld [vmem:[%s13205_s3 + $0x1628] sm:$0xff]  ;;  %v3722_v45 = vld [vmem:[%s13205_s3 + $0x17b8] sm:$0xff] }
 0x22a   :  { %v3699_v12 = vld [vmem:[%s13205_s3 + $0x1700] sm:$0xff]  ;;  %v3673_v36 = vld [vmem:[%s13205_s3 + $0x1630] sm:$0xff]  ;;  %v3676_v42 = vld [vmem:[%s13205_s3 + $0x1648] sm:$0xff] }
 0x22b   :  { %8443 = vmatpush3.bf16.msra.mxu0 %v8442_v54  ;;  %v3633_v54 = vld [vmem:[%s13205_s3 + $0x14f0] sm:$0xff]  ;;  %v3719_v24 = vld [vmem:[%s13205_s3 + $0x17a0] sm:$0xff] }
 0x22c   :  { %8475 = vmatpush3.bf16.msra.mxu1 %v8474_v55  ;;  %8445 = vmatprep.subr.bf16.mxu0 %v8444_v31  ;;  %v3634_v55 = vld [vmem:[%s13205_s3 + $0x14f8] sm:$0xff]  ;;  %v2621_v31 = vadd.s32 5376, %v9974_v59 }
 0x22d   :  { %8477 = vmatprep.subr.bf16.mxu1 %v8476_v23  ;;  %v3666_v23 = vld [vmem:[%s13205_s3 + $0x15f8] sm:$0xff] }
 0x22e   :  { %v8492_v6 = vpack.c.bf16 %v3666_v23, %v3665_v0  ;;  %v2685_v4 = vand.u32 255, %v2621_v31  ;;  %v3688_v0 = vld [vmem:[%s13205_s3 + $0x16a8] sm:$0xff] }
 0x22f   :  { %8447 = vmatpush3.bf16.msra.mxu0 %v8446_v60  ;;  %v8490_v60 = vpack.c.bf16 %v3648_v28, %v3647_v34  ;;  %v8498_v34 = vpack.c.bf16 %v3668_v47, %v3667_v57  ;;  %v3669_v28 = vld [vmem:[%s13205_s3 + $0x1610] sm:$0xff]  ;;  %v3675_v47 = vld [vmem:[%s13205_s3 + $0x1640] sm:$0xff] }
 0x230   :  { %8479 = vmatpush3.bf16.msra.mxu1 %v8478_v9  ;;  %8449 = vmatprep.subr.bf16.mxu0 %v8448_v33  ;;  %v8460_v9 = vpack.c.bf16 %v3634_v55, %v3633_v54  ;;  %v3617_v33 = vld [vmem:[%s13205_s3 + $0x1470] sm:$0xff]  ;;  %v3670_v54 = vld [vmem:[%s13205_s3 + $0x1618] sm:$0xff] }
 0x231   :  { %8481 = vmatprep.subr.bf16.mxu1 %v8480_v18  ;;  %v8462_v56 = vpack.c.bf16 %v3618_v26, %v3617_v33  ;;  %v3701_v55 = vld [vmem:[%s13205_s3 + $0x1710] sm:$0xff]  ;;  %v3690_v33 = vld [vmem:[%s13205_s3 + $0x16b8] sm:$0xff] }
 0x232   :  { %v3721_v26 = vld [vmem:[%s13205_s3 + $0x17b0] sm:$0xff] }
 0x233   :  { %8451 = vmatpush3.bf16.msra.mxu0 %v8450_v10  ;;  %v3715_v10 = vld [vmem:[%s13205_s3 + $0x1780] sm:$0xff] }
 0x234   :  { %8483 = vmatpush3.bf16.msra.mxu1 %v8482_v22  ;;  %8453 = vmatprep.subr.bf16.mxu0 %v8452_v3  ;;  %v2688_v22 = vand.u32 255, %v2624_v1  ;;  %v3720_v1 = vld [vmem:[%s13205_s3 + $0x17a8] sm:$0xff] }
 0x235   :  { %v6658_v58 = vpop.f32.mrb[38].mxu0  ;;  %v6693_v52 = vpop.f32.mrb[38].mxu1  ;;  %8485 = vmatprep.subr.bf16.mxu1 %v8484_v61  ;;  %v8496_v61 = vpack.c.bf16 %v3684_v63, %v3683_v35  ;;  %v3674_v35 = vld [vmem:[%s13205_s3 + $0x1638] sm:$0xff]  ;;  %v3705_v63 = vld [vmem:[%s13205_s3 + $0x1730] sm:$0xff] }
 0x236   :  { %v6659_v53 = vpop.f32.mrb[39].mxu0  ;;  %v6694_v49 = vpop.f32.mrb[39].mxu1  ;;  %v2752_v32 = vcvt.s32.f32 %v2688_v22  ;;  %v3692_v22 = vld [vmem:[%s13205_s3 + $0x16c8] sm:$0xff] }
 0x237   :  { %v6660_v8 = vadd.f32 %v6659_v53, %v6658_v58  ;;  %v6695_v19 = vadd.f32 %v6694_v49, %v6693_v52  ;;  %8455 = vmatpush3.bf16.msra.mxu0 %v8454_v43  ;;  %v3700_v43 = vld [vmem:[%s13205_s3 + $0x1708] sm:$0xff]  ;;  %v3718_v58 = vld [vmem:[%s13205_s3 + $0x1798] sm:$0xff]  ;;  %v2754_v52 = vcvt.s32.f32 %v2690_v11  ;;  %v3687_v49 = vld [vmem:[%s13205_s3 + $0x16a0] sm:$0xff] }
 0x238   :  { %8487 = vmatpush3.bf16.msra.mxu1 %v8486_v51  ;;  %8457 = vmatprep.subr.bf16.mxu0 %v8456_v29  ;;  %v2749_v51 = vcvt.s32.f32 %v2685_v4  ;;  %v3685_v29 = vld [vmem:[%s13205_s3 + $0x1690] sm:$0xff]  ;;  %v3702_v53 = vld [vmem:[%s13205_s3 + $0x1718] sm:$0xff]  ;;  %v8532_v23 = vpack.c.bf16 %v3718_v58, %v3717_v39  ;;  %vm2816_vm13 = vcmp.eq.f32.partialorder %v10671_v17, %v2752_v32  ;;  %v3703_v17 = vld [vmem:[%s13205_s3 + $0x1720] sm:$0xff]  ;;  %v8540_v4 = vpack.c.bf16 %v3722_v45, %v3721_v26 }
 0x239   :  { %v4474_v18 = vadd.f32 %v6660_v8, %v11955_v2  ;;  %8489 = vmatprep.subr.bf16.mxu1 %v8488_v30  ;;  %v3716_v2 = vld [vmem:[%s13205_s3 + $0x1788] sm:$0xff]  ;;  %v8530_v30 = vpack.c.bf16 %v3700_v43, %v3699_v12  ;;  %v8500_v31 = vpack.c.bf16 %v3686_v38, %v3685_v29  ;;  %v8502_v8 = vpack.c.bf16 %v3670_v54, %v3669_v28  ;;  %v3694_v29 = vld [vmem:[%s13205_s3 + $0x16d8] sm:$0xff]  ;;  %v3725_v38 = vld [vmem:[%s13205_s3 + $0x17d0] sm:$0xff] }
 0x23a   :  { %v8528_v62 = vpack.c.bf16 %v3716_v2, %v3715_v10  ;;  %vm2813_vm12 = vcmp.eq.f32.partialorder %v10603_v25, %v2749_v51  ;;  %vm2818_vm14 = vcmp.eq.f32.partialorder %v10673_v27, %v2754_v52  ;;  %v8534_v25 = vpack.c.bf16 %v3702_v53, %v3701_v55  ;;  %v3706_v10 = vld [vmem:[%s13205_s3 + $0x1738] sm:$0xff]  ;;  %v3691_v2 = vld [vmem:[%s13205_s3 + $0x16c0] sm:$0xff]  ;;  %v3724_v11 = vld [vmem:[%s13205_s3 + $0x17c8] sm:$0xff] }
 0x23b   :  { %v12162_v3 = vadd.f32 %v6695_v19, %v4474_v18  ;;  %8459 = vmatpush3.bf16.msra.mxu0 %v8458_v48  ;;  %v8504_v19 = vpack.c.bf16 %v3688_v0, %v3687_v49  ;;  %v3671_v48 = vld [vmem:[%s13205_s3 + $0x1620] sm:$0xff]  ;;  %v8536_v27 = vpack.c.bf16 %v3720_v1, %v3719_v24  ;;  %v8512_v57 = vpack.c.bf16 %v3692_v22, %v3691_v2  ;;  %v3708_v43 = vld [vmem:[%s13205_s3 + $0x1748] sm:$0xff]  ;;  %v3693_v51 = vld [vmem:[%s13205_s3 + $0x16d0] sm:$0xff] }
 0x23c   :  { %8491 = vmatpush3.bf16.msra.mxu1 %v8490_v60  ;;  %8461 = vmatprep.subr.bf16.mxu0 %v8460_v9  ;;  %v3704_v60 = vld [vmem:[%s13205_s3 + $0x1728] sm:$0xff]  ;;  %v3689_v9 = vld [vmem:[%s13205_s3 + $0x16b0] sm:$0xff]  ;;  %v8506_v5 = vpack.c.bf16 %v3672_v50, %v3671_v48  ;;  %v3726_v32 = vld [vmem:[%s13205_s3 + $0x17d8] sm:$0xff]  ;;  %v8516_v58 = vpack.c.bf16 %v3694_v29, %v3693_v51  ;;  %v2623_v48 = vadd.s32 5632, %v9974_v59 }
 0x23d   :  { %8493 = vmatprep.subr.bf16.mxu1 %v8492_v6  ;;  %v8538_v18 = vpack.c.bf16 %v3704_v60, %v3703_v17  ;;  %v8508_v6 = vpack.c.bf16 %v3690_v33, %v3689_v9  ;;  %v3677_v52 = vld [vmem:[%s13205_s3 + $0x1650] sm:$0xff]  ;;  %v8548_v54 = vpack.c.bf16 %v3726_v32, %v3725_v38  ;;  %v3710_v55 = vld [vmem:[%s13205_s3 + $0x1758] sm:$0xff]  ;;  %v3696_v53 = vld [vmem:[%s13205_s3 + $0x16e8] sm:$0xff]  ;;  %v2625_v33 = vadd.s32 5888, %v9974_v59 }
 0x23e   :  { %v3709_v28 = vld [vmem:[%s13205_s3 + $0x1750] sm:$0xff]  ;;  %v3727_v49 = vld [vmem:[%s13205_s3 + $0x17e0] sm:$0xff]  ;;  %v3728_v0 = vld [vmem:[%s13205_s3 + $0x17e8] sm:$0xff] }
 0x23f   :  { %8463 = vmatpush3.bf16.msra.mxu0 %v8462_v56  ;;  %v3723_v56 = vld [vmem:[%s13205_s3 + $0x17c0] sm:$0xff]  ;;  %v8550_v24 = vpack.c.bf16 %v3710_v55, %v3709_v28  ;;  %v8552_v17 = vpack.c.bf16 %v3728_v0, %v3727_v49  ;;  %v3697_v60 = vld [vmem:[%s13205_s3 + $0x16f0] sm:$0xff]  ;;  %v3698_v9 = vld [vmem:[%s13205_s3 + $0x16f8] sm:$0xff] }
 0x240   :  { %8495 = vmatpush3.bf16.msra.mxu1 %v8494_v46  ;;  %8497 = vmatprep.subr.bf16.mxu0 %v8496_v61  ;;  %v8510_v46 = vpack.c.bf16 %v3674_v35, %v3673_v36  ;;  %v8542_v61 = vpack.c.bf16 %v3706_v10, %v3705_v63  ;;  %v8544_v12 = vpack.c.bf16 %v3724_v11, %v3723_v56  ;;  %v3681_v56 = vld [vmem:[%s13205_s3 + $0x1670] sm:$0xff]  ;;  %v3682_v11 = vld [vmem:[%s13205_s3 + $0x1678] sm:$0xff]  ;;  %v3779_v51 = vld [vmem:[%s13205_s3 + $0x1980] sm:$0xff] }
 0x241   :  { %8529 = vmatprep.subr.bf16.mxu1 %v8528_v62  ;;  %v3707_v62 = vld [vmem:[%s13205_s3 + $0x1740] sm:$0xff]  ;;  %v8524_v22 = vpack.c.bf16 %v3698_v9, %v3697_v60  ;;  %v8526_v32 = vpack.c.bf16 %v3682_v11, %v3681_v56  ;;  %v3749_v49 = vld [vmem:[%s13205_s3 + $0x1890] sm:$0xff]  ;;  %v3750_v0 = vld [vmem:[%s13205_s3 + $0x1898] sm:$0xff] }
 0x242   :  { %6392 = vmatmul.mubr.msk.f32.vlgmr.msra.gmra.mrb[52].mxu0 %vm2811_vm11, %v13218_v13  ;;  %v8546_v39 = vpack.c.bf16 %v3708_v43, %v3707_v62  ;;  %v3747_v62 = vld [vmem:[%s13205_s3 + $0x1880] sm:$0xff]  ;;  %v2689_v43 = vand.u32 255, %v2625_v33  ;;  %v3766_v60 = vld [vmem:[%s13205_s3 + $0x1918] sm:$0xff]  ;;  %v3752_v33 = vld [vmem:[%s13205_s3 + $0x18a8] sm:$0xff] }
 0x243   :  { %6394 = vmatmul.mubr.msk.f32.vlgmr.msra.gmra.mrb[52].mxu1 %vm2813_vm12, %v13218_v13  ;;  %8499 = vmatpush3.bf16.msra.mxu0 %v8498_v34  ;;  %v8514_v34 = vpack.c.bf16 %v3676_v42, %v3675_v47  ;;  %v3714_v42 = vld [vmem:[%s13205_s3 + $0x1778] sm:$0xff]  ;;  %v3763_v55 = vld [vmem:[%s13205_s3 + $0x1900] sm:$0xff] }
 0x244   :  { %6395 = vmatprep.mubr.msk.f32.mxu0 %vm2816_vm13, %v13218_v13  ;;  %8531 = vmatpush3.bf16.msra.mxu1 %v8530_v30  ;;  %v3678_v30 = vld [vmem:[%s13205_s3 + $0x1658] sm:$0xff]  ;;  %v3751_v9 = vld [vmem:[%s13205_s3 + $0x18a0] sm:$0xff] }
 0x245   :  { %6397 = vmatprep.mubr.msk.f32.mxu1 %vm2818_vm14, %v13218_v13  ;;  %8501 = vmatprep.subr.bf16.mxu0 %v8500_v31  ;;  %v3695_v31 = vld [vmem:[%s13205_s3 + $0x16e0] sm:$0xff] }
 0x246   :  { %8533 = vmatprep.subr.bf16.mxu1 %v8532_v23  ;;  %v8518_v23 = vpack.c.bf16 %v3678_v30, %v3677_v52  ;;  %v8520_v1 = vpack.c.bf16 %v3696_v53, %v3695_v31  ;;  %v3731_v52 = vld [vmem:[%s13205_s3 + $0x1800] sm:$0xff]  ;;  %v3732_v30 = vld [vmem:[%s13205_s3 + $0x1808] sm:$0xff]  ;;  %v2753_v53 = vcvt.s32.f32 %v2689_v43 }
 0x247   :  { %8503 = vmatpush3.bf16.msra.mxu0 %v8502_v8  ;;  %v3679_v8 = vld [vmem:[%s13205_s3 + $0x1660] sm:$0xff]  ;;  %v3764_v31 = vld [vmem:[%s13205_s3 + $0x1908] sm:$0xff] }
 0x248   :  { %8535 = vmatpush3.bf16.msra.mxu1 %v8534_v25  ;;  %8505 = vmatprep.subr.bf16.mxu0 %v8504_v19  ;;  %v3680_v25 = vld [vmem:[%s13205_s3 + $0x1668] sm:$0xff]  ;;  %v3711_v19 = vld [vmem:[%s13205_s3 + $0x1760] sm:$0xff]  ;;  %vm2817_vm0 = vcmp.eq.f32.partialorder %v10663_v15, %v2753_v53 }
 0x249   :  { %8537 = vmatprep.subr.bf16.mxu1 %v8536_v27  ;;  %v3712_v27 = vld [vmem:[%s13205_s3 + $0x1768] sm:$0xff]  ;;  %v8522_v63 = vpack.c.bf16 %v3680_v25, %v3679_v8  ;;  %v3782_v8 = vld [vmem:[%s13205_s3 + $0x1998] sm:$0xff]  ;;  %v3787_v43 = vld [vmem:[%s13205_s3 + $0x19c0] sm:$0xff] }
 0x24a   :  { %v8554_v2 = vpack.c.bf16 %v3712_v27, %v3711_v19  ;;  %v8594_v19 = vpack.c.bf16 %v3764_v31, %v3763_v55  ;;  %v8564_v27 = vpack.c.bf16 %v3750_v0, %v3749_v49  ;;  %v3789_v55 = vld [vmem:[%s13205_s3 + $0x19d0] sm:$0xff]  ;;  %v3790_v31 = vld [vmem:[%s13205_s3 + $0x19d8] sm:$0xff] }
 0x24b   :  { %8507 = vmatpush3.bf16.msra.mxu0 %v8506_v5  ;;  %v3729_v5 = vld [vmem:[%s13205_s3 + $0x17f0] sm:$0xff] }
 0x24c   :  { %8539 = vmatpush3.bf16.msra.mxu1 %v8538_v18  ;;  %8509 = vmatprep.subr.bf16.mxu0 %v8508_v6  ;;  %v3730_v18 = vld [vmem:[%s13205_s3 + $0x17f8] sm:$0xff]  ;;  %v2628_v6 = vadd.s32 6272, %v9974_v59 }
 0x24d   :  { %8541 = vmatprep.subr.bf16.mxu1 %v8540_v4  ;;  %v2630_v4 = vadd.s32 6528, %v9974_v59  ;;  %v8556_v47 = vpack.c.bf16 %v3730_v18, %v3729_v5  ;;  %v8568_v18 = vpack.c.bf16 %v3752_v33, %v3751_v9  ;;  %v3743_v33 = vld [vmem:[%s13205_s3 + $0x1860] sm:$0xff] }
 0x24e   :  { %v2692_v29 = vand.u32 255, %v2628_v6  ;;  %v3735_v6 = vld [vmem:[%s13205_s3 + $0x1820] sm:$0xff] }
 0x24f   :  { %8511 = vmatpush3.bf16.msra.mxu0 %v8510_v46  ;;  %v3713_v46 = vld [vmem:[%s13205_s3 + $0x1770] sm:$0xff] }
 0x250   :  { %8543 = vmatpush3.bf16.msra.mxu1 %v8542_v61  ;;  %8513 = vmatprep.subr.bf16.mxu0 %v8512_v57  ;;  %v2687_v61 = vand.u32 255, %v2623_v48  ;;  %v3733_v48 = vld [vmem:[%s13205_s3 + $0x1810] sm:$0xff] }
 0x251   :  { %8545 = vmatprep.subr.bf16.mxu1 %v8544_v12  ;;  %v3748_v12 = vld [vmem:[%s13205_s3 + $0x1888] sm:$0xff] }
 0x252   :  { %v2751_v28 = vcvt.s32.f32 %v2687_v61  ;;  %v3738_v61 = vld [vmem:[%s13205_s3 + $0x1838] sm:$0xff] }
 0x253   :  { %8515 = vmatpush3.bf16.msra.mxu0 %v8514_v34  ;;  %v2694_v34 = vand.u32 255, %v2630_v4  ;;  %v3754_v4 = vld [vmem:[%s13205_s3 + $0x18b8] sm:$0xff] }
 0x254   :  { %8547 = vmatpush3.bf16.msra.mxu1 %v8546_v39  ;;  %8517 = vmatprep.subr.bf16.mxu0 %v8516_v58  ;;  %v8558_v39 = vpack.c.bf16 %v3714_v42, %v3713_v46  ;;  %v8560_v58 = vpack.c.bf16 %v3748_v12, %v3747_v62  ;;  %vm2815_vm15 = vcmp.eq.f32.partialorder %v10661_v14, %v2751_v28  ;;  %v3783_v14 = vld [vmem:[%s13205_s3 + $0x19a0] sm:$0xff]  ;;  %v3737_v46 = vld [vmem:[%s13205_s3 + $0x1830] sm:$0xff]  ;;  %v3770_v42 = vld [vmem:[%s13205_s3 + $0x1938] sm:$0xff] }
 0x255   :  { %v6728_v50 = vpop.f32.mrb[40].mxu0  ;;  %8549 = vmatprep.subr.bf16.mxu1 %v8548_v54  ;;  %v2758_v25 = vcvt.s32.f32 %v2694_v34  ;;  %v3755_v62 = vld [vmem:[%s13205_s3 + $0x18c0] sm:$0xff]  ;;  %v3756_v12 = vld [vmem:[%s13205_s3 + $0x18c8] sm:$0xff]  ;;  %v3757_v28 = vld [vmem:[%s13205_s3 + $0x18d0] sm:$0xff] }
 0x256   :  { %v6763_v26 = vpop.f32.mrb[40].mxu1  ;;  %v6729_v45 = vpop.f32.mrb[41].mxu0  ;;  %v3739_v34 = vld [vmem:[%s13205_s3 + $0x1840] sm:$0xff] }
 0x257   :  { %v6730_v36 = vadd.f32 %v6729_v45, %v6728_v50  ;;  %v6764_v35 = vpop.f32.mrb[41].mxu1  ;;  %8519 = vmatpush3.bf16.msra.mxu0 %v8518_v23  ;;  %v2756_v23 = vcvt.s32.f32 %v2692_v29  ;;  %v3734_v50 = vld [vmem:[%s13205_s3 + $0x1818] sm:$0xff]  ;;  %v3784_v45 = vld [vmem:[%s13205_s3 + $0x19a8] sm:$0xff]  ;;  %vm2822_vm2 = vcmp.eq.f32.partialorder %v10723_v44, %v2758_v25 }
 0x258   :  { %v6765_v10 = vadd.f32 %v6764_v35, %v6763_v26  ;;  %8551 = vmatpush3.bf16.msra.mxu1 %v8550_v24  ;;  %8521 = vmatprep.subr.bf16.mxu0 %v8520_v1  ;;  %v8562_v24 = vpack.c.bf16 %v3732_v30, %v3731_v52  ;;  %v3781_v1 = vld [vmem:[%s13205_s3 + $0x1990] sm:$0xff]  ;;  %v8566_v5 = vpack.c.bf16 %v3734_v50, %v3733_v48  ;;  %v3768_v35 = vld [vmem:[%s13205_s3 + $0x1928] sm:$0xff]  ;;  %v3774_v25 = vld [vmem:[%s13205_s3 + $0x1958] sm:$0xff] }
 0x259   :  { %v4614_v57 = vadd.f32 %v6730_v36, %v12162_v3  ;;  %8553 = vmatprep.subr.bf16.mxu1 %v8552_v17  ;;  %v3780_v3 = vld [vmem:[%s13205_s3 + $0x1988] sm:$0xff]  ;;  %v3765_v17 = vld [vmem:[%s13205_s3 + $0x1910] sm:$0xff]  ;;  %v8596_v26 = vpack.c.bf16 %v3782_v8, %v3781_v1  ;;  %vm2820_vm1 = vcmp.eq.f32.partialorder %v10721_v41, %v2756_v23  ;;  %v3767_v41 = vld [vmem:[%s13205_s3 + $0x1920] sm:$0xff]  ;;  %v8600_v44 = vpack.c.bf16 %v3784_v45, %v3783_v14 }
 0x25a   :  { %v8592_v54 = vpack.c.bf16 %v3780_v3, %v3779_v51  ;;  %v8598_v15 = vpack.c.bf16 %v3766_v60, %v3765_v17  ;;  %v3736_v36 = vld [vmem:[%s13205_s3 + $0x1828] sm:$0xff]  ;;  %v8602_v56 = vpack.c.bf16 %v3768_v35, %v3767_v41  ;;  %v8574_v3 = vpack.c.bf16 %v3738_v61, %v3737_v46  ;;  %v3741_v23 = vld [vmem:[%s13205_s3 + $0x1850] sm:$0xff]  ;;  %v3791_v50 = vld [vmem:[%s13205_s3 + $0x19e0] sm:$0xff] }
 0x25b   :  { %v12369_v38 = vadd.f32 %v6765_v10, %v4614_v57  ;;  %8523 = vmatpush3.bf16.msra.mxu0 %v8522_v63  ;;  %v3753_v63 = vld [vmem:[%s13205_s3 + $0x18b0] sm:$0xff]  ;;  %v3788_v51 = vld [vmem:[%s13205_s3 + $0x19c8] sm:$0xff]  ;;  %v8612_v8 = vpack.c.bf16 %v3790_v31, %v3789_v55  ;;  %v3775_v14 = vld [vmem:[%s13205_s3 + $0x1960] sm:$0xff]  ;;  %v2627_v45 = vadd.s32 6144, %v9974_v59  ;;  %v2629_v41 = vadd.s32 6400, %v9974_v59 }
 0x25c   :  { %8555 = vmatpush3.bf16.msra.mxu1 %v8554_v2  ;;  %8525 = vmatprep.subr.bf16.mxu0 %v8524_v22  ;;  %v3785_v10 = vld [vmem:[%s13205_s3 + $0x19b0] sm:$0xff]  ;;  %v3786_v2 = vld [vmem:[%s13205_s3 + $0x19b8] sm:$0xff]  ;;  %v8570_v22 = vpack.c.bf16 %v3736_v36, %v3735_v6  ;;  %v8572_v11 = vpack.c.bf16 %v3754_v4, %v3753_v63  ;;  %v8608_v52 = vpack.c.bf16 %v3788_v51, %v3787_v43  ;;  %v3772_v30 = vld [vmem:[%s13205_s3 + $0x1948] sm:$0xff] }
 0x25d   :  { %8557 = vmatprep.subr.bf16.mxu1 %v8556_v47  ;;  %v3769_v57 = vld [vmem:[%s13205_s3 + $0x1930] sm:$0xff]  ;;  %v8604_v47 = vpack.c.bf16 %v3786_v2, %v3785_v10  ;;  %v3760_v48 = vld [vmem:[%s13205_s3 + $0x18e8] sm:$0xff]  ;;  %v3762_v36 = vld [vmem:[%s13205_s3 + $0x18f8] sm:$0xff]  ;;  %v2632_v10 = vadd.s32 6784, %v9974_v59 }
 0x25e   :  { %v8606_v29 = vpack.c.bf16 %v3770_v42, %v3769_v57  ;;  %v3773_v1 = vld [vmem:[%s13205_s3 + $0x1950] sm:$0xff]  ;;  %v3792_v17 = vld [vmem:[%s13205_s3 + $0x19e8] sm:$0xff]  ;;  %v3794_v4 = vld [vmem:[%s13205_s3 + $0x19f8] sm:$0xff] }
 0x25f   :  { %8527 = vmatpush3.bf16.msra.mxu0 %v8526_v32  ;;  %v8576_v32 = vpack.c.bf16 %v3756_v12, %v3755_v62  ;;  %v8614_v60 = vpack.c.bf16 %v3774_v25, %v3773_v1  ;;  %v3761_v6 = vld [vmem:[%s13205_s3 + $0x18f0] sm:$0xff]  ;;  %v3746_v42 = vld [vmem:[%s13205_s3 + $0x1878] sm:$0xff]  ;;  %v2691_v12 = vand.u32 255, %v2627_v45  ;;  %v3795_v31 = vld [vmem:[%s13205_s3 + $0x1a00] sm:$0xff] }
 0x260   :  { %8559 = vmatpush3.bf16.msra.mxu1 %v8558_v39  ;;  %8561 = vmatprep.subr.bf16.mxu0 %v8560_v58  ;;  %v3740_v39 = vld [vmem:[%s13205_s3 + $0x1848] sm:$0xff]  ;;  %v3771_v58 = vld [vmem:[%s13205_s3 + $0x1940] sm:$0xff]  ;;  %v3793_v63 = vld [vmem:[%s13205_s3 + $0x19f0] sm:$0xff]  ;;  %v8588_v57 = vpack.c.bf16 %v3762_v36, %v3761_v6 }
 0x261   :  { %8593 = vmatprep.subr.bf16.mxu1 %v8592_v54  ;;  %v3758_v54 = vld [vmem:[%s13205_s3 + $0x18d8] sm:$0xff]  ;;  %v8578_v53 = vpack.c.bf16 %v3740_v39, %v3739_v34  ;;  %v8610_v49 = vpack.c.bf16 %v3772_v30, %v3771_v58  ;;  %v3777_v62 = vld [vmem:[%s13205_s3 + $0x1970] sm:$0xff]  ;;  %v8620_v51 = vpack.c.bf16 %v3794_v4, %v3793_v63  ;;  %v2693_v34 = vand.u32 255, %v2629_v41  ;;  %v3843_v39 = vld [vmem:[%s13205_s3 + $0x1b80] sm:$0xff] }
 0x262   :  { %6396 = vmatmul.mubr.msk.f32.vlgmr.msra.gmra.mrb[54].mxu0 %vm2815_vm15, %v13218_v13  ;;  %v8580_v0 = vpack.c.bf16 %v3758_v54, %v3757_v28  ;;  %v2696_v58 = vand.u32 255, %v2632_v10  ;;  %v3814_v25 = vld [vmem:[%s13205_s3 + $0x1a98] sm:$0xff]  ;;  %v3848_v6 = vld [vmem:[%s13205_s3 + $0x1ba8] sm:$0xff]  ;;  %v3817_v4 = vld [vmem:[%s13205_s3 + $0x1ab0] sm:$0xff] }
 0x263   :  { %6398 = vmatmul.mubr.msk.f32.vlgmr.msra.gmra.mrb[54].mxu1 %vm2817_vm0, %v13218_v13  ;;  %8563 = vmatpush3.bf16.msra.mxu0 %v8562_v24  ;;  %v3742_v24 = vld [vmem:[%s13205_s3 + $0x1858] sm:$0xff]  ;;  %v2757_v1 = vcvt.s32.f32 %v2693_v34  ;;  %v3832_v63 = vld [vmem:[%s13205_s3 + $0x1b28] sm:$0xff] }
 0x264   :  { %6399 = vmatprep.mubr.msk.f32.mxu0 %vm2820_vm1, %v13218_v13  ;;  %8595 = vmatpush3.bf16.msra.mxu1 %v8594_v19  ;;  %v3759_v19 = vld [vmem:[%s13205_s3 + $0x18e0] sm:$0xff]  ;;  %v3830_v45 = vld [vmem:[%s13205_s3 + $0x1b18] sm:$0xff] }
 0x265   :  { %6401 = vmatprep.mubr.msk.f32.mxu1 %vm2822_vm2, %v13218_v13  ;;  %8565 = vmatprep.subr.bf16.mxu0 %v8564_v27  ;;  %v8582_v27 = vpack.c.bf16 %v3742_v24, %v3741_v23  ;;  %v8584_v9 = vpack.c.bf16 %v3760_v48, %v3759_v19  ;;  %v3827_v23 = vld [vmem:[%s13205_s3 + $0x1b00] sm:$0xff]  ;;  %v3828_v24 = vld [vmem:[%s13205_s3 + $0x1b08] sm:$0xff]  ;;  %v2760_v19 = vcvt.s32.f32 %v2696_v58  ;;  %vm2821_vm4 = vcmp.eq.f32.partialorder %v10719_v37, %v2757_v1  ;;  %v3818_v10 = vld [vmem:[%s13205_s3 + $0x1ab8] sm:$0xff] }
 0x266   :  { %8597 = vmatprep.subr.bf16.mxu1 %v8596_v26  ;;  %v3744_v26 = vld [vmem:[%s13205_s3 + $0x1868] sm:$0xff]  ;;  %v3835_v58 = vld [vmem:[%s13205_s3 + $0x1b40] sm:$0xff]  ;;  %v3806_v1 = vld [vmem:[%s13205_s3 + $0x1a58] sm:$0xff] }
 0x267   :  { %8567 = vmatpush3.bf16.msra.mxu0 %v8566_v5  ;;  %vm2824_vm5 = vcmp.eq.f32.partialorder %v10785_v16, %v2760_v19  ;;  %v3831_v16 = vld [vmem:[%s13205_s3 + $0x1b20] sm:$0xff]  ;;  %v3838_v19 = vld [vmem:[%s13205_s3 + $0x1b58] sm:$0xff] }
 0x268   :  { %8599 = vmatpush3.bf16.msra.mxu1 %v8598_v15  ;;  %8569 = vmatprep.subr.bf16.mxu0 %v8568_v18  ;;  %v8616_v15 = vpack.c.bf16 %v3792_v17, %v3791_v50  ;;  %v3776_v18 = vld [vmem:[%s13205_s3 + $0x1968] sm:$0xff]  ;;  %v3845_v50 = vld [vmem:[%s13205_s3 + $0x1b90] sm:$0xff]  ;;  %v3846_v17 = vld [vmem:[%s13205_s3 + $0x1b98] sm:$0xff] }
 0x269   :  { %8601 = vmatprep.subr.bf16.mxu1 %v8600_v44  ;;  %v8618_v61 = vpack.c.bf16 %v3776_v18, %v3775_v14  ;;  %v8660_v18 = vpack.c.bf16 %v3846_v17, %v3845_v50  ;;  %v3824_v50 = vld [vmem:[%s13205_s3 + $0x1ae8] sm:$0xff]  ;;  %v3855_v17 = vld [vmem:[%s13205_s3 + $0x1be0] sm:$0xff] }
 0x26b   :  { %8571 = vmatpush3.bf16.msra.mxu0 %v8570_v22 }
 0x26c   :  { %8603 = vmatpush3.bf16.msra.mxu1 %v8602_v56  ;;  %8573 = vmatprep.subr.bf16.mxu0 %v8572_v11  ;;  %v8586_v56 = vpack.c.bf16 %v3744_v26, %v3743_v33  ;;  %v2634_v11 = vadd.s32 7040, %v9974_v59  ;;  %v3798_v33 = vld [vmem:[%s13205_s3 + $0x1a18] sm:$0xff]  ;;  %v3829_v26 = vld [vmem:[%s13205_s3 + $0x1b10] sm:$0xff] }
 0x26d   :  { %8605 = vmatprep.subr.bf16.mxu1 %v8604_v47  ;;  %v3745_v47 = vld [vmem:[%s13205_s3 + $0x1870] sm:$0xff]  ;;  %v8662_v37 = vpack.c.bf16 %v3830_v45, %v3829_v26  ;;  %v3807_v26 = vld [vmem:[%s13205_s3 + $0x1a60] sm:$0xff] }
 0x26e   :  { %v8590_v30 = vpack.c.bf16 %v3746_v42, %v3745_v47  ;;  %v2698_v28 = vand.u32 255, %v2634_v11  ;;  %v8666_v11 = vpack.c.bf16 %v3832_v63, %v3831_v16  ;;  %v3833_v47 = vld [vmem:[%s13205_s3 + $0x1b30] sm:$0xff]  ;;  %v3839_v45 = vld [vmem:[%s13205_s3 + $0x1b60] sm:$0xff]  ;;  %v3858_v16 = vld [vmem:[%s13205_s3 + $0x1bf8] sm:$0xff] }
 0x26f   :  { %8575 = vmatpush3.bf16.msra.mxu0 %v8574_v3  ;;  %v3778_v3 = vld [vmem:[%s13205_s3 + $0x1978] sm:$0xff] }
 0x270   :  { %8607 = vmatpush3.bf16.msra.mxu1 %v8606_v29  ;;  %8577 = vmatprep.subr.bf16.mxu0 %v8576_v32  ;;  %v3811_v29 = vld [vmem:[%s13205_s3 + $0x1a80] sm:$0xff]  ;;  %v3812_v32 = vld [vmem:[%s13205_s3 + $0x1a88] sm:$0xff]  ;;  %v8622_v54 = vpack.c.bf16 %v3778_v3, %v3777_v62  ;;  %v3834_v62 = vld [vmem:[%s13205_s3 + $0x1b38] sm:$0xff] }
 0x271   :  { %8609 = vmatprep.subr.bf16.mxu1 %v8608_v52  ;;  %v8624_v55 = vpack.c.bf16 %v3812_v32, %v3811_v29  ;;  %v3852_v3 = vld [vmem:[%s13205_s3 + $0x1bc8] sm:$0xff]  ;;  %v8670_v32 = vpack.c.bf16 %v3834_v62, %v3833_v47 }
 0x273   :  { %8579 = vmatpush3.bf16.msra.mxu0 %v8578_v53  ;;  %v3796_v53 = vld [vmem:[%s13205_s3 + $0x1a08] sm:$0xff] }
 0x274   :  { %8611 = vmatpush3.bf16.msra.mxu1 %v8610_v49  ;;  %8581 = vmatprep.subr.bf16.mxu0 %v8580_v0  ;;  %v2755_v49 = vcvt.s32.f32 %v2691_v12  ;;  %v8626_v48 = vpack.c.bf16 %v3796_v53, %v3795_v31  ;;  %v3819_v12 = vld [vmem:[%s13205_s3 + $0x1ac0] sm:$0xff]  ;;  %v3853_v31 = vld [vmem:[%s13205_s3 + $0x1bd0] sm:$0xff]  ;;  %v3854_v53 = vld [vmem:[%s13205_s3 + $0x1bd8] sm:$0xff] }
 0x275   :  { %v6798_v5 = vpop.f32.mrb[42].mxu0  ;;  %8613 = vmatprep.subr.bf16.mxu1 %v8612_v8  ;;  %v3813_v8 = vld [vmem:[%s13205_s3 + $0x1a90] sm:$0xff] }
 0x276   :  { %v6833_v44 = vpop.f32.mrb[42].mxu1  ;;  %v6799_v35 = vpop.f32.mrb[43].mxu0  ;;  %vm2819_vm3 = vcmp.eq.f32.partialorder %v10717_v7, %v2755_v49  ;;  %v8628_v14 = vpack.c.bf16 %v3814_v25, %v3813_v8  ;;  %v3847_v7 = vld [vmem:[%s13205_s3 + $0x1ba0] sm:$0xff]  ;;  %v3837_v8 = vld [vmem:[%s13205_s3 + $0x1b50] sm:$0xff]  ;;  %v8676_v25 = vpack.c.bf16 %v3854_v53, %v3853_v31 }
 0x277   :  { %v6800_v2 = vadd.f32 %v6799_v35, %v6798_v5  ;;  %v6834_v22 = vpop.f32.mrb[43].mxu1  ;;  %8583 = vmatpush3.bf16.msra.mxu0 %v8582_v27  ;;  %v2762_v27 = vcvt.s32.f32 %v2698_v28  ;;  %v3815_v5 = vld [vmem:[%s13205_s3 + $0x1aa0] sm:$0xff]  ;;  %v3800_v35 = vld [vmem:[%s13205_s3 + $0x1a28] sm:$0xff] }
 0x278   :  { %v6835_v46 = vadd.f32 %v6834_v22, %v6833_v44  ;;  %8615 = vmatpush3.bf16.msra.mxu1 %v8614_v60  ;;  %8585 = vmatprep.subr.bf16.mxu0 %v8584_v9  ;;  %v8658_v60 = vpack.c.bf16 %v3828_v24, %v3827_v23  ;;  %v3797_v9 = vld [vmem:[%s13205_s3 + $0x1a10] sm:$0xff]  ;;  %v3799_v44 = vld [vmem:[%s13205_s3 + $0x1a20] sm:$0xff]  ;;  %v3850_v22 = vld [vmem:[%s13205_s3 + $0x1bb8] sm:$0xff] }
 0x279   :  { %v4754_v43 = vadd.f32 %v6800_v2, %v12369_v38  ;;  %8617 = vmatprep.subr.bf16.mxu1 %v8616_v15  ;;  %v3844_v38 = vld [vmem:[%s13205_s3 + $0x1b88] sm:$0xff]  ;;  %v8630_v36 = vpack.c.bf16 %v3798_v33, %v3797_v9  ;;  %vm2826_vm6 = vcmp.eq.f32.partialorder %v10787_v40, %v2762_v27  ;;  %v8664_v40 = vpack.c.bf16 %v3848_v6, %v3847_v7  ;;  %v3849_v2 = vld [vmem:[%s13205_s3 + $0x1bb0] sm:$0xff]  ;;  %v3891_v53 = vld [vmem:[%s13205_s3 + $0x1d00] sm:$0xff] }
 0x27a   :  { %v8656_v0 = vpack.c.bf16 %v3844_v38, %v3843_v39  ;;  %v3816_v15 = vld [vmem:[%s13205_s3 + $0x1aa8] sm:$0xff]  ;;  %v8668_v42 = vpack.c.bf16 %v3850_v22, %v3849_v2  ;;  %v3803_v39 = vld [vmem:[%s13205_s3 + $0x1a40] sm:$0xff]  ;;  %v3805_v24 = vld [vmem:[%s13205_s3 + $0x1a50] sm:$0xff]  ;;  %v8678_v9 = vpack.c.bf16 %v3838_v19, %v3837_v8  ;;  %v2638_v2 = vadd.s32 7552, %v9974_v59 }
 0x27b   :  { %v12576_v52 = vadd.f32 %v6835_v46, %v4754_v43  ;;  %8587 = vmatpush3.bf16.msra.mxu0 %v8586_v56  ;;  %v8632_v41 = vpack.c.bf16 %v3816_v15, %v3815_v5  ;;  %v8634_v56 = vpack.c.bf16 %v3800_v35, %v3799_v44  ;;  %v8636_v46 = vpack.c.bf16 %v3818_v10, %v3817_v4  ;;  %v3820_v43 = vld [vmem:[%s13205_s3 + $0x1ac8] sm:$0xff]  ;;  %v3825_v6 = vld [vmem:[%s13205_s3 + $0x1af0] sm:$0xff]  ;;  %v3910_v19 = vld [vmem:[%s13205_s3 + $0x1d98] sm:$0xff] }
 0x27c   :  { %8619 = vmatpush3.bf16.msra.mxu1 %v8618_v61  ;;  %8589 = vmatprep.subr.bf16.mxu0 %v8588_v57  ;;  %v3801_v61 = vld [vmem:[%s13205_s3 + $0x1a30] sm:$0xff]  ;;  %v3802_v57 = vld [vmem:[%s13205_s3 + $0x1a38] sm:$0xff]  ;;  %v8640_v34 = vpack.c.bf16 %v3820_v43, %v3819_v12  ;;  %v3804_v38 = vld [vmem:[%s13205_s3 + $0x1a48] sm:$0xff]  ;;  %v2631_v5 = vadd.s32 6656, %v9974_v59 }
 0x27d   :  { %8621 = vmatprep.subr.bf16.mxu1 %v8620_v51  ;;  %v3851_v51 = vld [vmem:[%s13205_s3 + $0x1bc0] sm:$0xff]  ;;  %v8638_v29 = vpack.c.bf16 %v3802_v57, %v3801_v61  ;;  %v3836_v28 = vld [vmem:[%s13205_s3 + $0x1b48] sm:$0xff]  ;;  %v8642_v49 = vpack.c.bf16 %v3804_v38, %v3803_v39  ;;  %v3857_v35 = vld [vmem:[%s13205_s3 + $0x1bf0] sm:$0xff]  ;;  %v2702_v38 = vand.u32 255, %v2638_v2 }
 0x27e   :  { %v3856_v27 = vld [vmem:[%s13205_s3 + $0x1be8] sm:$0xff]  ;;  %v3810_v61 = vld [vmem:[%s13205_s3 + $0x1a78] sm:$0xff]  ;;  %v3841_v57 = vld [vmem:[%s13205_s3 + $0x1b70] sm:$0xff]  ;;  %v2695_v47 = vand.u32 255, %v2631_v5  ;;  %v8684_v62 = vpack.c.bf16 %v3858_v16, %v3857_v35 }
 0x27f   :  { %8591 = vmatpush3.bf16.msra.mxu0 %v8590_v30  ;;  %v8672_v30 = vpack.c.bf16 %v3852_v3, %v3851_v51  ;;  %v3840_v7 = vld [vmem:[%s13205_s3 + $0x1b68] sm:$0xff]  ;;  %v3842_v12 = vld [vmem:[%s13205_s3 + $0x1b78] sm:$0xff]  ;;  %v3875_v43 = vld [vmem:[%s13205_s3 + $0x1c80] sm:$0xff] }
 0x280   :  { %8623 = vmatpush3.bf16.msra.mxu1 %v8622_v54  ;;  %8625 = vmatprep.subr.bf16.mxu0 %v8624_v55  ;;  %v3821_v54 = vld [vmem:[%s13205_s3 + $0x1ad0] sm:$0xff]  ;;  %v3822_v55 = vld [vmem:[%s13205_s3 + $0x1ad8] sm:$0xff]  ;;  %v3876_v51 = vld [vmem:[%s13205_s3 + $0x1c88] sm:$0xff] }
 0x281   :  { %8657 = vmatprep.subr.bf16.mxu1 %v8656_v0  ;;  %v8674_v0 = vpack.c.bf16 %v3836_v28, %v3835_v58  ;;  %v8644_v23 = vpack.c.bf16 %v3822_v55, %v3821_v54  ;;  %v8686_v58 = vpack.c.bf16 %v3842_v12, %v3841_v57  ;;  %v3859_v28 = vld [vmem:[%s13205_s3 + $0x1c00] sm:$0xff]  ;;  %v3860_v54 = vld [vmem:[%s13205_s3 + $0x1c08] sm:$0xff]  ;;  %v2759_v55 = vcvt.s32.f32 %v2695_v47  ;;  %v3881_v16 = vld [vmem:[%s13205_s3 + $0x1cb0] sm:$0xff] }
 0x282   :  { %6400 = vmatmul.mubr.msk.f32.vlgmr.msra.gmra.mrb[56].mxu0 %vm2819_vm3, %v13218_v13  ;;  %v8690_v8 = vpack.c.bf16 %v3860_v54, %v3859_v28  ;;  %v3912_v5 = vld [vmem:[%s13205_s3 + $0x1da8] sm:$0xff]  ;;  %v3898_v57 = vld [vmem:[%s13205_s3 + $0x1d38] sm:$0xff]  ;;  %v3883_v47 = vld [vmem:[%s13205_s3 + $0x1cc0] sm:$0xff] }
 0x283   :  { %6402 = vmatmul.mubr.msk.f32.vlgmr.msra.gmra.mrb[56].mxu1 %vm2821_vm4, %v13218_v13  ;;  %8627 = vmatpush3.bf16.msra.mxu0 %v8626_v48  ;;  %v3823_v48 = vld [vmem:[%s13205_s3 + $0x1ae0] sm:$0xff]  ;;  %vm2823_vm7 = vcmp.eq.f32.partialorder %v10781_v20, %v2759_v55  ;;  %v3896_v35 = vld [vmem:[%s13205_s3 + $0x1d28] sm:$0xff]  ;;  %v3917_v28 = vld [vmem:[%s13205_s3 + $0x1dd0] sm:$0xff] }
 0x284   :  { %6403 = vmatprep.mubr.msk.f32.mxu0 %vm2824_vm5, %v13218_v13  ;;  %8659 = vmatpush3.bf16.msra.mxu1 %v8658_v60  ;;  %v8646_v60 = vpack.c.bf16 %v3806_v1, %v3805_v24  ;;  %v8648_v33 = vpack.c.bf16 %v3824_v50, %v3823_v48  ;;  %v3878_v24 = vld [vmem:[%s13205_s3 + $0x1c98] sm:$0xff]  ;;  %v2766_v48 = vcvt.s32.f32 %v2702_v38  ;;  %v3911_v20 = vld [vmem:[%s13205_s3 + $0x1da0] sm:$0xff]  ;;  %v3916_v12 = vld [vmem:[%s13205_s3 + $0x1dc8] sm:$0xff] }
 0x285   :  { %6405 = vmatprep.mubr.msk.f32.mxu1 %vm2826_vm6, %v13218_v13  ;;  %8629 = vmatprep.subr.bf16.mxu0 %v8628_v14  ;;  %v3808_v14 = vld [vmem:[%s13205_s3 + $0x1a68] sm:$0xff]  ;;  %v3918_v54 = vld [vmem:[%s13205_s3 + $0x1dd8] sm:$0xff] }
 0x286   :  { %8661 = vmatprep.subr.bf16.mxu1 %v8660_v18  ;;  %v8680_v18 = vpack.c.bf16 %v3856_v27, %v3855_v17  ;;  %v8650_v10 = vpack.c.bf16 %v3808_v14, %v3807_v26  ;;  %v3861_v17 = vld [vmem:[%s13205_s3 + $0x1c10] sm:$0xff]  ;;  %v3862_v27 = vld [vmem:[%s13205_s3 + $0x1c18] sm:$0xff]  ;;  %v3879_v26 = vld [vmem:[%s13205_s3 + $0x1ca0] sm:$0xff] }
 0x287   :  { %8631 = vmatpush3.bf16.msra.mxu0 %v8630_v36  ;;  %v3826_v36 = vld [vmem:[%s13205_s3 + $0x1af8] sm:$0xff]  ;;  %v3880_v14 = vld [vmem:[%s13205_s3 + $0x1ca8] sm:$0xff] }
 0x288   :  { %8663 = vmatpush3.bf16.msra.mxu1 %v8662_v37  ;;  %8633 = vmatprep.subr.bf16.mxu0 %v8632_v41  ;;  %v2633_v37 = vadd.s32 6912, %v9974_v59  ;;  %v3900_v38 = vld [vmem:[%s13205_s3 + $0x1d48] sm:$0xff] }
 0x289   :  { %8665 = vmatprep.subr.bf16.mxu1 %v8664_v40  ;;  %v2636_v40 = vadd.s32 7296, %v9974_v59 }
 0x28a   :  { %v2697_v3 = vand.u32 255, %v2633_v37  ;;  %v3864_v37 = vld [vmem:[%s13205_s3 + $0x1c28] sm:$0xff] }
 0x28b   :  { %8635 = vmatpush3.bf16.msra.mxu0 %v8634_v56  ;;  %v8682_v56 = vpack.c.bf16 %v3840_v7, %v3839_v45  ;;  %v13220_v7 = vld [vmem:[#allocation11_spill] sm:$0xff] }
 0x28c   :  { %8667 = vmatpush3.bf16.msra.mxu1 %v8666_v11  ;;  %8637 = vmatprep.subr.bf16.mxu0 %v8636_v46  ;;  %v8652_v11 = vpack.c.bf16 %v3826_v36, %v3825_v6  ;;  %v3809_v46 = vld [vmem:[%s13205_s3 + $0x1a70] sm:$0xff]  ;;  %vm2830_vm10 = vcmp.eq.f32.partialorder %v13220_v7, %v2766_v48  ;;  %v8696_v6 = vpack.c.bf16 %v3880_v14, %v3879_v26  ;;  %v3863_v36 = vld [vmem:[%s13205_s3 + $0x1c20] sm:$0xff]  ;;  %v3920_v48 = vld [vmem:[%s13205_s3 + $0x1de8] sm:$0xff]  ;;  %v2635_v26 = vadd.s32 7168, %v9974_v59 }
 0x28d   :  { %8669 = vmatprep.subr.bf16.mxu1 %v8668_v42  ;;  %v8654_v39 = vpack.c.bf16 %v3810_v61, %v3809_v46  ;;  %v3897_v46 = vld [vmem:[%s13205_s3 + $0x1d30] sm:$0xff] }
 0x28f   :  { %8639 = vmatpush3.bf16.msra.mxu0 %v8638_v29  ;;  %v3907_v29 = vld [vmem:[%s13205_s3 + $0x1d80] sm:$0xff] }
 0x290   :  { %8671 = vmatpush3.bf16.msra.mxu1 %v8670_v32  ;;  %8641 = vmatprep.subr.bf16.mxu0 %v8640_v34  ;;  %v2700_v32 = vand.u32 255, %v2636_v40  ;;  %v3882_v40 = vld [vmem:[%s13205_s3 + $0x1cb8] sm:$0xff] }
 0x291   :  { %8673 = vmatprep.subr.bf16.mxu1 %v8672_v30  ;;  %v8688_v30 = vpack.c.bf16 %v3876_v51, %v3875_v43  ;;  %v8734_v51 = vpack.c.bf16 %v3898_v57, %v3897_v46  ;;  %v3939_v57 = vld [vmem:[%s13205_s3 + $0x1e80] sm:$0xff] }
 0x292   :  { %v2764_v1 = vcvt.s32.f32 %v2700_v32  ;;  %v3899_v32 = vld [vmem:[%s13205_s3 + $0x1d40] sm:$0xff] }
 0x293   :  { %8643 = vmatpush3.bf16.msra.mxu0 %v8642_v49  ;;  %v3892_v49 = vld [vmem:[%s13205_s3 + $0x1d08] sm:$0xff] }
 0x294   :  { %8675 = vmatpush3.bf16.msra.mxu1 %v8674_v0  ;;  %8645 = vmatprep.subr.bf16.mxu0 %v8644_v23  ;;  %v2761_v0 = vcvt.s32.f32 %v2697_v3  ;;  %v3877_v23 = vld [vmem:[%s13205_s3 + $0x1c90] sm:$0xff]  ;;  %v8722_v50 = vpack.c.bf16 %v3892_v49, %v3891_v53 }
 0x295   :  { %v6868_v15 = vpop.f32.mrb[44].mxu0  ;;  %8677 = vmatprep.subr.bf16.mxu1 %v8676_v25  ;;  %v3909_v25 = vld [vmem:[%s13205_s3 + $0x1d90] sm:$0xff] }
 0x296   :  { %v6903_v41 = vpop.f32.mrb[44].mxu1  ;;  %v6869_v44 = vpop.f32.mrb[45].mxu0  ;;  %vm2825_vm8 = vcmp.eq.f32.partialorder %v10783_v21, %v2761_v0  ;;  %v8724_v45 = vpack.c.bf16 %v3910_v19, %v3909_v25  ;;  %v3869_v49 = vld [vmem:[%s13205_s3 + $0x1c50] sm:$0xff]  ;;  %v3870_v0 = vld [vmem:[%s13205_s3 + $0x1c58] sm:$0xff]  ;;  %v3888_v25 = vld [vmem:[%s13205_s3 + $0x1ce8] sm:$0xff] }
 0x297   :  { %v6870_v63 = vadd.f32 %v6869_v44, %v6868_v15  ;;  %v6904_v4 = vpop.f32.mrb[45].mxu1  ;;  %8647 = vmatpush3.bf16.msra.mxu0 %v8646_v60  ;;  %v3893_v60 = vld [vmem:[%s13205_s3 + $0x1d10] sm:$0xff]  ;;  %v13219_v15 = vld [vmem:[#allocation10_spill] sm:$0xff]  ;;  %v8728_v44 = vpack.c.bf16 %v3912_v5, %v3911_v20  ;;  %v3919_v19 = vld [vmem:[%s13205_s3 + $0x1de0] sm:$0xff] }
 0x298   :  { %v6905_v22 = vadd.f32 %v6904_v4, %v6903_v41  ;;  %8679 = vmatpush3.bf16.msra.mxu1 %v8678_v9  ;;  %8649 = vmatprep.subr.bf16.mxu0 %v8648_v33  ;;  %v8692_v9 = vpack.c.bf16 %v3878_v24, %v3877_v23  ;;  %v3894_v33 = vld [vmem:[%s13205_s3 + $0x1d18] sm:$0xff]  ;;  %vm2828_vm9 = vcmp.eq.f32.partialorder %v13219_v15, %v2764_v1  ;;  %v3895_v41 = vld [vmem:[%s13205_s3 + $0x1d20] sm:$0xff]  ;;  %v3901_v23 = vld [vmem:[%s13205_s3 + $0x1d50] sm:$0xff] }
 0x299   :  { %v4894_v42 = vadd.f32 %v6870_v63, %v12576_v52  ;;  %8681 = vmatprep.subr.bf16.mxu1 %v8680_v18  ;;  %v3908_v52 = vld [vmem:[%s13205_s3 + $0x1d88] sm:$0xff]  ;;  %v8694_v18 = vpack.c.bf16 %v3862_v27, %v3861_v17  ;;  %v8726_v21 = vpack.c.bf16 %v3894_v33, %v3893_v60  ;;  %v3913_v63 = vld [vmem:[%s13205_s3 + $0x1db0] sm:$0xff]  ;;  %v3914_v4 = vld [vmem:[%s13205_s3 + $0x1db8] sm:$0xff]  ;;  %v8730_v2 = vpack.c.bf16 %v3896_v35, %v3895_v41 }
 0x29a   :  { %v8720_v31 = vpack.c.bf16 %v3908_v52, %v3907_v29  ;;  %v8732_v61 = vpack.c.bf16 %v3914_v4, %v3913_v63  ;;  %v3867_v29 = vld [vmem:[%s13205_s3 + $0x1c40] sm:$0xff]  ;;  %v3868_v52 = vld [vmem:[%s13205_s3 + $0x1c48] sm:$0xff]  ;;  %v8740_v24 = vpack.c.bf16 %v3918_v54, %v3917_v28  ;;  %v3902_v1 = vld [vmem:[%s13205_s3 + $0x1d58] sm:$0xff] }
 0x29b   :  { %v12783_v34 = vadd.f32 %v6905_v22, %v4894_v42  ;;  %8651 = vmatpush3.bf16.msra.mxu0 %v8650_v10  ;;  %v8698_v10 = vpack.c.bf16 %v3864_v37, %v3863_v36  ;;  %v8700_v22 = vpack.c.bf16 %v3882_v40, %v3881_v16  ;;  %v3884_v42 = vld [vmem:[%s13205_s3 + $0x1cc8] sm:$0xff]  ;;  %v8706_v55 = vpack.c.bf16 %v3868_v52, %v3867_v29  ;;  %v3871_v60 = vld [vmem:[%s13205_s3 + $0x1c60] sm:$0xff]  ;;  %v3889_v5 = vld [vmem:[%s13205_s3 + $0x1cf0] sm:$0xff] }
 0x29c   :  { %8683 = vmatpush3.bf16.msra.mxu1 %v8682_v56  ;;  %8653 = vmatprep.subr.bf16.mxu0 %v8652_v11  ;;  %v3865_v56 = vld [vmem:[%s13205_s3 + $0x1c30] sm:$0xff]  ;;  %v3866_v11 = vld [vmem:[%s13205_s3 + $0x1c38] sm:$0xff]  ;;  %v8704_v3 = vpack.c.bf16 %v3884_v42, %v3883_v47  ;;  %v8742_v17 = vpack.c.bf16 %v3902_v1, %v3901_v23  ;;  %v3903_v33 = vld [vmem:[%s13205_s3 + $0x1d60] sm:$0xff]  ;;  %v2640_v37 = vadd.s32 7808, %v9974_v59  ;;  %v2642_v16 = vadd.s32 8064, %v9974_v59 }
 0x29d   :  { %8685 = vmatprep.subr.bf16.mxu1 %v8684_v62  ;;  %v3915_v62 = vld [vmem:[%s13205_s3 + $0x1dc0] sm:$0xff]  ;;  %v8702_v43 = vpack.c.bf16 %v3866_v11, %v3865_v56  ;;  %v3904_v20 = vld [vmem:[%s13205_s3 + $0x1d68] sm:$0xff]  ;;  %v3890_v15 = vld [vmem:[%s13205_s3 + $0x1cf8] sm:$0xff]  ;;  %v2699_v56 = vand.u32 255, %v2635_v26 }
 0x29e   :  { %v3922_v36 = vld [vmem:[%s13205_s3 + $0x1df8] sm:$0xff]  ;;  %v8746_v63 = vpack.c.bf16 %v3904_v20, %v3903_v33  ;;  %v8716_v4 = vpack.c.bf16 %v3890_v15, %v3889_v5  ;;  %v3940_v47 = vld [vmem:[%s13205_s3 + $0x1e88] sm:$0xff]  ;;  %v3975_v26 = vld [vmem:[%s13205_s3 + $0x1fa0] sm:$0xff] }
 0x29f   :  { %8655 = vmatpush3.bf16.msra.mxu0 %v8654_v39  ;;  %v8736_v39 = vpack.c.bf16 %v3916_v12, %v3915_v62  ;;  %v3971_v62 = vld [vmem:[%s13205_s3 + $0x1f80] sm:$0xff]  ;;  %v2704_v12 = vand.u32 255, %v2640_v37  ;;  %v8752_v52 = vpack.c.bf16 %v3940_v47, %v3939_v57  ;;  %v3956_v28 = vld [vmem:[%s13205_s3 + $0x1f08] sm:$0xff]  ;;  %v3974_v23 = vld [vmem:[%s13205_s3 + $0x1f98] sm:$0xff] }
 0x2a0   :  { %8687 = vmatpush3.bf16.msra.mxu1 %v8686_v58  ;;  %8689 = vmatprep.subr.bf16.mxu0 %v8688_v30  ;;  %v3885_v58 = vld [vmem:[%s13205_s3 + $0x1cd0] sm:$0xff]  ;;  %v3886_v30 = vld [vmem:[%s13205_s3 + $0x1cd8] sm:$0xff]  ;;  %v13224_v5 = vld [vmem:[#allocation15_spill] sm:$0xff] }
 0x2a1   :  { %8721 = vmatprep.subr.bf16.mxu1 %v8720_v31  ;;  %v8738_v31 = vpack.c.bf16 %v3900_v38, %v3899_v32  ;;  %v8708_v53 = vpack.c.bf16 %v3886_v30, %v3885_v58  ;;  %v3923_v32 = vld [vmem:[%s13205_s3 + $0x1e00] sm:$0xff]  ;;  %v2763_v38 = vcvt.s32.f32 %v2699_v56  ;;  %v3960_v37 = vld [vmem:[%s13205_s3 + $0x1f28] sm:$0xff] }
 0x2a2   :  { %6404 = vmatmul.mubr.msk.f32.vlgmr.msra.gmra.mrb[58].mxu0 %vm2823_vm7, %v13218_v13  ;;  %v3955_v30 = vld [vmem:[%s13205_s3 + $0x1f00] sm:$0xff]  ;;  %v3980_v47 = vld [vmem:[%s13205_s3 + $0x1fc8] sm:$0xff] }
 0x2a3   :  { %6406 = vmatmul.mubr.msk.f32.vlgmr.msra.gmra.mrb[58].mxu1 %vm2825_vm8, %v13218_v13  ;;  %8691 = vmatpush3.bf16.msra.mxu0 %v8690_v8  ;;  %v3887_v8 = vld [vmem:[%s13205_s3 + $0x1ce0] sm:$0xff]  ;;  %v8786_v1 = vpack.c.bf16 %v3956_v28, %v3955_v30 }
 0x2a4   :  { %6407 = vmatprep.mubr.msk.f32.mxu0 %vm2828_vm9, %v13218_v13  ;;  %8723 = vmatpush3.bf16.msra.mxu1 %v8722_v50  ;;  %v8710_v50 = vpack.c.bf16 %v3870_v0, %v3869_v49  ;;  %v8712_v27 = vpack.c.bf16 %v3888_v25, %v3887_v8  ;;  %v3973_v0 = vld [vmem:[%s13205_s3 + $0x1f90] sm:$0xff]  ;;  %v3926_v25 = vld [vmem:[%s13205_s3 + $0x1e18] sm:$0xff]  ;;  %v3979_v57 = vld [vmem:[%s13205_s3 + $0x1fc0] sm:$0xff] }
 0x2a5   :  { %6409 = vmatprep.mubr.msk.f32.mxu1 %vm2830_vm10, %v13218_v13  ;;  %8693 = vmatprep.subr.bf16.mxu0 %v8692_v9  ;;  %v3872_v9 = vld [vmem:[%s13205_s3 + $0x1c68] sm:$0xff]  ;;  %v3925_v8 = vld [vmem:[%s13205_s3 + $0x1e10] sm:$0xff]  ;;  %v8788_v33 = vpack.c.bf16 %v3974_v23, %v3973_v0  ;;  %v3966_v0 = vld [vmem:[%s13205_s3 + $0x1f58] sm:$0xff] }
 0x2a6   :  { %8725 = vmatprep.subr.bf16.mxu1 %v8724_v45  ;;  %v8744_v45 = vpack.c.bf16 %v3920_v48, %v3919_v19  ;;  %v8714_v35 = vpack.c.bf16 %v3872_v9, %v3871_v60  ;;  %v3957_v19 = vld [vmem:[%s13205_s3 + $0x1f10] sm:$0xff]  ;;  %v13221_v48 = vld [vmem:[#allocation8_spill] sm:$0xff]  ;;  %v8758_v20 = vpack.c.bf16 %v3926_v25, %v3925_v8  ;;  %v3951_v23 = vld [vmem:[%s13205_s3 + $0x1ee0] sm:$0xff] }
 0x2a7   :  { %8695 = vmatpush3.bf16.msra.mxu0 %v8694_v18  ;;  %v2637_v18 = vadd.s32 7424, %v9974_v59  ;;  %vm2827_vm11 = vcmp.eq.f32.partialorder %v13221_v48, %v2763_v38  ;;  %v3944_v60 = vld [vmem:[%s13205_s3 + $0x1ea8] sm:$0xff]  ;;  %v13222_v9 = vld [vmem:[#allocation9_spill] sm:$0xff] }
 0x2a8   :  { %8727 = vmatpush3.bf16.msra.mxu1 %v8726_v21  ;;  %8697 = vmatprep.subr.bf16.mxu0 %v8696_v6  ;;  %v3921_v6 = vld [vmem:[%s13205_s3 + $0x1df0] sm:$0xff]  ;;  %v3984_v8 = vld [vmem:[%s13205_s3 + $0x1fe8] sm:$0xff] }
 0x2a9   :  { %8729 = vmatprep.subr.bf16.mxu1 %v8728_v44  ;;  %v8748_v46 = vpack.c.bf16 %v3922_v36, %v3921_v6  ;;  %v2701_v42 = vand.u32 255, %v2637_v18  ;;  %v3959_v6 = vld [vmem:[%s13205_s3 + $0x1f20] sm:$0xff]  ;;  %v3981_v38 = vld [vmem:[%s13205_s3 + $0x1fd0] sm:$0xff] }
 0x2ab   :  { %8699 = vmatpush3.bf16.msra.mxu0 %v8698_v10  ;;  %v3873_v10 = vld [vmem:[%s13205_s3 + $0x1c70] sm:$0xff]  ;;  %v2765_v54 = vcvt.s32.f32 %v2701_v42 }
 0x2ac   :  { %8731 = vmatpush3.bf16.msra.mxu1 %v8730_v2  ;;  %8701 = vmatprep.subr.bf16.mxu0 %v8700_v22  ;;  %v3874_v2 = vld [vmem:[%s13205_s3 + $0x1c78] sm:$0xff]  ;;  %v3905_v22 = vld [vmem:[%s13205_s3 + $0x1d70] sm:$0xff] }
 0x2ad   :  { %8733 = vmatprep.subr.bf16.mxu1 %v8732_v61  ;;  %v3906_v61 = vld [vmem:[%s13205_s3 + $0x1d78] sm:$0xff]  ;;  %vm2829_vm12 = vcmp.eq.f32.partialorder %v13222_v9, %v2765_v54 }
 0x2ae   :  { %v8750_v29 = vpack.c.bf16 %v3906_v61, %v3905_v22  ;;  %v3961_v22 = vld [vmem:[%s13205_s3 + $0x1f30] sm:$0xff]  ;;  %v3948_v61 = vld [vmem:[%s13205_s3 + $0x1ec8] sm:$0xff] }
 0x2af   :  { %8703 = vmatpush3.bf16.msra.mxu0 %v8702_v43 }
 0x2b0   :  { %8735 = vmatpush3.bf16.msra.mxu1 %v8734_v51  ;;  %8705 = vmatprep.subr.bf16.mxu0 %v8704_v3  ;;  %v8718_v51 = vpack.c.bf16 %v3874_v2, %v3873_v10  ;;  %v2706_v3 = vand.u32 255, %v2642_v16  ;;  %v3978_v16 = vld [vmem:[%s13205_s3 + $0x1fb8] sm:$0xff]  ;;  %v3929_v10 = vld [vmem:[%s13205_s3 + $0x1e30] sm:$0xff] }
 0x2b1   :  { %8737 = vmatprep.subr.bf16.mxu1 %v8736_v39  ;;  %v3924_v39 = vld [vmem:[%s13205_s3 + $0x1e08] sm:$0xff]  ;;  %v3930_v2 = vld [vmem:[%s13205_s3 + $0x1e38] sm:$0xff] }
 0x2b2   :  { %v8754_v49 = vpack.c.bf16 %v3924_v39, %v3923_v32  ;;  %v8766_v42 = vpack.c.bf16 %v3930_v2, %v3929_v10  ;;  %v3949_v32 = vld [vmem:[%s13205_s3 + $0x1ed0] sm:$0xff]  ;;  %v3950_v39 = vld [vmem:[%s13205_s3 + $0x1ed8] sm:$0xff] }
 0x2b3   :  { %8707 = vmatpush3.bf16.msra.mxu0 %v8706_v55  ;;  %v3941_v55 = vld [vmem:[%s13205_s3 + $0x1e90] sm:$0xff]  ;;  %v8772_v54 = vpack.c.bf16 %v3950_v39, %v3949_v32  ;;  %v3970_v10 = vld [vmem:[%s13205_s3 + $0x1f78] sm:$0xff] }
 0x2b4   :  { %8739 = vmatpush3.bf16.msra.mxu1 %v8738_v31  ;;  %8709 = vmatprep.subr.bf16.mxu0 %v8708_v53  ;;  %v3942_v31 = vld [vmem:[%s13205_s3 + $0x1e98] sm:$0xff]  ;;  %v2768_v53 = vcvt.s32.f32 %v2704_v12  ;;  %v3931_v12 = vld [vmem:[%s13205_s3 + $0x1e40] sm:$0xff] }
 0x2b5   :  { %v6938_v14 = vpop.f32.mrb[46].mxu0  ;;  %8741 = vmatprep.subr.bf16.mxu1 %v8740_v24  ;;  %v2770_v24 = vcvt.s32.f32 %v2706_v3  ;;  %v3963_v3 = vld [vmem:[%s13205_s3 + $0x1f40] sm:$0xff] }
 0x2b6   :  { %v6973_v7 = vpop.f32.mrb[46].mxu1  ;;  %v6939_v21 = vpop.f32.mrb[47].mxu0 }
 0x2b7   :  { %v6940_v41 = vadd.f32 %v6939_v21, %v6938_v14  ;;  %v6974_v44 = vpop.f32.mrb[47].mxu1  ;;  %8711 = vmatpush3.bf16.msra.mxu0 %v8710_v50  ;;  %v8756_v50 = vpack.c.bf16 %v3942_v31, %v3941_v55  ;;  %v3976_v14 = vld [vmem:[%s13205_s3 + $0x1fa8] sm:$0xff]  ;;  %vm2834_vm14 = vcmp.eq.f32.partialorder %v13224_v5, %v2770_v24  ;;  %v3933_v55 = vld [vmem:[%s13205_s3 + $0x1e50] sm:$0xff]  ;;  %v3934_v31 = vld [vmem:[%s13205_s3 + $0x1e58] sm:$0xff] }
 0x2b8   :  { %v6975_v40 = vadd.f32 %v6974_v44, %v6973_v7  ;;  %8743 = vmatpush3.bf16.msra.mxu1 %v8742_v17  ;;  %8713 = vmatprep.subr.bf16.mxu0 %v8712_v27  ;;  %v3958_v17 = vld [vmem:[%s13205_s3 + $0x1f18] sm:$0xff]  ;;  %v3943_v27 = vld [vmem:[%s13205_s3 + $0x1ea0] sm:$0xff]  ;;  %v3928_v21 = vld [vmem:[%s13205_s3 + $0x1e28] sm:$0xff]  ;;  %v8792_v36 = vpack.c.bf16 %v3976_v14, %v3975_v26  ;;  %v8774_v25 = vpack.c.bf16 %v3934_v31, %v3933_v55 }
 0x2b9   :  { %v5034_v11 = vadd.f32 %v6940_v41, %v12783_v34  ;;  %8745 = vmatprep.subr.bf16.mxu1 %v8744_v45  ;;  %v3972_v34 = vld [vmem:[%s13205_s3 + $0x1f88] sm:$0xff]  ;;  %v13223_v45 = vld [vmem:[#allocation14_spill] sm:$0xff]  ;;  %v8790_v15 = vpack.c.bf16 %v3958_v17, %v3957_v19  ;;  %v8760_v18 = vpack.c.bf16 %v3944_v60, %v3943_v27  ;;  %v3927_v7 = vld [vmem:[%s13205_s3 + $0x1e20] sm:$0xff]  ;;  %v2639_v60 = vadd.s32 7680, %v9974_v59 }
 0x2ba   :  { %v8784_v58 = vpack.c.bf16 %v3972_v34, %v3971_v62  ;;  %vm2832_vm13 = vcmp.eq.f32.partialorder %v13223_v45, %v2768_v53  ;;  %v3945_v41 = vld [vmem:[%s13205_s3 + $0x1eb0] sm:$0xff]  ;;  %v3946_v44 = vld [vmem:[%s13205_s3 + $0x1eb8] sm:$0xff]  ;;  %v3952_v24 = vld [vmem:[%s13205_s3 + $0x1ee8] sm:$0xff] }
 0x2bb   :  { %v12990_v43 = vadd.f32 %v6975_v40, %v5034_v11  ;;  %8715 = vmatpush3.bf16.msra.mxu0 %v8714_v35  ;;  %v3977_v35 = vld [vmem:[%s13205_s3 + $0x1fb0] sm:$0xff]  ;;  %v8762_v40 = vpack.c.bf16 %v3928_v21, %v3927_v7  ;;  %v3962_v11 = vld [vmem:[%s13205_s3 + $0x1f38] sm:$0xff]  ;;  %v8776_v48 = vpack.c.bf16 %v3952_v24, %v3951_v23  ;;  %v3936_v17 = vld [vmem:[%s13205_s3 + $0x1e68] sm:$0xff] }
 0x2bc   :  { %8747 = vmatpush3.bf16.msra.mxu1 %v8746_v63  ;;  %8717 = vmatprep.subr.bf16.mxu0 %v8716_v4  ;;  %v8794_v63 = vpack.c.bf16 %v3960_v37, %v3959_v6  ;;  %v8764_v4 = vpack.c.bf16 %v3946_v44, %v3945_v41  ;;  %v8796_v56 = vpack.c.bf16 %v3978_v16, %v3977_v35  ;;  %v3965_v53 = vld [vmem:[%s13205_s3 + $0x1f50] sm:$0xff]  ;;  %v3967_v27 = vld [vmem:[%s13205_s3 + $0x1f60] sm:$0xff]  ;;  %v3968_v26 = vld [vmem:[%s13205_s3 + $0x1f68] sm:$0xff]  ;;  %v2703_v16 = vand.u32 255, %v2639_v60 }
 0x2bd   :  { %8749 = vmatprep.subr.bf16.mxu1 %v8748_v46  ;;  %v3947_v46 = vld [vmem:[%s13205_s3 + $0x1ec0] sm:$0xff]  ;;  %v8798_v62 = vpack.c.bf16 %v3962_v11, %v3961_v22  ;;  %v8806_v19 = vpack.c.bf16 %v3966_v0, %v3965_v53  ;;  %v3953_v14 = vld [vmem:[%s13205_s3 + $0x1ef0] sm:$0xff]  ;;  %v3954_v45 = vld [vmem:[%s13205_s3 + $0x1ef8] sm:$0xff]  ;;  %v8810_v41 = vpack.c.bf16 %v3968_v26, %v3967_v27 }
 0x2be   :  { %v8768_v34 = vpack.c.bf16 %v3948_v61, %v3947_v46  ;;  %v3986_v7 = vld [vmem:[%s13205_s3 + $0x1ff8] sm:$0xff]  ;;  %v8780_v44 = vpack.c.bf16 %v3954_v45, %v3953_v14  ;;  %v2767_v46 = vcvt.s32.f32 %v2703_v16  ;;  %v13225_v61 = vld [vmem:[#allocation12_spill] sm:$0xff] }
 0x2bf   :  { %8719 = vmatpush3.bf16.msra.mxu0 %v8718_v51  ;;  %v3932_v51 = vld [vmem:[%s13205_s3 + $0x1e48] sm:$0xff]  ;;  %v3938_v35 = vld [vmem:[%s13205_s3 + $0x1e78] sm:$0xff] }
 0x2c0   :  { %8751 = vmatpush3.bf16.msra.mxu1 %v8750_v29  ;;  %8753 = vmatprep.subr.bf16.mxu0 %v8752_v52  ;;  %v8800_v29 = vpack.c.bf16 %v3980_v47, %v3979_v57  ;;  %v3964_v52 = vld [vmem:[%s13205_s3 + $0x1f48] sm:$0xff]  ;;  %v8770_v30 = vpack.c.bf16 %v3932_v51, %v3931_v12  ;;  %vm2831_vm15 = vcmp.eq.f32.partialorder %v13225_v61, %v2767_v46  ;;  %v13226_v57 = vld [vmem:[#allocation13_spill] sm:$0xff] }
 0x2c1   :  { %8785 = vmatprep.subr.bf16.mxu1 %v8784_v58  ;;  %v3982_v58 = vld [vmem:[%s13205_s3 + $0x1fd8] sm:$0xff]  ;;  %v8802_v28 = vpack.c.bf16 %v3964_v52, %v3963_v3 }
 0x2c2   :  { %6408 = vmatmul.mubr.msk.f32.vlgmr.msra.gmra.mrb[60].mxu0 %vm2827_vm11, %v13218_v13 }
 0x2c3   :  { %6410 = vmatmul.mubr.msk.f32.vlgmr.msra.gmra.mrb[60].mxu1 %vm2829_vm12, %v13218_v13  ;;  %8755 = vmatpush3.bf16.msra.mxu0 %v8754_v49  ;;  %v8804_v49 = vpack.c.bf16 %v3982_v58, %v3981_v38 }
 0x2c4   :  { %6411 = vmatprep.mubr.msk.f32.mxu0 %vm2832_vm13, %v13218_v13  ;;  %8787 = vmatpush3.bf16.msra.mxu1 %v8786_v1  ;;  %v3983_v1 = vld [vmem:[%s13205_s3 + $0x1fe0] sm:$0xff] }
 0x2c5   :  { %6413 = vmatprep.mubr.msk.f32.mxu1 %vm2834_vm14, %v13218_v13  ;;  %8757 = vmatprep.subr.bf16.mxu0 %v8756_v50  ;;  %v3935_v50 = vld [vmem:[%s13205_s3 + $0x1e60] sm:$0xff] }
 0x2c6   :  { %8789 = vmatprep.subr.bf16.mxu1 %v8788_v33  ;;  %v8808_v33 = vpack.c.bf16 %v3984_v8, %v3983_v1 }
 0x2c7   :  { %8759 = vmatpush3.bf16.msra.mxu0 %v8758_v20  ;;  %v2641_v20 = vadd.s32 7936, %v9974_v59  ;;  %v3937_v59 = vld [vmem:[%s13205_s3 + $0x1e70] sm:$0xff] }
 0x2c8   :  { %8791 = vmatpush3.bf16.msra.mxu1 %v8790_v15  ;;  %8761 = vmatprep.subr.bf16.mxu0 %v8760_v18  ;;  %v3985_v18 = vld [vmem:[%s13205_s3 + $0x1ff0] sm:$0xff] }
 0x2c9   :  { %8793 = vmatprep.subr.bf16.mxu1 %v8792_v36  ;;  %v8778_v36 = vpack.c.bf16 %v3936_v17, %v3935_v50  ;;  %v2705_v2 = vand.u32 255, %v2641_v20 }
 0x2cb   :  { %8763 = vmatpush3.bf16.msra.mxu0 %v8762_v40 }
 0x2cc   :  { %8795 = vmatpush3.bf16.msra.mxu1 %v8794_v63  ;;  %8765 = vmatprep.subr.bf16.mxu0 %v8764_v4  ;;  %v8812_v63 = vpack.c.bf16 %v3986_v7, %v3985_v18  ;;  %v3969_v4 = vld [vmem:[%s13205_s3 + $0x1f70] sm:$0xff]  ;;  %s6254_s3 = sld [smem:[#allocation2 + $0x2]] }
 0x2cd   :  { %8797 = vmatprep.subr.bf16.mxu1 %v8796_v56  ;;  %v8782_v56 = vpack.c.bf16 %v3938_v35, %v3937_v59  ;;  %v8814_v11 = vpack.c.bf16 %v3970_v10, %v3969_v4 }
 0x2cf   :  { %8767 = vmatpush3.bf16.msra.mxu0 %v8766_v42 }
 0x2d0   :  { %8799 = vmatpush3.bf16.msra.mxu1 %v8798_v62  ;;  %8769 = vmatprep.subr.bf16.mxu0 %v8768_v34 }
 0x2d1   :  { %8801 = vmatprep.subr.bf16.mxu1 %v8800_v29 }
 0x2d2   :  { %v6227_v10 = vstv %s6254_s3 }
 0x2d3   :  { %8771 = vmatpush3.bf16.msra.mxu0 %v8770_v30 }
 0x2d4   :  { %8803 = vmatpush3.bf16.msra.mxu1 %v8802_v28  ;;  %8773 = vmatprep.subr.bf16.mxu0 %v8772_v54 }
 0x2d5   :  { %v7008_v9 = vpop.f32.mrb[48].mxu0  ;;  %8805 = vmatprep.subr.bf16.mxu1 %v8804_v49 }
 0x2d6   :  { %v7043_v5 = vpop.f32.mrb[48].mxu1  ;;  %v7009_v15 = vpop.f32.mrb[49].mxu0 }
 0x2d7   :  { %v7010_v21 = vadd.f32 %v7009_v15, %v7008_v9  ;;  %v7044_v6 = vpop.f32.mrb[49].mxu1  ;;  %8775 = vmatpush3.bf16.msra.mxu0 %v8774_v25 }
 0x2d8   :  { %v7045_v37 = vadd.f32 %v7044_v6, %v7043_v5  ;;  %8807 = vmatpush3.bf16.msra.mxu1 %v8806_v19  ;;  %8777 = vmatprep.subr.bf16.mxu0 %v8776_v48 }
 0x2d9   :  { %v5174_v40 = vadd.f32 %v7010_v21, %v12990_v43  ;;  %8809 = vmatprep.subr.bf16.mxu1 %v8808_v33  ;;  %v2769_v43 = vcvt.s32.f32 %v2705_v2 }
 0x2db   :  { %v5244_v22 = vadd.f32 %v7045_v37, %v5174_v40  ;;  %8779 = vmatpush3.bf16.msra.mxu0 %v8778_v36  ;;  %vm2833_vm0 = vcmp.eq.f32.partialorder %v13226_v57, %v2769_v43 }
 0x2dc   :  { %8811 = vmatpush3.bf16.msra.mxu1 %v8810_v41  ;;  %8781 = vmatprep.subr.bf16.mxu0 %v8780_v44 }
 0x2dd   :  { %8813 = vmatprep.subr.bf16.mxu1 %v8812_v63 }
 0x2df   :  { %8783 = vmatpush3.bf16.msra.mxu0 %v8782_v56 }
 0x2e0   :  { %8815 = vmatpush3.bf16.msra.mxu1 %v8814_v11 }
 0x2e2   :  { %6412 = vmatmul.mubr.msk.f32.vlgmr.msra.gmra.mrb[62].mxu0 %vm2831_vm15, %v13218_v13 }
 0x2e3   :  { %6414 = vmatmul.mubr.msk.f32.vlgmr.msra.gmra.mrb[62].mxu1 %vm2833_vm0, %v13218_v13 }
 0x2f5   :  { %v7078_v47 = vpop.f32.mrb[50].mxu0 }
 0x2f6   :  { %v7113_v42 = vpop.f32.mrb[50].mxu1  ;;  %v7079_v62 = vpop.f32.mrb[51].mxu0 }
 0x2f7   :  { %v7080_v34 = vadd.f32 %v7079_v62, %v7078_v47  ;;  %v7114_v12 = vpop.f32.mrb[51].mxu1 }
 0x2f8   :  { %v7115_v51 = vadd.f32 %v7114_v12, %v7113_v42 }
 0x2f9   :  { %v5314_v3 = vadd.f32 %v7080_v34, %v5244_v22  ;;  %v6415_v22 = vld [vmem:[%s13206_s4] ss:$0 sm:$0xff] }
 0x2fb   :  { %v5384_v29 = vadd.f32 %v7115_v51, %v5314_v3 }
 0x315   :  { %v7148_v52 = vpop.f32.mrb[52].mxu0 }
 0x316   :  { %v7183_v32 = vpop.f32.mrb[52].mxu1  ;;  %v7149_v39 = vpop.f32.mrb[53].mxu0 }
 0x317   :  { %v7150_v38 = vadd.f32 %v7149_v39, %v7148_v52  ;;  %v7184_v58 = vpop.f32.mrb[53].mxu1 }
 0x318   :  { %v7185_v30 = vadd.f32 %v7184_v58, %v7183_v32 }
 0x319   :  { %v5454_v28 = vadd.f32 %v7150_v38, %v5384_v29 }
 0x31b   :  { %v5524_v54 = vadd.f32 %v7185_v30, %v5454_v28 }
 0x335   :  { %v7218_v55 = vpop.f32.mrb[54].mxu0 }
 0x336   :  { %v7253_v31 = vpop.f32.mrb[54].mxu1  ;;  %v7219_v53 = vpop.f32.mrb[55].mxu0 }
 0x337   :  { %v7220_v13 = vadd.f32 %v7219_v53, %v7218_v55  ;;  %v7254_v49 = vpop.f32.mrb[55].mxu1 }
 0x338   :  { %v7255_v0 = vadd.f32 %v7254_v49, %v7253_v31 }
 0x339   :  { %v5594_v23 = vadd.f32 %v7220_v13, %v5524_v54 }
 0x33b   :  { %v5664_v24 = vadd.f32 %v7255_v0, %v5594_v23 }
 0x355   :  { %v7288_v1 = vpop.f32.mrb[56].mxu0 }
 0x356   :  { %v7323_v8 = vpop.f32.mrb[56].mxu1  ;;  %v7289_v25 = vpop.f32.mrb[57].mxu0 }
 0x357   :  { %v7290_v19 = vadd.f32 %v7289_v25, %v7288_v1  ;;  %v7324_v48 = vpop.f32.mrb[57].mxu1 }
 0x358   :  { %v7325_v50 = vadd.f32 %v7324_v48, %v7323_v8 }
 0x359   :  { %v5734_v17 = vadd.f32 %v7290_v19, %v5664_v24 }
 0x35b   :  { %v5804_v27 = vadd.f32 %v7325_v50, %v5734_v17 }
 0x375   :  { %v7358_v60 = vpop.f32.mrb[58].mxu0 }
 0x376   :  { %v7393_v9 = vpop.f32.mrb[58].mxu1  ;;  %v7359_v33 = vpop.f32.mrb[59].mxu0 }
 0x377   :  { %v7360_v26 = vadd.f32 %v7359_v33, %v7358_v60  ;;  %v7394_v14 = vpop.f32.mrb[59].mxu1 }
 0x378   :  { %v7395_v45 = vadd.f32 %v7394_v14, %v7393_v9 }
 0x379   :  { %v5874_v20 = vadd.f32 %v7360_v26, %v5804_v27 }
 0x37b   :  { %v5944_v5 = vadd.f32 %v7395_v45, %v5874_v20 }
 0x395   :  { %v7428_v15 = vpop.f32.mrb[60].mxu0 }
 0x396   :  { %v7463_v18 = vpop.f32.mrb[60].mxu1  ;;  %v7429_v7 = vpop.f32.mrb[61].mxu0 }
 0x397   :  { %v7430_v21 = vadd.f32 %v7429_v7, %v7428_v15  ;;  %v7464_v6 = vpop.f32.mrb[61].mxu1 }
 0x398   :  { %v7465_v36 = vadd.f32 %v7464_v6, %v7463_v18 }
 0x399   :  { %v6014_v37 = vadd.f32 %v7430_v21, %v5944_v5 }
 0x39b   :  { %v6084_v41 = vadd.f32 %v7465_v36, %v6014_v37 }
 0x3b5   :  { %v7498_v44 = vpop.f32.mrb[62].mxu0 }
 0x3b6   :  { %v7533_v59 = vpop.f32.mrb[62].mxu1  ;;  %v7499_v35 = vpop.f32.mrb[63].mxu0 }
 0x3b7   :  { %v7500_v16 = vadd.f32 %v7499_v35, %v7498_v44  ;;  %v7534_v40 = vpop.f32.mrb[63].mxu1 }
 0x3b8   :  { %v7535_v63 = vadd.f32 %v7534_v40, %v7533_v59 }
 0x3b9   :  { %v6154_v4 = vadd.f32 %v7500_v16, %v6084_v41 }
 0x3bb   :  { %v6224_v2 = vadd.f32 %v7535_v63, %v6154_v4 }
 0x3bd   :  { %v6228_v56 = vmul.f32 %v6227_v10, %v6224_v2 }
 0x3bf   :  { %v6236_v11 = vadd.f32 %v6415_v22, %v6228_v56 }
 0x3c1   :  { %6237 = vst [vmem:[#allocation5] sm:$0xff] %v6236_v11 }
 0x3c2   :  { %8846 = shalt.err (!%p8843_p9)
}
 0x3c3   :  { %s8847_s12 = scalar_lea.hbm %s13207_s5, 128 }
 0x3c4   :  { %p8848_p10 = scmp.ne.s32.totalorder %s13207_s5, %s8847_s12  ;;  %p8851_p11 = scmp.lt.u32.totalorder %s8847_s12, %s13207_s5 }
 0x3c6   :  { %p8853_p12 = pnand %p8851_p11, %p8848_p10 }
 0x3c8   :  { %8856 = shalt.err (!%p8853_p12)
}
 0x3c9   :  { %6247 = dma.vmem_to_hbm [thread:$0]  %s6245_s9, 128, %s13207_s5, [#allocation3]  }
 0x3ca   :  { %8859 = dma.done.wait [#allocation3], 128  }
 0x3cb   :  { %8860 = vsyncadd [#allocation3], 4294967168 }
 0x3cc   :  { %6251 = vsyncpa [#allocation3], 1 }
 0x3cd   :  { %6252 = vsyncpa [#allocation4], 1 }

</bundles_post_ra>
